<compile_context>
chip_gen: v5e
topology: v5e:2x2
jax: 0.10.0
libtpu: 0.0.40
codegen_flags: <defaults>
</compile_context>

<pallas_src>
import functools

import jax
import jax.numpy as jnp
from jax.experimental import pallas as pl
from jax.experimental.pallas import tpu as pltpu

_CONV_CFG = ((32, 8, 4), (64, 4, 2), (64, 3, 1))   # (out_channels, kernel, stride)


def _round_up(a, m):
    return (a + m - 1) // m * m


def _conv_out(size, k, s):
    return (size - k) // s + 1


# ----------------------------------------------------------------------------
# The fused Pallas kernel: 3 convs + flatten + FC stack for one batch tile.
# ----------------------------------------------------------------------------
def _nature_cnn_kernel(*refs, dims, n_fc):
    oh0, ow0, oh1, ow1, oh2, ow2, nb = dims
    x_ref = refs[0]                                   # (hb, wb, nb, 16*C) bf16
    cw0, cb0, cw1, cb1, cw2, cb2 = refs[1:7]
    fc_refs = refs[7:7 + 2 * n_fc]
    o_ref = refs[7 + 2 * n_fc]

    sc = x_ref.shape[-1]                              # space-to-depth channels

    def mm_bias(patch, w_ref, b_ref, relu):
        acc = jnp.dot(patch, w_ref[...], preferred_element_type=jnp.float32)
        acc = acc + b_ref[...]                        # (1, O) f32 bias broadcast
        if relu:
            acc = jnp.maximum(acc, 0.0)
        return acc

    # ---- conv0: 2x2 / stride-1 conv on the 4x4 space-to-depth input ----------
    pieces = []
    for p in range(2):
        for q in range(2):
            pieces.append(x_ref[p:p + oh0, q:q + ow0, :, :])     # (oh0, ow0, nb, sc)
    patch = jnp.concatenate(pieces, axis=-1)                     # (oh0, ow0, nb, 4*sc)
    patch = patch.reshape(oh0 * ow0 * nb, 4 * sc)
    c0 = cw0.shape[-1]
    v0 = mm_bias(patch, cw0, cb0, relu=True).astype(jnp.bfloat16)
    v0 = v0.reshape(oh0, ow0, nb, c0)                            # (oh0, ow0, nb, 32)

    # ---- conv1: k4/s2 == 2x2 / stride-1 conv on a 2x2 s2d VIEW of v0 ---------
    v0r = v0.reshape(oh0 // 2, 2, ow0, nb, c0)                   # split rows (view)
    pieces = []
    for i in range(4):                                           # original kernel row
        p, rh = divmod(i, 2)
        band = v0r[p:p + oh1, rh, :, :, :]                       # (oh1, ow0, nb, c0)
        band = band.reshape(oh1, ow0 // 2, 2, nb, c0)            # split cols (view)
        for j in range(4):                                       # original kernel col
            q, rw = divmod(j, 2)
            pieces.append(band[:, q:q + ow1, rw, :, :])          # (oh1, ow1, nb, c0)
    patch = jnp.concatenate(pieces, axis=-1)                     # (oh1, ow1, nb, 16*c0)
    patch = patch.reshape(oh1 * ow1 * nb, 16 * c0)
    c1 = cw1.shape[-1]
    v1 = mm_bias(patch, cw1, cb1, relu=True).astype(jnp.bfloat16)
    v1 = v1.reshape(oh1, ow1, nb, c1)                            # (oh1, ow1, nb, 64)

    # ---- conv2: k3 / stride-1 -------------------------------------------------
    pieces = []
    for i in range(3):
        for j in range(3):
            pieces.append(v1[i:i + oh2, j:j + ow2, :, :])        # (oh2, ow2, nb, c1)
    patch = jnp.concatenate(pieces, axis=-1)                     # (oh2, ow2, nb, 9*c1)
    patch = patch.reshape(oh2 * ow2 * nb, 9 * c1)
    c2 = cw2.shape[-1]
    v2 = mm_bias(patch, cw2, cb2, relu=True).astype(jnp.bfloat16)
    v2 = v2.reshape(oh2, ow2, nb, c2)                            # (oh2, ow2, nb, 64)

    # ---- flatten to per-image (h, w, c) features + fused FC stack -------------
    feats = jnp.concatenate(
        [v2[i, j, :, :] for i in range(oh2) for j in range(ow2)], axis=-1)
    h = feats                                                    # (nb, oh2*ow2*c2) bf16
    for l in range(n_fc):
        w_ref, b_ref = fc_refs[2 * l], fc_refs[2 * l + 1]
        h = mm_bias(h, w_ref, b_ref, relu=(l != n_fc - 1))
        if l != n_fc - 1:
            h = h.astype(jnp.bfloat16)
        # nn.Dropout(p=0.0) between hidden FC layers is the identity.
    o_ref[...] = h.astype(o_ref.dtype)


# ----------------------------------------------------------------------------
# Generation-aware batch tiling / VMEM budget (review items #2-#5, #7).
# ----------------------------------------------------------------------------
def _select_tiling(n_batch):
    try:
        kind = jax.devices()[0].device_kind.lower()
    except Exception:                                 # pragma: no cover
        kind = ""
    is_v7 = "v7" in kind
    nb_cap = 16 if is_v7 else 32                      # ~0.8 MB VMEM per image @ 84x84
    vmem_limit = (48 if is_v7 else 64) * 1024 * 1024  # v7x: 64 MiB physical VMEM
    n16 = _round_up(max(int(n_batch), 1), 16)         # nb multiple of 16: bf16 sublane
    nb = min(nb_cap, n16)                             #   packing -> view-like reshapes
    if is_v7 and n16 >= 32 and n16 // nb < 2:
        nb = 16                                       # >=2 grid steps -> both v7x TCs run
    n_pad = _round_up(n16, nb)
    return nb, n_pad, vmem_limit


# ----------------------------------------------------------------------------
# Forward pass
# ----------------------------------------------------------------------------
def nature_cnn_forward(prepared, x):
    """x: (N, C, H, W) float32 -> (N, out_dim) float32."""
    n, c, hh, ww = x.shape
    assert hh % 8 == 4 and ww % 8 == 4 and hh >= 36 and ww >= 36, (
        "fused space-to-depth conv path needs in_dim % 8 == 4 (e.g. 36, 84)")
    hb, wb = hh // 4, ww // 4
    oh0, ow0 = hb - 1, wb - 1                          # == (H-8)//4 + 1 for H % 4 == 0
    oh1, ow1 = _conv_out(oh0, 4, 2), _conv_out(ow0, 4, 2)
    oh2, ow2 = _conv_out(oh1, 3, 1), _conv_out(ow1, 3, 1)

    conv_ws, conv_bs = prepared["conv_ws"], prepared["conv_bs"]
    fc_ws, fc_bs = prepared["fc_ws"], prepared["fc_bs"]
    n_fc = len(fc_ws)
    out_dim = fc_ws[-1].shape[1]

    nb, n_pad, vmem_limit = _select_tiling(n)

    # Single XLA-side layout transform: NCHW f32 -> 4x4 space-to-depth, batch on
    # the sublane dim, bf16:  xs[hb, wb, n, (rh, rw, c)] = x[n, c, 4*hb+rh, 4*wb+rw].
    xp = jnp.pad(x, ((0, n_pad - n), (0, 0), (0, 0), (0, 0)))
    xs = xp.reshape(n_pad, c, hb, 4, wb, 4)
    xs = jnp.transpose(xs, (2, 4, 0, 3, 5, 1)).reshape(hb, wb, n_pad, 16 * c)
    xs = xs.astype(jnp.bfloat16)

    args = [xs]
    in_specs = [pl.BlockSpec((hb, wb, nb, 16 * c), lambda i: (0, 0, i, 0))]
    for w, b in zip(list(conv_ws) + list(fc_ws), list(conv_bs) + list(fc_bs)):
        pass  # (zip below keeps conv/fc interleaving explicit)
    for w, b in zip(conv_ws, conv_bs):
        in_specs.append(pl.BlockSpec(w.shape, lambda i: (0, 0)))   # VMEM-resident weight
        in_specs.append(pl.BlockSpec(b.shape, lambda i: (0, 0)))
        args += [w, b]
    for w, b in zip(fc_ws, fc_bs):
        in_specs.append(pl.BlockSpec(w.shape, lambda i: (0, 0)))
        in_specs.append(pl.BlockSpec(b.shape, lambda i: (0, 0)))
        args += [w, b]

    dims = (oh0, ow0, oh1, ow1, oh2, ow2, nb)
    out = pl.pallas_call(
        functools.partial(_nature_cnn_kernel, dims=dims, n_fc=n_fc),
        out_shape=jax.ShapeDtypeStruct((n_pad, out_dim), jnp.float32),
        grid=(n_pad // nb,),
        in_specs=in_specs,
        out_specs=pl.BlockSpec((nb, out_dim), lambda i: (i, 0)),
        compiler_params=pltpu.CompilerParams(
            dimension_semantics=("parallel",),
            vmem_limit_bytes=vmem_limit),
    )(*args)
    return out[:n]


# ----------------------------------------------------------------------------
# Parameters: PyTorch-layout init + one-time repack into kernel layouts
# ----------------------------------------------------------------------------
def init_params(key, in_channels, in_dim, out_dim, fc_layers=(128, 128)):
    def uniform(k, shape, fan_in):
        bound = 1.0 / jnp.sqrt(fan_in)
        return jax.random.uniform(k, shape, jnp.float32, -bound, bound)

    keys = jax.random.split(key, 16)
    params = {}
    ci = in_channels
    for idx, (co, k, _) in enumerate(_CONV_CFG):
        fan_in = ci * k * k
        params[f"conv{idx}_w"] = uniform(keys[2 * idx], (co, ci, k, k), fan_in)
        params[f"conv{idx}_b"] = uniform(keys[2 * idx + 1], (co,), fan_in)
        ci = co

    h, w = in_dim
    for (_, k, s) in _CONV_CFG:
        h, w = _conv_out(h, k, s), _conv_out(w, k, s)
    n_flatten = _CONV_CFG[-1][0] * h * w

    dims = [n_flatten, *fc_layers, out_dim]
    for idx in range(len(dims) - 1):
        fi, fo = dims[idx], dims[idx + 1]
        params[f"fc{idx}_w"] = uniform(keys[6 + 2 * idx], (fo, fi), fi)
        params[f"fc{idx}_b"] = uniform(keys[7 + 2 * idx], (fo,), fi)
    params["_n_fc"] = len(dims) - 1
    return params


def prepare_params(params, in_dim):
    """One-time repack (no per-call weight transposes), all MXU inputs bf16:
       conv0 OIHW -> rows ordered (p, q, rh, rw, c) to match the s2d patch build,
       conv1/conv2 OIHW -> (kh*kw*C, O), FC (out, in) -> (in, out); fc0 rows are
       permuted from torch's channel-major (c, h, w) flatten to (h, w, c)."""
    h, w = in_dim
    c_in = params["conv0_w"].shape[1]

    # conv0: original kernel position (u, v) = (4p + rh, 4q + rw).
    w0 = params["conv0_w"]                                   # (32, C, 8, 8)
    o0 = w0.shape[0]
    w0 = w0.reshape(o0, c_in, 2, 4, 2, 4)                    # (o, c, p, rh, q, rw)
    w0 = jnp.transpose(w0, (2, 4, 3, 5, 1, 0)).reshape(4 * 16 * c_in, o0)
    conv_ws = [w0.astype(jnp.bfloat16)]
    conv_bs = [params["conv0_b"].reshape(1, -1).astype(jnp.float32)]

    for idx in (1, 2):
        cw = params[f"conv{idx}_w"]                          # (O, C, k, k)
        o, ci, k, _ = cw.shape
        wp = jnp.transpose(cw, (2, 3, 1, 0)).reshape(k * k * ci, o)
        conv_ws.append(wp.astype(jnp.bfloat16))
        conv_bs.append(params[f"conv{idx}_b"].reshape(1, -1).astype(jnp.float32))

    hh, ww = h, w
    for (_, k, s) in _CONV_CFG:
        hh, ww = _conv_out(hh, k, s), _conv_out(ww, k, s)
    c_last = _CONV_CFG[-1][0]

    n_fc = params["_n_fc"]
    fc_ws, fc_bs = [], []
    w_fc0 = params["fc0_w"]                                  # (out0, c_last*hh*ww), (c,h,w)
    out0 = w_fc0.shape[0]
    w_fc0 = w_fc0.reshape(out0, c_last, hh, ww)
    w_fc0 = jnp.transpose(w_fc0, (2, 3, 1, 0)).reshape(hh * ww * c_last, out0)
    fc_ws.append(w_fc0.astype(jnp.bfloat16))
    fc_bs.append(params["fc0_b"].reshape(1, -1).astype(jnp.float32))
    for idx in range(1, n_fc):
        fc_ws.append(params[f"fc{idx}_w"].T.astype(jnp.bfloat16))
        fc_bs.append(params[f"fc{idx}_b"].reshape(1, -1).astype(jnp.float32))
    return {"conv_ws": conv_ws, "conv_bs": conv_bs, "fc_ws": fc_ws, "fc_bs": fc_bs}


# ----------------------------------------------------------------------------
# Pure-JAX f32 reference (PyTorch semantics) for the correctness check
# ----------------------------------------------------------------------------
def reference_forward(params, x):
    def conv(x, w, b, stride):
        y = jax.lax.conv_general_dilated(
            x, w, window_strides=(stride, stride), padding="VALID",
            dimension_numbers=("NCHW", "OIHW", "NCHW"))
        return jnp.maximum(y + b.reshape(1, -1, 1, 1), 0.0)

    x = conv(x, params["conv0_w"], params["conv0_b"], 4)
    x = conv(x, params["conv1_w"], params["conv1_b"], 2)
    x = conv(x, params["conv2_w"], params["conv2_b"], 1)
    x = x.reshape(x.shape[0], -1)
    n_fc = params["_n_fc"]
    for idx in range(n_fc):
        x = x @ params[f"fc{idx}_w"].T + params[f"fc{idx}_b"]
        if idx != n_fc - 1:
            x = jnp.maximum(x, 0.0)
    return x


if __name__ == "__main__":
    # Smallest input on this kernel's fast path (dim % 8 == 4): 36x36.
    batch, in_channels, out_dim = 2, 4, 8
    in_dim = (36, 36)

    key = jax.random.PRNGKey(0)
    pkey, xkey = jax.random.split(key)
    params = init_params(pkey, in_channels, in_dim, out_dim)
    prepared = prepare_params(params, in_dim)
    x = jax.random.normal(xkey, (batch, in_channels, *in_dim), jnp.float32)

    fwd = jax.jit(nature_cnn_forward)
    out = jax.block_until_ready(fwd(prepared, x))

    ref = jax.block_until_ready(reference_forward(params, x))
    assert out.shape == (batch, out_dim)
    # bf16 matmul inputs + f32 accumulation => loose-but-meaningful tolerance.
    assert jnp.allclose(out, ref, atol=5e-2, rtol=5e-2), (
        "mismatch vs JAX reference: max abs err "
        f"{float(jnp.max(jnp.abs(out - ref)))}")

    print("KERNEL_OK")
</pallas_src>

<mosaic_0001>
module attributes {stable_mosaic.version = 11 : i64} {
  func.func @_nature_cnn_kernel(%arg0: i32, %arg1: memref<9x9x16x64xbf16, #tpu.memory_space<vmem>>, %arg2: memref<256x32xbf16, #tpu.memory_space<vmem>>, %arg3: memref<1x32xf32, #tpu.memory_space<vmem>>, %arg4: memref<512x64xbf16, #tpu.memory_space<vmem>>, %arg5: memref<1x64xf32, #tpu.memory_space<vmem>>, %arg6: memref<576x64xbf16, #tpu.memory_space<vmem>>, %arg7: memref<1x64xf32, #tpu.memory_space<vmem>>, %arg8: memref<64x128xbf16, #tpu.memory_space<vmem>>, %arg9: memref<1x128xf32, #tpu.memory_space<vmem>>, %arg10: memref<128x128xbf16, #tpu.memory_space<vmem>>, %arg11: memref<1x128xf32, #tpu.memory_space<vmem>>, %arg12: memref<128x8xbf16, #tpu.memory_space<vmem>>, %arg13: memref<1x8xf32, #tpu.memory_space<vmem>>, %arg14: memref<16x8xf32, #tpu.memory_space<vmem>>) attributes {dimension_semantics = [#tpu.dimension_semantics<parallel>], iteration_bounds = array<i64: 1>, scalar_prefetch = 0 : i64, scratch_operands = 0 : i64, tpu.core_type = #tpu.core_type<tc>, window_params = [{transform_indices = @transform_0, window_bounds = array<i64: 9, 9, 16, 64>}, {pipeline_mode = #tpu.pipeline_mode<synchronous>, transform_indices = @transform_1, window_bounds = array<i64: 256, 32>}, {pipeline_mode = #tpu.pipeline_mode<synchronous>, transform_indices = @transform_2, window_bounds = array<i64: 1, 32>}, {pipeline_mode = #tpu.pipeline_mode<synchronous>, transform_indices = @transform_3, window_bounds = array<i64: 512, 64>}, {pipeline_mode = #tpu.pipeline_mode<synchronous>, transform_indices = @transform_4, window_bounds = array<i64: 1, 64>}, {pipeline_mode = #tpu.pipeline_mode<synchronous>, transform_indices = @transform_5, window_bounds = array<i64: 576, 64>}, {pipeline_mode = #tpu.pipeline_mode<synchronous>, transform_indices = @transform_6, window_bounds = array<i64: 1, 64>}, {pipeline_mode = #tpu.pipeline_mode<synchronous>, transform_indices = @transform_7, window_bounds = array<i64: 64, 128>}, {pipeline_mode = #tpu.pipeline_mode<synchronous>, transform_indices = @transform_8, window_bounds = array<i64: 1, 128>}, {pipeline_mode = #tpu.pipeline_mode<synchronous>, transform_indices = @transform_9, window_bounds = array<i64: 128, 128>}, {pipeline_mode = #tpu.pipeline_mode<synchronous>, transform_indices = @transform_10, window_bounds = array<i64: 1, 128>}, {pipeline_mode = #tpu.pipeline_mode<synchronous>, transform_indices = @transform_11, window_bounds = array<i64: 128, 8>}, {pipeline_mode = #tpu.pipeline_mode<synchronous>, transform_indices = @transform_12, window_bounds = array<i64: 1, 8>}, {transform_indices = @transform_13, window_bounds = array<i64: 16, 8>}]} {
    %c0 = arith.constant 0 : index
    %c0_0 = arith.constant 0 : index
    %c0_1 = arith.constant 0 : index
    %c0_2 = arith.constant 0 : index
    %0 = vector.load %arg1[%c0, %c0_0, %c0_1, %c0_2] : memref<9x9x16x64xbf16, #tpu.memory_space<vmem>>, vector<8x8x16x64xbf16>
    %c0_3 = arith.constant 0 : index
    %c1 = arith.constant 1 : index
    %c0_4 = arith.constant 0 : index
    %c0_5 = arith.constant 0 : index
    %1 = vector.load %arg1[%c0_3, %c1, %c0_4, %c0_5] : memref<9x9x16x64xbf16, #tpu.memory_space<vmem>>, vector<8x8x16x64xbf16>
    %c1_6 = arith.constant 1 : index
    %c0_7 = arith.constant 0 : index
    %c0_8 = arith.constant 0 : index
    %c0_9 = arith.constant 0 : index
    %2 = vector.load %arg1[%c1_6, %c0_7, %c0_8, %c0_9] : memref<9x9x16x64xbf16, #tpu.memory_space<vmem>>, vector<8x8x16x64xbf16>
    %c1_10 = arith.constant 1 : index
    %c1_11 = arith.constant 1 : index
    %c0_12 = arith.constant 0 : index
    %c0_13 = arith.constant 0 : index
    %3 = vector.load %arg1[%c1_10, %c1_11, %c0_12, %c0_13] : memref<9x9x16x64xbf16, #tpu.memory_space<vmem>>, vector<8x8x16x64xbf16>
    %4 = tpu.concatenate %0, %1, %2, %3 in 3 : vector<8x8x16x64xbf16>, vector<8x8x16x64xbf16>, vector<8x8x16x64xbf16>, vector<8x8x16x64xbf16> -> vector<8x8x16x256xbf16>
    %5 = vector.shape_cast %4 : vector<8x8x16x256xbf16> to vector<1024x256xbf16>
    %c0_14 = arith.constant 0 : index
    %c0_15 = arith.constant 0 : index
    %6 = vector.load %arg2[%c0_14, %c0_15] : memref<256x32xbf16, #tpu.memory_space<vmem>>, vector<256x32xbf16>
    %cst = arith.constant dense<0.000000e+00> : vector<1024x32xf32>
    %7 = tpu.matmul %5, %6, %cst {dimension_numbers = #tpu.dot_dimension_numbers<[1], [0], [0], [1], [0, 0, 1, 1], [], []>} : vector<1024x256xbf16>, vector<256x32xbf16>, vector<1024x32xf32> -> vector<1024x32xf32>
    %c0_16 = arith.constant 0 : index
    %c0_17 = arith.constant 0 : index
    %8 = vector.load %arg3[%c0_16, %c0_17] : memref<1x32xf32, #tpu.memory_space<vmem>>, vector<1x32xf32>
    %9 = vector.broadcast %8 : vector<1x32xf32> to vector<1024x32xf32>
    %10 = arith.addf %7, %9 : vector<1024x32xf32>
    %cst_18 = arith.constant 0.000000e+00 : f32
    %11 = vector.broadcast %cst_18 : f32 to vector<1024x32xf32>
    %12 = arith.maximumf %10, %11 : vector<1024x32xf32>
    %13 = arith.truncf %12 : vector<1024x32xf32> to vector<1024x32xbf16>
    %14 = vector.shape_cast %13 : vector<1024x32xbf16> to vector<8x8x16x32xbf16>
    %15 = vector.shape_cast %14 : vector<8x8x16x32xbf16> to vector<4x2x8x16x32xbf16>
    %16 = vector.extract_strided_slice %15 {offsets = [0, 0, 0, 0, 0], sizes = [3, 1, 8, 16, 32], strides = [1, 1, 1, 1, 1]} : vector<4x2x8x16x32xbf16> to vector<3x1x8x16x32xbf16>
    %17 = vector.shape_cast %16 : vector<3x1x8x16x32xbf16> to vector<3x8x16x32xbf16>
    %18 = vector.shape_cast %17 : vector<3x8x16x32xbf16> to vector<3x4x2x16x32xbf16>
    %19 = vector.extract_strided_slice %18 {offsets = [0, 0, 0, 0, 0], sizes = [3, 3, 1, 16, 32], strides = [1, 1, 1, 1, 1]} : vector<3x4x2x16x32xbf16> to vector<3x3x1x16x32xbf16>
    %20 = vector.shape_cast %19 : vector<3x3x1x16x32xbf16> to vector<3x3x16x32xbf16>
    %21 = vector.extract_strided_slice %18 {offsets = [0, 0, 1, 0, 0], sizes = [3, 3, 1, 16, 32], strides = [1, 1, 1, 1, 1]} : vector<3x4x2x16x32xbf16> to vector<3x3x1x16x32xbf16>
    %22 = vector.shape_cast %21 : vector<3x3x1x16x32xbf16> to vector<3x3x16x32xbf16>
    %23 = vector.extract_strided_slice %18 {offsets = [0, 1, 0, 0, 0], sizes = [3, 3, 1, 16, 32], strides = [1, 1, 1, 1, 1]} : vector<3x4x2x16x32xbf16> to vector<3x3x1x16x32xbf16>
    %24 = vector.shape_cast %23 : vector<3x3x1x16x32xbf16> to vector<3x3x16x32xbf16>
    %25 = vector.extract_strided_slice %18 {offsets = [0, 1, 1, 0, 0], sizes = [3, 3, 1, 16, 32], strides = [1, 1, 1, 1, 1]} : vector<3x4x2x16x32xbf16> to vector<3x3x1x16x32xbf16>
    %26 = vector.shape_cast %25 : vector<3x3x1x16x32xbf16> to vector<3x3x16x32xbf16>
    %27 = vector.extract_strided_slice %15 {offsets = [0, 1, 0, 0, 0], sizes = [3, 1, 8, 16, 32], strides = [1, 1, 1, 1, 1]} : vector<4x2x8x16x32xbf16> to vector<3x1x8x16x32xbf16>
    %28 = vector.shape_cast %27 : vector<3x1x8x16x32xbf16> to vector<3x8x16x32xbf16>
    %29 = vector.shape_cast %28 : vector<3x8x16x32xbf16> to vector<3x4x2x16x32xbf16>
    %30 = vector.extract_strided_slice %29 {offsets = [0, 0, 0, 0, 0], sizes = [3, 3, 1, 16, 32], strides = [1, 1, 1, 1, 1]} : vector<3x4x2x16x32xbf16> to vector<3x3x1x16x32xbf16>
    %31 = vector.shape_cast %30 : vector<3x3x1x16x32xbf16> to vector<3x3x16x32xbf16>
    %32 = vector.extract_strided_slice %29 {offsets = [0, 0, 1, 0, 0], sizes = [3, 3, 1, 16, 32], strides = [1, 1, 1, 1, 1]} : vector<3x4x2x16x32xbf16> to vector<3x3x1x16x32xbf16>
    %33 = vector.shape_cast %32 : vector<3x3x1x16x32xbf16> to vector<3x3x16x32xbf16>
    %34 = vector.extract_strided_slice %29 {offsets = [0, 1, 0, 0, 0], sizes = [3, 3, 1, 16, 32], strides = [1, 1, 1, 1, 1]} : vector<3x4x2x16x32xbf16> to vector<3x3x1x16x32xbf16>
    %35 = vector.shape_cast %34 : vector<3x3x1x16x32xbf16> to vector<3x3x16x32xbf16>
    %36 = vector.extract_strided_slice %29 {offsets = [0, 1, 1, 0, 0], sizes = [3, 3, 1, 16, 32], strides = [1, 1, 1, 1, 1]} : vector<3x4x2x16x32xbf16> to vector<3x3x1x16x32xbf16>
    %37 = vector.shape_cast %36 : vector<3x3x1x16x32xbf16> to vector<3x3x16x32xbf16>
    %38 = vector.extract_strided_slice %15 {offsets = [1, 0, 0, 0, 0], sizes = [3, 1, 8, 16, 32], strides = [1, 1, 1, 1, 1]} : vector<4x2x8x16x32xbf16> to vector<3x1x8x16x32xbf16>
    %39 = vector.shape_cast %38 : vector<3x1x8x16x32xbf16> to vector<3x8x16x32xbf16>
    %40 = vector.shape_cast %39 : vector<3x8x16x32xbf16> to vector<3x4x2x16x32xbf16>
    %41 = vector.extract_strided_slice %40 {offsets = [0, 0, 0, 0, 0], sizes = [3, 3, 1, 16, 32], strides = [1, 1, 1, 1, 1]} : vector<3x4x2x16x32xbf16> to vector<3x3x1x16x32xbf16>
    %42 = vector.shape_cast %41 : vector<3x3x1x16x32xbf16> to vector<3x3x16x32xbf16>
    %43 = vector.extract_strided_slice %40 {offsets = [0, 0, 1, 0, 0], sizes = [3, 3, 1, 16, 32], strides = [1, 1, 1, 1, 1]} : vector<3x4x2x16x32xbf16> to vector<3x3x1x16x32xbf16>
    %44 = vector.shape_cast %43 : vector<3x3x1x16x32xbf16> to vector<3x3x16x32xbf16>
    %45 = vector.extract_strided_slice %40 {offsets = [0, 1, 0, 0, 0], sizes = [3, 3, 1, 16, 32], strides = [1, 1, 1, 1, 1]} : vector<3x4x2x16x32xbf16> to vector<3x3x1x16x32xbf16>
    %46 = vector.shape_cast %45 : vector<3x3x1x16x32xbf16> to vector<3x3x16x32xbf16>
    %47 = vector.extract_strided_slice %40 {offsets = [0, 1, 1, 0, 0], sizes = [3, 3, 1, 16, 32], strides = [1, 1, 1, 1, 1]} : vector<3x4x2x16x32xbf16> to vector<3x3x1x16x32xbf16>
    %48 = vector.shape_cast %47 : vector<3x3x1x16x32xbf16> to vector<3x3x16x32xbf16>
    %49 = vector.extract_strided_slice %15 {offsets = [1, 1, 0, 0, 0], sizes = [3, 1, 8, 16, 32], strides = [1, 1, 1, 1, 1]} : vector<4x2x8x16x32xbf16> to vector<3x1x8x16x32xbf16>
    %50 = vector.shape_cast %49 : vector<3x1x8x16x32xbf16> to vector<3x8x16x32xbf16>
    %51 = vector.shape_cast %50 : vector<3x8x16x32xbf16> to vector<3x4x2x16x32xbf16>
    %52 = vector.extract_strided_slice %51 {offsets = [0, 0, 0, 0, 0], sizes = [3, 3, 1, 16, 32], strides = [1, 1, 1, 1, 1]} : vector<3x4x2x16x32xbf16> to vector<3x3x1x16x32xbf16>
    %53 = vector.shape_cast %52 : vector<3x3x1x16x32xbf16> to vector<3x3x16x32xbf16>
    %54 = vector.extract_strided_slice %51 {offsets = [0, 0, 1, 0, 0], sizes = [3, 3, 1, 16, 32], strides = [1, 1, 1, 1, 1]} : vector<3x4x2x16x32xbf16> to vector<3x3x1x16x32xbf16>
    %55 = vector.shape_cast %54 : vector<3x3x1x16x32xbf16> to vector<3x3x16x32xbf16>
    %56 = vector.extract_strided_slice %51 {offsets = [0, 1, 0, 0, 0], sizes = [3, 3, 1, 16, 32], strides = [1, 1, 1, 1, 1]} : vector<3x4x2x16x32xbf16> to vector<3x3x1x16x32xbf16>
    %57 = vector.shape_cast %56 : vector<3x3x1x16x32xbf16> to vector<3x3x16x32xbf16>
    %58 = vector.extract_strided_slice %51 {offsets = [0, 1, 1, 0, 0], sizes = [3, 3, 1, 16, 32], strides = [1, 1, 1, 1, 1]} : vector<3x4x2x16x32xbf16> to vector<3x3x1x16x32xbf16>
    %59 = vector.shape_cast %58 : vector<3x3x1x16x32xbf16> to vector<3x3x16x32xbf16>
    %60 = tpu.concatenate %20, %22, %24, %26, %31, %33, %35, %37, %42, %44, %46, %48, %53, %55, %57, %59 in 3 : vector<3x3x16x32xbf16>, vector<3x3x16x32xbf16>, vector<3x3x16x32xbf16>, vector<3x3x16x32xbf16>, vector<3x3x16x32xbf16>, vector<3x3x16x32xbf16>, vector<3x3x16x32xbf16>, vector<3x3x16x32xbf16>, vector<3x3x16x32xbf16>, vector<3x3x16x32xbf16>, vector<3x3x16x32xbf16>, vector<3x3x16x32xbf16>, vector<3x3x16x32xbf16>, vector<3x3x16x32xbf16>, vector<3x3x16x32xbf16>, vector<3x3x16x32xbf16> -> vector<3x3x16x512xbf16>
    %61 = vector.shape_cast %60 : vector<3x3x16x512xbf16> to vector<144x512xbf16>
    %c0_19 = arith.constant 0 : index
    %c0_20 = arith.constant 0 : index
    %62 = vector.load %arg4[%c0_19, %c0_20] : memref<512x64xbf16, #tpu.memory_space<vmem>>, vector<512x64xbf16>
    %cst_21 = arith.constant dense<0.000000e+00> : vector<144x64xf32>
    %63 = tpu.matmul %61, %62, %cst_21 {dimension_numbers = #tpu.dot_dimension_numbers<[1], [0], [0], [1], [0, 0, 1, 1], [], []>} : vector<144x512xbf16>, vector<512x64xbf16>, vector<144x64xf32> -> vector<144x64xf32>
    %c0_22 = arith.constant 0 : index
    %c0_23 = arith.constant 0 : index
    %64 = vector.load %arg5[%c0_22, %c0_23] : memref<1x64xf32, #tpu.memory_space<vmem>>, vector<1x64xf32>
    %65 = vector.broadcast %64 : vector<1x64xf32> to vector<144x64xf32>
    %66 = arith.addf %63, %65 : vector<144x64xf32>
    %cst_24 = arith.constant 0.000000e+00 : f32
    %67 = vector.broadcast %cst_24 : f32 to vector<144x64xf32>
    %68 = arith.maximumf %66, %67 : vector<144x64xf32>
    %69 = arith.truncf %68 : vector<144x64xf32> to vector<144x64xbf16>
    %70 = vector.shape_cast %69 : vector<144x64xbf16> to vector<3x3x16x64xbf16>
    %71 = vector.extract_strided_slice %70 {offsets = [0, 0, 0, 0], sizes = [1, 1, 16, 64], strides = [1, 1, 1, 1]} : vector<3x3x16x64xbf16> to vector<1x1x16x64xbf16>
    %72 = vector.extract_strided_slice %70 {offsets = [0, 1, 0, 0], sizes = [1, 1, 16, 64], strides = [1, 1, 1, 1]} : vector<3x3x16x64xbf16> to vector<1x1x16x64xbf16>
    %73 = vector.extract_strided_slice %70 {offsets = [0, 2, 0, 0], sizes = [1, 1, 16, 64], strides = [1, 1, 1, 1]} : vector<3x3x16x64xbf16> to vector<1x1x16x64xbf16>
    %74 = vector.extract_strided_slice %70 {offsets = [1, 0, 0, 0], sizes = [1, 1, 16, 64], strides = [1, 1, 1, 1]} : vector<3x3x16x64xbf16> to vector<1x1x16x64xbf16>
    %75 = vector.extract_strided_slice %70 {offsets = [1, 1, 0, 0], sizes = [1, 1, 16, 64], strides = [1, 1, 1, 1]} : vector<3x3x16x64xbf16> to vector<1x1x16x64xbf16>
    %76 = vector.extract_strided_slice %70 {offsets = [1, 2, 0, 0], sizes = [1, 1, 16, 64], strides = [1, 1, 1, 1]} : vector<3x3x16x64xbf16> to vector<1x1x16x64xbf16>
    %77 = vector.extract_strided_slice %70 {offsets = [2, 0, 0, 0], sizes = [1, 1, 16, 64], strides = [1, 1, 1, 1]} : vector<3x3x16x64xbf16> to vector<1x1x16x64xbf16>
    %78 = vector.extract_strided_slice %70 {offsets = [2, 1, 0, 0], sizes = [1, 1, 16, 64], strides = [1, 1, 1, 1]} : vector<3x3x16x64xbf16> to vector<1x1x16x64xbf16>
    %79 = vector.extract_strided_slice %70 {offsets = [2, 2, 0, 0], sizes = [1, 1, 16, 64], strides = [1, 1, 1, 1]} : vector<3x3x16x64xbf16> to vector<1x1x16x64xbf16>
    %80 = tpu.concatenate %71, %72, %73, %74, %75, %76, %77, %78, %79 in 3 : vector<1x1x16x64xbf16>, vector<1x1x16x64xbf16>, vector<1x1x16x64xbf16>, vector<1x1x16x64xbf16>, vector<1x1x16x64xbf16>, vector<1x1x16x64xbf16>, vector<1x1x16x64xbf16>, vector<1x1x16x64xbf16>, vector<1x1x16x64xbf16> -> vector<1x1x16x576xbf16>
    %81 = vector.shape_cast %80 : vector<1x1x16x576xbf16> to vector<16x576xbf16>
    %c0_25 = arith.constant 0 : index
    %c0_26 = arith.constant 0 : index
    %82 = vector.load %arg6[%c0_25, %c0_26] : memref<576x64xbf16, #tpu.memory_space<vmem>>, vector<576x64xbf16>
    %cst_27 = arith.constant dense<0.000000e+00> : vector<16x64xf32>
    %83 = tpu.matmul %81, %82, %cst_27 {dimension_numbers = #tpu.dot_dimension_numbers<[1], [0], [0], [1], [0, 0, 1, 1], [], []>} : vector<16x576xbf16>, vector<576x64xbf16>, vector<16x64xf32> -> vector<16x64xf32>
    %c0_28 = arith.constant 0 : index
    %c0_29 = arith.constant 0 : index
    %84 = vector.load %arg7[%c0_28, %c0_29] : memref<1x64xf32, #tpu.memory_space<vmem>>, vector<1x64xf32>
    %85 = vector.broadcast %84 : vector<1x64xf32> to vector<16x64xf32>
    %86 = arith.addf %83, %85 : vector<16x64xf32>
    %cst_30 = arith.constant 0.000000e+00 : f32
    %87 = vector.broadcast %cst_30 : f32 to vector<16x64xf32>
    %88 = arith.maximumf %86, %87 : vector<16x64xf32>
    %89 = arith.truncf %88 : vector<16x64xf32> to vector<16x64xbf16>
    %90 = vector.shape_cast %89 : vector<16x64xbf16> to vector<1x1x16x64xbf16>
    %91 = vector.shape_cast %90 : vector<1x1x16x64xbf16> to vector<16x64xbf16>
    %c0_31 = arith.constant 0 : index
    %c0_32 = arith.constant 0 : index
    %92 = vector.load %arg8[%c0_31, %c0_32] : memref<64x128xbf16, #tpu.memory_space<vmem>>, vector<64x128xbf16>
    %cst_33 = arith.constant dense<0.000000e+00> : vector<16x128xf32>
    %93 = tpu.matmul %91, %92, %cst_33 {dimension_numbers = #tpu.dot_dimension_numbers<[1], [0], [0], [1], [0, 0, 1, 1], [], []>} : vector<16x64xbf16>, vector<64x128xbf16>, vector<16x128xf32> -> vector<16x128xf32>
    %c0_34 = arith.constant 0 : index
    %c0_35 = arith.constant 0 : index
    %94 = vector.load %arg9[%c0_34, %c0_35] : memref<1x128xf32, #tpu.memory_space<vmem>>, vector<1x128xf32>
    %95 = vector.broadcast %94 : vector<1x128xf32> to vector<16x128xf32>
    %96 = arith.addf %93, %95 : vector<16x128xf32>
    %cst_36 = arith.constant 0.000000e+00 : f32
    %97 = vector.broadcast %cst_36 : f32 to vector<16x128xf32>
    %98 = arith.maximumf %96, %97 : vector<16x128xf32>
    %99 = arith.truncf %98 : vector<16x128xf32> to vector<16x128xbf16>
    %c0_37 = arith.constant 0 : index
    %c0_38 = arith.constant 0 : index
    %100 = vector.load %arg10[%c0_37, %c0_38] : memref<128x128xbf16, #tpu.memory_space<vmem>>, vector<128x128xbf16>
    %cst_39 = arith.constant dense<0.000000e+00> : vector<16x128xf32>
    %101 = tpu.matmul %99, %100, %cst_39 {dimension_numbers = #tpu.dot_dimension_numbers<[1], [0], [0], [1], [0, 0, 1, 1], [], []>} : vector<16x128xbf16>, vector<128x128xbf16>, vector<16x128xf32> -> vector<16x128xf32>
    %c0_40 = arith.constant 0 : index
    %c0_41 = arith.constant 0 : index
    %102 = vector.load %arg11[%c0_40, %c0_41] : memref<1x128xf32, #tpu.memory_space<vmem>>, vector<1x128xf32>
    %103 = vector.broadcast %102 : vector<1x128xf32> to vector<16x128xf32>
    %104 = arith.addf %101, %103 : vector<16x128xf32>
    %cst_42 = arith.constant 0.000000e+00 : f32
    %105 = vector.broadcast %cst_42 : f32 to vector<16x128xf32>
    %106 = arith.maximumf %104, %105 : vector<16x128xf32>
    %107 = arith.truncf %106 : vector<16x128xf32> to vector<16x128xbf16>
    %c0_43 = arith.constant 0 : index
    %c0_44 = arith.constant 0 : index
    %108 = vector.load %arg12[%c0_43, %c0_44] : memref<128x8xbf16, #tpu.memory_space<vmem>>, vector<128x8xbf16>
    %cst_45 = arith.constant dense<0.000000e+00> : vector<16x8xf32>
    %109 = tpu.matmul %107, %108, %cst_45 {dimension_numbers = #tpu.dot_dimension_numbers<[1], [0], [0], [1], [0, 0, 1, 1], [], []>} : vector<16x128xbf16>, vector<128x8xbf16>, vector<16x8xf32> -> vector<16x8xf32>
    %c0_46 = arith.constant 0 : index
    %c0_47 = arith.constant 0 : index
    %110 = vector.load %arg13[%c0_46, %c0_47] : memref<1x8xf32, #tpu.memory_space<vmem>>, vector<1x8xf32>
    %111 = vector.broadcast %110 : vector<1x8xf32> to vector<16x8xf32>
    %112 = arith.addf %109, %111 : vector<16x8xf32>
    %c0_48 = arith.constant 0 : index
    %c0_49 = arith.constant 0 : index
    %113 = vector.load %arg14[%c0_48, %c0_49] : memref<16x8xf32, #tpu.memory_space<vmem>>, vector<16x8xf32>
    tpu.vector_store %arg14[%c0_48, %c0_49], %112 {strides = array<i32>} : memref<16x8xf32, #tpu.memory_space<vmem>>, vector<16x8xf32>,
    return
  }
  func.func @transform_0(%arg0: i32) -> (i32, i32, i32, i32) {
    %c0_i32 = arith.constant 0 : i32
    %c0_i32_0 = arith.constant 0 : i32
    %c0_i32_1 = arith.constant 0 : i32
    %c0_i32_2 = arith.constant 0 : i32
    return %c0_i32, %c0_i32_0, %arg0, %c0_i32_1 : i32, i32, i32, i32
  }
  func.func @transform_1(%arg0: i32) -> (i32, i32) {
    %c0_i32 = arith.constant 0 : i32
    %c0_i32_0 = arith.constant 0 : i32
    %c0_i32_1 = arith.constant 0 : i32
    return %c0_i32, %c0_i32_0 : i32, i32
  }
  func.func @transform_2(%arg0: i32) -> (i32, i32) {
    %c0_i32 = arith.constant 0 : i32
    %c0_i32_0 = arith.constant 0 : i32
    %c0_i32_1 = arith.constant 0 : i32
    return %c0_i32, %c0_i32_0 : i32, i32
  }
  func.func @transform_3(%arg0: i32) -> (i32, i32) {
    %c0_i32 = arith.constant 0 : i32
    %c0_i32_0 = arith.constant 0 : i32
    %c0_i32_1 = arith.constant 0 : i32
    return %c0_i32, %c0_i32_0 : i32, i32
  }
  func.func @transform_4(%arg0: i32) -> (i32, i32) {
    %c0_i32 = arith.constant 0 : i32
    %c0_i32_0 = arith.constant 0 : i32
    %c0_i32_1 = arith.constant 0 : i32
    return %c0_i32, %c0_i32_0 : i32, i32
  }
  func.func @transform_5(%arg0: i32) -> (i32, i32) {
    %c0_i32 = arith.constant 0 : i32
    %c0_i32_0 = arith.constant 0 : i32
    %c0_i32_1 = arith.constant 0 : i32
    return %c0_i32, %c0_i32_0 : i32, i32
  }
  func.func @transform_6(%arg0: i32) -> (i32, i32) {
    %c0_i32 = arith.constant 0 : i32
    %c0_i32_0 = arith.constant 0 : i32
    %c0_i32_1 = arith.constant 0 : i32
    return %c0_i32, %c0_i32_0 : i32, i32
  }
  func.func @transform_7(%arg0: i32) -> (i32, i32) {
    %c0_i32 = arith.constant 0 : i32
    %c0_i32_0 = arith.constant 0 : i32
    %c0_i32_1 = arith.constant 0 : i32
    return %c0_i32, %c0_i32_0 : i32, i32
  }
  func.func @transform_8(%arg0: i32) -> (i32, i32) {
    %c0_i32 = arith.constant 0 : i32
    %c0_i32_0 = arith.constant 0 : i32
    %c0_i32_1 = arith.constant 0 : i32
    return %c0_i32, %c0_i32_0 : i32, i32
  }
  func.func @transform_9(%arg0: i32) -> (i32, i32) {
    %c0_i32 = arith.constant 0 : i32
    %c0_i32_0 = arith.constant 0 : i32
    %c0_i32_1 = arith.constant 0 : i32
    return %c0_i32, %c0_i32_0 : i32, i32
  }
  func.func @transform_10(%arg0: i32) -> (i32, i32) {
    %c0_i32 = arith.constant 0 : i32
    %c0_i32_0 = arith.constant 0 : i32
    %c0_i32_1 = arith.constant 0 : i32
    return %c0_i32, %c0_i32_0 : i32, i32
  }
  func.func @transform_11(%arg0: i32) -> (i32, i32) {
    %c0_i32 = arith.constant 0 : i32
    %c0_i32_0 = arith.constant 0 : i32
    %c0_i32_1 = arith.constant 0 : i32
    return %c0_i32, %c0_i32_0 : i32, i32
  }
  func.func @transform_12(%arg0: i32) -> (i32, i32) {
    %c0_i32 = arith.constant 0 : i32
    %c0_i32_0 = arith.constant 0 : i32
    %c0_i32_1 = arith.constant 0 : i32
    return %c0_i32, %c0_i32_0 : i32, i32
  }
  func.func @transform_13(%arg0: i32) -> (i32, i32) {
    %c0_i32 = arith.constant 0 : i32
    %c0_i32_0 = arith.constant 0 : i32
    return %arg0, %c0_i32 : i32, i32
  }
}

</mosaic_0001>

<bundles_post_ra>
// kernel: nature_cnn_forward.1
= control target key start
LH: loop header
LB: loop body
LE: loop exit
PB: predicated region body
PF: predicated region fallthrough
CT: control target
= control target key end

     0   :  { %s7707_s14 = smov 64   ;;  %vm2096_vm0 = vcmask 523264   ;;  %s7708_s25 = smov 32   ;;  %vm4119_vm1 = vcmask 261120   ;;  %vm4165_vm2 = vcmask 785408   ;;  %vm5485_vm3 = vcmask 64512   ;;  %s10120_s0 = inlined_call_operand.vmem [shape: bf16[9,9,16,64], index: 0, kind: input, shape index: {}]   ;;  %s10121_s1 = inlined_call_operand.vmem [shape: bf16[256,32], index: 1, kind: input, shape index: {}]   ;;  %s10122_s2 = inlined_call_operand.vmem [shape: f32[1,32], index: 2, kind: input, shape index: {}]   ;;  %s10123_s3 = inlined_call_operand.vmem [shape: bf16[512,64], index: 3, kind: input, shape index: {}]   ;;  %s10124_s4 = inlined_call_operand.vmem [shape: f32[1,64], index: 4, kind: input, shape index: {}]   ;;  %s10125_s5 = inlined_call_operand.vmem [shape: bf16[576,64], index: 5, kind: input, shape index: {}]   ;;  %s10126_s6 = inlined_call_operand.vmem [shape: f32[1,64], index: 6, kind: input, shape index: {}]   ;;  %s10127_s8 = inlined_call_operand.vmem [shape: f32[1,128], index: 8, kind: input, shape index: {}]   ;;  %s10128_s7 = inlined_call_operand.vmem [shape: bf16[64,128], index: 7, kind: input, shape index: {}]   ;;  %s10129_s9 = inlined_call_operand.vmem [shape: bf16[128,128], index: 9, kind: input, shape index: {}]   ;;  %s10130_s10 = inlined_call_operand.vmem [shape: f32[1,128], index: 10, kind: input, shape index: {}]   ;;  %s10131_s11 = inlined_call_operand.vmem [shape: bf16[128,8], index: 11, kind: input, shape index: {}]   ;;  %s10132_s12 = inlined_call_operand.vmem [shape: f32[1,8], index: 12, kind: input, shape index: {}]   ;;  %s10133_s13 = inlined_call_operand.vmem [shape: f32[16,8], index: 13, kind: output, shape index: {}]  }
   0x1   :  { %v7384_v0 = vld [vmem:[%s10120_s0 + $0x18] sm:$0xff]  ;;  %v7383_v1 = vld [vmem:[%s10120_s0 + $0x10] sm:$0xff]  ;;  %v7382_v2 = vld [vmem:[%s10120_s0 + $0x8] sm:$0xff]  ;;  %s7709_s16 = smov 96  }
   0x2   :  { %1204 = vrot.lane.b32.xlu2 %v7384_v0, %s7707_s14  ;;  %1202 = vrot.lane.b32.xlu1 %v7383_v1, %s7707_s14  ;;  %v7512_v3 = vld [vmem:[%s10120_s0 + $0x60] sm:$0xff]  ;;  %v7511_v4 = vld [vmem:[%s10120_s0 + $0x58] sm:$0xff] }
   0x3   :  { %1200 = vrot.lane.b32.xlu0 %v7382_v2, %s7707_s14  ;;  %v7510_v5 = vld [vmem:[%s10120_s0 + $0x50] sm:$0xff]  ;;  %v7386_v6 = vld [vmem:[%s10120_s0 + $0x28] sm:$0xff]  ;;  %v7385_v8 = vld [vmem:[%s10120_s0 + $0x20] sm:$0xff] }
   0x4   :  { %v7513_v7 = vld [vmem:[%s10120_s0 + $0x68] sm:$0xff]  ;;  %v7515_v9 = vld [vmem:[%s10120_s0 + $0x78] sm:$0xff]  ;;  %v7387_v10 = vld [vmem:[%s10120_s0 + $0x30] sm:$0xff] }
   0x5   :  { %v7514_v11 = vld [vmem:[%s10120_s0 + $0x70] sm:$0xff]  ;;  %v7389_v12 = vld [vmem:[%s10120_s0 + $0x40] sm:$0xff]  ;;  %v7388_v14 = vld [vmem:[%s10120_s0 + $0x38] sm:$0xff] }
   0x6   :  { %v7516_v13 = vld [vmem:[%s10120_s0 + $0x80] sm:$0xff]  ;;  %v7518_v15 = vld [vmem:[%s10120_s0 + $0x98] sm:$0xff]  ;;  %v7390_v16 = vld [vmem:[%s10120_s0 + $0x50] sm:$0xff] }
   0x7   :  { %v7517_v17 = vld [vmem:[%s10120_s0 + $0x88] sm:$0xff]  ;;  %v7392_v18 = vld [vmem:[%s10120_s0 + $0x60] sm:$0xff]  ;;  %v7391_v20 = vld [vmem:[%s10120_s0 + $0x58] sm:$0xff] }
   0x8   :  { %v7519_v19 = vld [vmem:[%s10120_s0 + $0xa0] sm:$0xff]  ;;  %v7581_v21 = vld [vmem:[%s10121_s1 + $0x38] sm:$0xff]  ;;  %v7521_v22 = vld [vmem:[%s10120_s0 + $0xb0] sm:$0xff] }
   0x9   :  { %2741 = vmatpush.bf16.msra.mxu0 %v7581_v21  ;;  %7678 = vmatpush.bf16.msra.mxu2 %v7581_v21  ;;  %v7393_v23 = vld [vmem:[%s10120_s0 + $0x68] sm:$0xff]  ;;  %v7580_v25 = vld [vmem:[%s10121_s1 + $0x30] sm:$0xff]  ;;  %v7589_v27 = vld [vmem:[%s10121_s1 + $0x78] sm:$0xff] }
   0xa   :  { %1972 = vrot.lane.b32.xlu2 %v7512_v3, %s7707_s14  ;;  %1970 = vrot.lane.b32.xlu1 %v7511_v4, %s7707_s14  ;;  %v7520_v24 = vld [vmem:[%s10120_s0 + $0xa8] sm:$0xff]  ;;  %v7395_v28 = vld [vmem:[%s10120_s0 + $0x78] sm:$0xff] }
   0xb   :  { %1968 = vrot.lane.b32.xlu0 %v7510_v5, %s7707_s14  ;;  %v7579_v26 = vld [vmem:[%s10121_s1 + $0x28] sm:$0xff]  ;;  %v7522_v29 = vld [vmem:[%s10120_s0 + $0xb8] sm:$0xff]  ;;  %3070 = vmatpush.bf16.msra.mxu1 %v7589_v27  ;;  %v7394_v30 = vld [vmem:[%s10120_s0 + $0x70] sm:$0xff] }
   0xc   :  { %7686 = vmatpush.bf16.msra.mxu3 %v7589_v27  ;;  %v7578_v31 = vld [vmem:[%s10121_s1 + $0x20] sm:$0xff]  ;;  %v7588_v32 = vld [vmem:[%s10121_s1 + $0x70] sm:$0xff]  ;;  %v7577_v33 = vld [vmem:[%s10121_s1 + $0x18] sm:$0xff] }
   0xd   :  { %2742 = vmatpush.bf16.msra.mxu0 %v7580_v25  ;;  %7679 = vmatpush.bf16.msra.mxu2 %v7580_v25  ;;  %v7587_v34 = vld [vmem:[%s10121_s1 + $0x68] sm:$0xff]  ;;  %v7396_v36 = vld [vmem:[%s10120_s0 + $0x80] sm:$0xff]  ;;  %v7576_v38 = vld [vmem:[%s10121_s1 + $0x10] sm:$0xff] }
   0xe   :  { %v7524_v35 = vld [vmem:[%s10120_s0 + $0xc8] sm:$0xff]  ;;  %v7523_v37 = vld [vmem:[%s10120_s0 + $0xc0] sm:$0xff]  ;;  %v7585_v41 = vld [vmem:[%s10121_s1 + $0x58] sm:$0xff] }
   0xf   :  { %3071 = vmatpush.bf16.msra.mxu1 %v7588_v32  ;;  %v7586_v39 = vld [vmem:[%s10121_s1 + $0x60] sm:$0xff]  ;;  %v7575_v40 = vld [vmem:[%s10121_s1 + $0x8] sm:$0xff]  ;;  %v7398_v42 = vld [vmem:[%s10120_s0 + $0x98] sm:$0xff] }
  0x10   :  { %7687 = vmatpush.bf16.msra.mxu3 %v7588_v32  ;;  %v7525_v43 = vld [vmem:[%s10120_s0 + $0xd0] sm:$0xff]  ;;  %v7397_v44 = vld [vmem:[%s10120_s0 + $0x88] sm:$0xff]  ;;  %v7574_v45 = vld [vmem:[%s10121_s1] sm:$0xff] }
  0x11   :  { %2743 = vmatpush.bf16.msra.mxu0 %v7579_v26  ;;  %7680 = vmatpush.bf16.msra.mxu2 %v7579_v26  ;;  %v7584_v46 = vld [vmem:[%s10121_s1 + $0x50] sm:$0xff]  ;;  %v7527_v47 = vld [vmem:[%s10120_s0 + $0xe8] sm:$0xff]  ;;  %v7399_v48 = vld [vmem:[%s10120_s0 + $0xa0] sm:$0xff] }
  0x12   :  { %1208 = vrot.lane.b32.xlu2 %v7386_v6, %s7707_s14  ;;  %1974 = vrot.lane.b32.xlu1 %v7513_v7, %s7707_s14  ;;  %v7583_v49 = vld [vmem:[%s10121_s1 + $0x48] sm:$0xff]  ;;  %v7526_v50 = vld [vmem:[%s10120_s0 + $0xe0] sm:$0xff] }
  0x13   :  { %1206 = vrot.lane.b32.xlu0 %v7385_v8, %s7707_s14  ;;  %3072 = vmatpush.bf16.msra.mxu1 %v7587_v34  ;;  %v7582_v51 = vld [vmem:[%s10121_s1 + $0x40] sm:$0xff]  ;;  %v7401_v53 = vld [vmem:[%s10120_s0 + $0xb0] sm:$0xff]  ;;  %v7400_v55 = vld [vmem:[%s10120_s0 + $0xa8] sm:$0xff] }
  0x14   :  { %7688 = vmatpush.bf16.msra.mxu3 %v7587_v34  ;;  %v7528_v54 = vld [vmem:[%s10120_s0 + $0xf0] sm:$0xff]  ;;  %v7530_v57 = vld [vmem:[%s10120_s0 + $0x100] sm:$0xff]  ;;  %v7402_v58 = vld [vmem:[%s10120_s0 + $0xb8] sm:$0xff] }
  0x15   :  { %2744 = vmatpush.bf16.msra.mxu0 %v7578_v31  ;;  %7681 = vmatpush.bf16.msra.mxu2 %v7578_v31  ;;  %v7529_v59 = vld [vmem:[%s10120_s0 + $0xf8] sm:$0xff]  ;;  %v7404_v61 = vld [vmem:[%s10120_s0 + $0xc8] sm:$0xff]  ;;  %v7403_v63 = vld [vmem:[%s10120_s0 + $0xc0] sm:$0xff] }
  0x16   :  { %v7531_v62 = vld [vmem:[%s10120_s0 + $0x108] sm:$0xff]  ;;  %v7318_v0 = vld [vmem:[%s10120_s0] sm:$0xff]  ;;  %v7533_v5 = vld [vmem:[%s10120_s0 + $0x118] sm:$0xff] }
  0x17   :  { %3073 = vmatpush.bf16.msra.mxu1 %v7586_v39  ;;  %v7405_v6 = vld [vmem:[%s10120_s0 + $0xd0] sm:$0xff]  ;;  %v7446_v8 = vld [vmem:[%s10120_s0 + $0x48] sm:$0xff]  ;;  %v7536_v21 = vld [vmem:[%s10120_s0 + $0x138] sm:$0xff] }
  0x18   :  { %7689 = vmatpush.bf16.msra.mxu3 %v7586_v39  ;;  %v7532_v7 = vld [vmem:[%s10120_s0 + $0x110] sm:$0xff]  ;;  %v7409_v31 = vld [vmem:[%s10120_s0 + $0xf8] sm:$0xff]  ;;  %v7538_v39 = vld [vmem:[%s10120_s0 + $0x148] sm:$0xff] }
  0x19   :  { %2745 = vmatpush.bf16.msra.mxu0 %v7577_v33  ;;  %7682 = vmatpush.bf16.msra.mxu2 %v7577_v33  ;;  %v7320_v32 = vld [vmem:[%s10120_s0 + $0x10] sm:$0xff] }
  0x1a   :  { %1978 = vrot.lane.b32.xlu2 %v7515_v9, %s7707_s14  ;;  %1210 = vrot.lane.b32.xlu1 %v7387_v10, %s7707_s14 }
  0x1b   :  { %1976 = vrot.lane.b32.xlu0 %v7514_v11, %s7707_s14  ;;  %3074 = vmatpush.bf16.msra.mxu1 %v7585_v41 }
  0x1c   :  { %7690 = vmatpush.bf16.msra.mxu3 %v7585_v41 }
  0x1d   :  { %2746 = vmatpush.bf16.msra.mxu0 %v7576_v38  ;;  %7683 = vmatpush.bf16.msra.mxu2 %v7576_v38  ;;  %v7426_v38 = vld [vmem:[%s10120_s0 + $0x190] sm:$0xff] }
  0x1f   :  { %3075 = vmatpush.bf16.msra.mxu1 %v7584_v46 }
  0x20   :  { %7691 = vmatpush.bf16.msra.mxu3 %v7584_v46  ;;  %v7539_v46 = vld [vmem:[%s10120_s0 + $0x150] sm:$0xff] }
  0x21   :  { %2747 = vmatpush.bf16.msra.mxu0 %v7575_v40  ;;  %7684 = vmatpush.bf16.msra.mxu2 %v7575_v40  ;;  %v7448_v40 = vld [vmem:[%s10120_s0 + $0x58] sm:$0xff] }
  0x22   :  { %1214 = vrot.lane.b32.xlu2 %v7389_v12, %s7707_s14  ;;  %1980 = vrot.lane.b32.xlu1 %v7516_v13, %s7707_s14  ;;  %v7407_v13 = vld [vmem:[%s10120_s0 + $0xe8] sm:$0xff] }
  0x23   :  { %1212 = vrot.lane.b32.xlu0 %v7388_v14, %s7707_s14  ;;  %3076 = vmatpush.bf16.msra.mxu1 %v7583_v49  ;;  %v7534_v14 = vld [vmem:[%s10120_s0 + $0x128] sm:$0xff] }
  0x24   :  { %7692 = vmatpush.bf16.msra.mxu3 %v7583_v49 }
  0x25   :  { %2748 = vmatpush.bf16.msra.mxu0 %v7574_v45  ;;  %7685 = vmatpush.bf16.msra.mxu2 %v7574_v45  ;;  %v7427_v45 = vld [vmem:[%s10120_s0 + $0x198] sm:$0xff] }
  0x27   :  { %3077 = vmatpush.bf16.msra.mxu1 %v7582_v51 }
  0x28   :  { %7693 = vmatpush.bf16.msra.mxu3 %v7582_v51 }
  0x2a   :  { %1984 = vrot.lane.b32.xlu2 %v7518_v15, %s7707_s14  ;;  %1216 = vrot.lane.b32.xlu1 %v7390_v16, %s7707_s14  ;;  %v7406_v15 = vld [vmem:[%s10120_s0 + $0xe0] sm:$0xff]  ;;  %v7319_v16 = vld [vmem:[%s10120_s0 + $0x8] sm:$0xff] }
  0x2b   :  { %1982 = vrot.lane.b32.xlu0 %v7517_v17, %s7707_s14 }
  0x32   :  { %1220 = vrot.lane.b32.xlu2 %v7392_v18, %s7707_s14  ;;  %1986 = vrot.lane.b32.xlu1 %v7519_v19, %s7707_s14 }
  0x33   :  { %1218 = vrot.lane.b32.xlu0 %v7391_v20, %s7707_s14 }
  0x3a   :  { %1990 = vrot.lane.b32.xlu2 %v7521_v22, %s7707_s14  ;;  %1222 = vrot.lane.b32.xlu1 %v7393_v23, %s7707_s14  ;;  %v7408_v22 = vld [vmem:[%s10120_s0 + $0xf0] sm:$0xff] }
  0x3b   :  { %1988 = vrot.lane.b32.xlu0 %v7520_v24, %s7707_s14  ;;  %v7535_v23 = vld [vmem:[%s10120_s0 + $0x130] sm:$0xff] }
  0x3c   :  { %v7447_v24 = vld [vmem:[%s10120_s0 + $0x50] sm:$0xff] }
  0x42   :  { %1226 = vrot.lane.b32.xlu2 %v7395_v28, %s7707_s14  ;;  %1992 = vrot.lane.b32.xlu1 %v7522_v29, %s7707_s14  ;;  %v7410_v29 = vld [vmem:[%s10120_s0 + $0x100] sm:$0xff] }
  0x43   :  { %1224 = vrot.lane.b32.xlu0 %v7394_v30, %s7707_s14  ;;  %v7537_v30 = vld [vmem:[%s10120_s0 + $0x140] sm:$0xff] }
  0x4a   :  { %1996 = vrot.lane.b32.xlu2 %v7524_v35, %s7707_s14  ;;  %1228 = vrot.lane.b32.xlu1 %v7396_v36, %s7707_s14 }
  0x4b   :  { %1994 = vrot.lane.b32.xlu0 %v7523_v37, %s7707_s14  ;;  %v7554_v37 = vld [vmem:[%s10120_s0 + $0x1d8] sm:$0xff] }
  0x52   :  { %1232 = vrot.lane.b32.xlu2 %v7398_v42, %s7707_s14  ;;  %1998 = vrot.lane.b32.xlu1 %v7525_v43, %s7707_s14 }
  0x53   :  { %1230 = vrot.lane.b32.xlu0 %v7397_v44, %s7707_s14 }
  0x5a   :  { %2002 = vrot.lane.b32.xlu2 %v7527_v47, %s7707_s14  ;;  %1234 = vrot.lane.b32.xlu1 %v7399_v48, %s7707_s14  ;;  %v7411_v47 = vld [vmem:[%s10120_s0 + $0x108] sm:$0xff]  ;;  %v7321_v48 = vld [vmem:[%s10120_s0 + $0x18] sm:$0xff] }
  0x5b   :  { %2000 = vrot.lane.b32.xlu0 %v7526_v50, %s7707_s14 }
  0x5c   :  { %v7972_v52 = vpop.permute.xlu2 %1204 }
  0x5d   :  { %v2107_v35 = vsel %vm2096_vm0, %v7320_v32, %v7972_v52 }
  0x62   :  { %1238 = vrot.lane.b32.xlu2 %v7401_v53, %s7707_s14  ;;  %2004 = vrot.lane.b32.xlu1 %v7528_v54, %s7707_s14  ;;  %v7540_v53 = vld [vmem:[%s10120_s0 + $0x158] sm:$0xff]  ;;  %v7412_v54 = vld [vmem:[%s10120_s0 + $0x110] sm:$0xff] }
  0x63   :  { %1236 = vrot.lane.b32.xlu0 %v7400_v55, %s7707_s14  ;;  %v7555_v55 = vld [vmem:[%s10120_s0 + $0x1e0] sm:$0xff] }
  0x64   :  { %v7986_v56 = vpop.permute.xlu2 %1972 }
  0x65   :  { %v2363_v43 = vsel %vm2096_vm0, %v7448_v40, %v7986_v56  ;;  %v7449_v56 = vld [vmem:[%s10120_s0 + $0x60] sm:$0xff] }
  0x6a   :  { %2008 = vrot.lane.b32.xlu2 %v7530_v57, %s7707_s14  ;;  %1240 = vrot.lane.b32.xlu1 %v7402_v58, %s7707_s14 }
  0x6b   :  { %2006 = vrot.lane.b32.xlu0 %v7529_v59, %s7707_s14 }
  0x6c   :  { %v8000_v60 = vpop.permute.xlu2 %1208 }
  0x72   :  { %1244 = vrot.lane.b32.xlu2 %v7404_v61, %s7707_s14  ;;  %2010 = vrot.lane.b32.xlu1 %v7531_v62, %s7707_s14  ;;  %v7413_v62 = vld [vmem:[%s10120_s0 + $0x118] sm:$0xff] }
  0x73   :  { %1242 = vrot.lane.b32.xlu0 %v7403_v63, %s7707_s14  ;;  %v7556_v63 = vld [vmem:[%s10120_s0 + $0x1e8] sm:$0xff] }
  0x74   :  { %v8017_v1 = vpop.permute.xlu2 %1978  ;;  %v1203_v2 = vpop.permute.xlu1 %1202 }
  0x75   :  { %v1201_v3 = vpop.permute.xlu0 %1200  ;;  %v2103_v19 = vsel %vm2096_vm0, %v7319_v16, %v1203_v2  ;;  %v7322_v2 = vld [vmem:[%s10120_s0 + $0x20] sm:$0xff]  ;;  %v7542_v16 = vld [vmem:[%s10120_s0 + $0x170] sm:$0xff] }
  0x76   :  { %v2099_v4 = vsel %vm2096_vm0, %v7318_v0, %v1201_v3  ;;  %v7428_v0 = vld [vmem:[%s10120_s0 + $0x1a0] sm:$0xff] }
  0x77   :  { %2749 = vmatmul.bf16.vlgmr.msra.gmra.mxu0 %v2099_v4 }
  0x7a   :  { %2014 = vrot.lane.b32.xlu2 %v7533_v5, %s7707_s14  ;;  %1246 = vrot.lane.b32.xlu1 %v7405_v6, %s7707_s14  ;;  %v2115_v5 = vsel %vm2096_vm0, %v7322_v2, %v8000_v60 }
  0x7b   :  { %2012 = vrot.lane.b32.xlu0 %v7532_v7, %s7707_s14  ;;  %v7557_v7 = vld [vmem:[%s10120_s0 + $0x1f0] sm:$0xff] }
  0x7c   :  { %v8035_v9 = vpop.permute.xlu2 %1214  ;;  %v1971_v10 = vpop.permute.xlu1 %1970 }
  0x7d   :  { %v1969_v11 = vpop.permute.xlu0 %1968  ;;  %v2359_v27 = vsel %vm2096_vm0, %v7447_v24, %v1971_v10  ;;  %v7541_v10 = vld [vmem:[%s10120_s0 + $0x160] sm:$0xff]  ;;  %v7543_v24 = vld [vmem:[%s10120_s0 + $0x178] sm:$0xff] }
  0x7e   :  { %v2355_v12 = vsel %vm2096_vm0, %v7446_v8, %v1969_v11  ;;  %v7429_v8 = vld [vmem:[%s10120_s0 + $0x1a8] sm:$0xff] }
  0x7f   :  { %3078 = vmatmul.bf16.vlgmr.msra.gmra.mxu1 %v2355_v12  ;;  %v7450_v11 = vld [vmem:[%s10120_s0 + $0x68] sm:$0xff] }
  0x82   :  { %1250 = vrot.lane.b32.xlu2 %v7407_v13, %s7707_s14  ;;  %2016 = vrot.lane.b32.xlu1 %v7534_v14, %s7707_s14 }
  0x83   :  { %1248 = vrot.lane.b32.xlu0 %v7406_v15, %s7707_s14  ;;  %v7430_v15 = vld [vmem:[%s10120_s0 + $0x1b8] sm:$0xff] }
  0x84   :  { %v8053_v17 = vpop.permute.xlu2 %1984  ;;  %v1975_v18 = vpop.permute.xlu1 %1974 }
  0x85   :  { %v1207_v20 = vpop.permute.xlu0 %1206  ;;  %v2367_v59 = vsel %vm2096_vm0, %v7449_v56, %v1975_v18  ;;  %v7414_v18 = vld [vmem:[%s10120_s0 + $0x128] sm:$0xff]  ;;  %v7433_v56 = vld [vmem:[%s10120_s0 + $0x1d0] sm:$0xff] }
  0x86   :  { %v2111_v51 = vsel %vm2096_vm0, %v7321_v48, %v1207_v20  ;;  %v7544_v48 = vld [vmem:[%s10120_s0 + $0x180] sm:$0xff] }
  0x87   :  { %2754 = vmatmul.bf16.gmra.mxu0 %v2103_v19  ;;  %v7323_v19 = vld [vmem:[%s10120_s0 + $0x28] sm:$0xff] }
  0x8a   :  { %2020 = vrot.lane.b32.xlu2 %v7536_v21, %s7707_s14  ;;  %1252 = vrot.lane.b32.xlu1 %v7408_v22, %s7707_s14 }
  0x8b   :  { %2018 = vrot.lane.b32.xlu0 %v7535_v23, %s7707_s14 }
  0x8c   :  { %v8071_v25 = vpop.permute.xlu2 %1220  ;;  %v8073_v26 = vpop.permute.xlu1 %1210 }
  0x8d   :  { %v8076_v28 = vpop.permute.xlu0 %1976  ;;  %v2119_v22 = vsel %vm2096_vm0, %v7323_v19, %v8073_v26  ;;  %v7562_v19 = vld [vmem:[%s10120_s0 + $0x220] sm:$0xff] }
  0x8e   :  { %v2371_v13 = vsel %vm2096_vm0, %v7450_v11, %v8076_v28  ;;  %v7558_v28 = vld [vmem:[%s10120_s0 + $0x200] sm:$0xff] }
  0x8f   :  { %3083 = vmatmul.bf16.gmra.mxu1 %v2359_v27  ;;  %v7415_v27 = vld [vmem:[%s10120_s0 + $0x130] sm:$0xff]  ;;  %v7453_v11 = vld [vmem:[%s10120_s0 + $0x80] sm:$0xff] }
  0x92   :  { %1256 = vrot.lane.b32.xlu2 %v7410_v29, %s7707_s14  ;;  %2022 = vrot.lane.b32.xlu1 %v7537_v30, %s7707_s14  ;;  %v7451_v29 = vld [vmem:[%s10120_s0 + $0x70] sm:$0xff] }
  0x93   :  { %1254 = vrot.lane.b32.xlu0 %v7409_v31, %s7707_s14  ;;  %v2375_v31 = vsel %vm2096_vm0, %v7451_v29, %v8017_v1 }
  0x94   :  { %v8093_v33 = vpop.permute.xlu2 %1990  ;;  %v8095_v34 = vpop.permute.xlu1 %1980 }
  0x95   :  { %v8099_v36 = vpop.permute.xlu0 %1212 }
  0x97   :  { %2759 = vmatmul.bf16.gmra.mxu0 %v2107_v35  ;;  %v7416_v35 = vld [vmem:[%s10120_s0 + $0x138] sm:$0xff] }
  0x9a   :  { %2056 = vrot.lane.b32.xlu2 %v7554_v37, %s7707_s14  ;;  %1288 = vrot.lane.b32.xlu1 %v7426_v38, %s7707_s14  ;;  %v7559_v37 = vld [vmem:[%s10120_s0 + $0x208] sm:$0xff]  ;;  %v7431_v38 = vld [vmem:[%s10120_s0 + $0x1c0] sm:$0xff] }
  0x9b   :  { %2024 = vrot.lane.b32.xlu0 %v7538_v39, %s7707_s14  ;;  %v7324_v39 = vld [vmem:[%s10120_s0 + $0x30] sm:$0xff] }
  0x9c   :  { %v8116_v41 = vpop.permute.xlu2 %1226  ;;  %v8118_v42 = vpop.permute.xlu1 %1216 }
  0x9d   :  { %v8122_v44 = vpop.permute.xlu0 %1982 }
  0x9f   :  { %3088 = vmatmul.bf16.gmra.mxu1 %v2363_v43  ;;  %v2123_v43 = vsel %vm2096_vm0, %v7324_v39, %v8099_v36  ;;  %v7435_v39 = vld [vmem:[%s10120_s0 + $0x1e0] sm:$0xff] }
  0xa2   :  { %1290 = vrot.lane.b32.xlu2 %v7427_v45, %s7707_s14  ;;  %2026 = vrot.lane.b32.xlu1 %v7539_v46, %s7707_s14  ;;  %v7560_v46 = vld [vmem:[%s10120_s0 + $0x210] sm:$0xff] }
  0xa3   :  { %1258 = vrot.lane.b32.xlu0 %v7411_v47, %s7707_s14  ;;  %v7432_v47 = vld [vmem:[%s10120_s0 + $0x1c8] sm:$0xff] }
  0xa4   :  { %v8139_v49 = vpop.permute.xlu2 %1996  ;;  %v8141_v50 = vpop.permute.xlu1 %1986 }
  0xa5   :  { %v8144_v52 = vpop.permute.xlu0 %1218 }
  0xa7   :  { %2764 = vmatmul.bf16.gmra.mxu0 %v2111_v51  ;;  %v7452_v51 = vld [vmem:[%s10120_s0 + $0x78] sm:$0xff] }
  0xaa   :  { %2028 = vrot.lane.b32.xlu2 %v7540_v53, %s7707_s14  ;;  %1260 = vrot.lane.b32.xlu1 %v7412_v54, %s7707_s14  ;;  %v2379_v54 = vsel %vm2096_vm0, %v7452_v51, %v8095_v34 }
  0xab   :  { %2058 = vrot.lane.b32.xlu0 %v7555_v55, %s7707_s14 }
  0xac   :  { %v8161_v57 = vpop.permute.xlu2 %1232  ;;  %v8163_v58 = vpop.permute.xlu1 %1222 }
  0xad   :  { %v8166_v61 = vpop.permute.xlu0 %1988 }
  0xaf   :  { %3093 = vmatmul.bf16.gmra.mxu1 %v2367_v59  ;;  %v7545_v59 = vld [vmem:[%s10120_s0 + $0x188] sm:$0xff] }
  0xb2   :  { %1262 = vrot.lane.b32.xlu2 %v7413_v62, %s7707_s14  ;;  %2060 = vrot.lane.b32.xlu1 %v7556_v63, %s7707_s14  ;;  %v7417_v62 = vld [vmem:[%s10120_s0 + $0x140] sm:$0xff]  ;;  %v7325_v63 = vld [vmem:[%s10120_s0 + $0x38] sm:$0xff] }
  0xb3   :  { %1292 = vrot.lane.b32.xlu0 %v7428_v0, %s7707_s14  ;;  %v2127_v2 = vsel %vm2096_vm0, %v7325_v63, %v8035_v9  ;;  %v7436_v63 = vld [vmem:[%s10120_s0 + $0x1e8] sm:$0xff] }
  0xb4   :  { %v8183_v3 = vpop.permute.xlu2 %2002  ;;  %v8185_v4 = vpop.permute.xlu1 %1992 }
  0xb5   :  { %v8189_v6 = vpop.permute.xlu0 %1224 }
  0xb7   :  { %2769 = vmatmul.bf16.gmra.mxu0 %v2115_v5 }
  0xba   :  { %2062 = vrot.lane.b32.xlu2 %v7557_v7, %s7707_s14  ;;  %1294 = vrot.lane.b32.xlu1 %v7429_v8, %s7707_s14  ;;  %v7546_v7 = vld [vmem:[%s10120_s0 + $0x190] sm:$0xff]  ;;  %v7418_v8 = vld [vmem:[%s10120_s0 + $0x148] sm:$0xff] }
  0xbb   :  { %2030 = vrot.lane.b32.xlu0 %v7541_v10, %s7707_s14  ;;  %v7561_v10 = vld [vmem:[%s10120_s0 + $0x218] sm:$0xff] }
  0xbc   :  { %v8206_v60 = vpop.permute.xlu2 %1238  ;;  %v8208_v12 = vpop.permute.xlu1 %1228 }
  0xbd   :  { %v8212_v14 = vpop.permute.xlu0 %1994 }
  0xbf   :  { %3098 = vmatmul.bf16.gmra.mxu1 %v2371_v13 }
  0xc2   :  { %1296 = vrot.lane.b32.xlu2 %v7430_v15, %s7707_s14  ;;  %2032 = vrot.lane.b32.xlu1 %v7542_v16, %s7707_s14  ;;  %v2383_v15 = vsel %vm2096_vm0, %v7453_v11, %v8122_v44  ;;  %v7490_v44 = vld [vmem:[%s10120_s0 + $0x1d0] sm:$0xff] }
  0xc3   :  { %1264 = vrot.lane.b32.xlu0 %v7414_v18, %s7707_s14  ;;  %v7419_v18 = vld [vmem:[%s10120_s0 + $0x150] sm:$0xff] }
  0xc4   :  { %v8229_v20 = vpop.permute.xlu2 %2008  ;;  %v8231_v21 = vpop.permute.xlu1 %1998 }
  0xc5   :  { %v8235_v23 = vpop.permute.xlu0 %1230 }
  0xc7   :  { %2774 = vmatmul.bf16.gmra.mxu0 %v2119_v22  ;;  %v7434_v22 = vld [vmem:[%s10120_s0 + $0x1d8] sm:$0xff] }
  0xca   :  { %2034 = vrot.lane.b32.xlu2 %v7543_v24, %s7707_s14  ;;  %1266 = vrot.lane.b32.xlu1 %v7415_v27, %s7707_s14  ;;  %v7326_v24 = vld [vmem:[%s10120_s0 + $0x48] sm:$0xff] }
  0xcb   :  { %2064 = vrot.lane.b32.xlu0 %v7558_v28, %s7707_s14  ;;  %v2131_v29 = vsel %vm2096_vm0, %v7326_v24, %v8118_v42  ;;  %v7547_v42 = vld [vmem:[%s10120_s0 + $0x198] sm:$0xff] }
  0xcc   :  { %v8252_v26 = vpop.permute.xlu2 %1244  ;;  %v8254_v30 = vpop.permute.xlu1 %1234 }
  0xcd   :  { %v8258_v32 = vpop.permute.xlu0 %2000 }
  0xcf   :  { %3103 = vmatmul.bf16.gmra.mxu1 %v2375_v31 }
  0xd2   :  { %1268 = vrot.lane.b32.xlu2 %v7416_v35, %s7707_s14  ;;  %2066 = vrot.lane.b32.xlu1 %v7559_v37, %s7707_s14 }
  0xd3   :  { %1298 = vrot.lane.b32.xlu0 %v7431_v38, %s7707_s14  ;;  %v7563_v38 = vld [vmem:[%s10120_s0 + $0x228] sm:$0xff] }
  0xd4   :  { %v8275_v1 = vpop.permute.xlu2 %2014  ;;  %v8277_v40 = vpop.permute.xlu1 %2004 }
  0xd5   :  { %v8281_v45 = vpop.permute.xlu0 %1236 }
  0xd7   :  { %2779 = vmatmul.bf16.gmra.mxu0 %v2123_v43  ;;  %v8386_v43 = vld [vmem:[%s10122_s2] ss:$0 sm:$0xff] }
  0xda   :  { %2068 = vrot.lane.b32.xlu2 %v7560_v46, %s7707_s14  ;;  %1300 = vrot.lane.b32.xlu1 %v7432_v47, %s7707_s14  ;;  %v7454_v46 = vld [vmem:[%s10120_s0 + $0x90] sm:$0xff] }
  0xdb   :  { %2036 = vrot.lane.b32.xlu0 %v7544_v48, %s7707_s14 }
  0xdc   :  { %v8298_v36 = vpop.permute.xlu2 %1250  ;;  %v8300_v53 = vpop.permute.xlu1 %1240 }
  0xdd   :  { %v8304_v55 = vpop.permute.xlu0 %2006 }
  0xdf   :  { %3108 = vmatmul.bf16.gmra.mxu1 %v2379_v54  ;;  %v2387_v54 = vsel %vm2096_vm0, %v7454_v46, %v8053_v17  ;;  %v7327_v17 = vld [vmem:[%s10120_s0 + $0x50] sm:$0xff] }
  0xe2   :  { %1302 = vrot.lane.b32.xlu2 %v7433_v56, %s7707_s14  ;;  %2038 = vrot.lane.b32.xlu1 %v7545_v59, %s7707_s14 }
  0xe3   :  { %1270 = vrot.lane.b32.xlu0 %v7417_v62, %s7707_s14 }
  0xe4   :  { %v8321_v34 = vpop.permute.xlu2 %2020  ;;  %v8323_v0 = vpop.permute.xlu1 %2010 }
  0xe5   :  { %v8327_v5 = vpop.permute.xlu0 %1242 }
  0xe7   :  { %2784 = vmatmul.bf16.gmra.mxu0 %v2127_v2  ;;  %v7548_v2 = vld [vmem:[%s10120_s0 + $0x1a0] sm:$0xff] }
  0xea   :  { %2040 = vrot.lane.b32.xlu2 %v7546_v7, %s7707_s14  ;;  %1272 = vrot.lane.b32.xlu1 %v7418_v8, %s7707_s14  ;;  %v7420_v7 = vld [vmem:[%s10120_s0 + $0x158] sm:$0xff] }
  0xeb   :  { %2070 = vrot.lane.b32.xlu0 %v7561_v10, %s7707_s14 }
  0xec   :  { %v8344_v9 = vpop.permute.xlu2 %1256  ;;  %v8346_v13 = vpop.permute.xlu1 %1246 }
  0xed   :  { %v8350_v16 = vpop.permute.xlu0 %2012 }
  0xef   :  { %3113 = vmatmul.bf16.gmra.mxu1 %v2383_v15 }
  0xf2   :  { %1274 = vrot.lane.b32.xlu2 %v7419_v18, %s7707_s14  ;;  %2072 = vrot.lane.b32.xlu1 %v7562_v19, %s7707_s14  ;;  %v2135_v18 = vsel %vm2096_vm0, %v7327_v17, %v8144_v52  ;;  %v7564_v52 = vld [vmem:[%s10120_s0 + $0x230] sm:$0xff]  ;;  %v7565_v17 = vld [vmem:[%s10120_s0 + $0x238] sm:$0xff] }
  0xf3   :  { %1304 = vrot.lane.b32.xlu0 %v7434_v22, %s7707_s14 }
  0xf4   :  { %v2750_v27 = vpop.f32.mrf.mxu0  ;;  %v2057_v28 = vpop.permute.xlu2 %2056 }
  0xf5   :  { %v8372_v31 = vpop.permute.xlu1 %2016  ;;  %v8374_v35 = vpop.permute.xlu0 %1248  ;;  %v2531_v37 = vsel %vm2096_vm0, %v7490_v44, %v2057_v28  ;;  %v2751_v47 = vadd.f32 %v8386_v43, %v2750_v27  ;;  %v7549_v44 = vld [vmem:[%s10120_s0 + $0x1a8] sm:$0xff]  ;;  %v7421_v27 = vld [vmem:[%s10120_s0 + $0x160] sm:$0xff] }
  0xf6   :  { %3298 = vmatmul.bf16.vlgmr.msra.gmra.mxu3 %v2531_v37  ;;  %v7455_v37 = vld [vmem:[%s10120_s0 + $0x98] sm:$0xff] }
  0xf7   :  { %2789 = vmatmul.bf16.gmra.mxu0 %v2131_v29 }
  0xfa   :  { %2074 = vrot.lane.b32.xlu2 %v7563_v38, %s7707_s14  ;;  %1306 = vrot.lane.b32.xlu1 %v7435_v39, %s7707_s14  ;;  %v7362_v39 = vld [vmem:[%s10120_s0 + $0x188] sm:$0xff] }
  0xfb   :  { %2042 = vrot.lane.b32.xlu0 %v7547_v42, %s7707_s14 }
  0xfc   :  { %v2752_v48 = vpop.f32.mrf.mxu0  ;;  %v3079_v51 = vpop.f32.mrf.mxu1 }
  0xfd   :  { %v3080_v56 = vadd.f32 %v3079_v51, %v2751_v47  ;;  %v8400_v59 = vpop.permute.xlu1 %1252  ;;  %v8402_v62 = vpop.permute.xlu0 %2018  ;;  %v2753_v8 = vadd.f32 %v8386_v43, %v2752_v48  ;;  %v2391_v51 = vsel %vm2096_vm0, %v7455_v37, %v8141_v50  ;;  %v7437_v50 = vld [vmem:[%s10120_s0 + $0x1f0] sm:$0xff] }
  0xfe   :  { %v1291_v37 = vpop.permute.xlu2 %1290 }
  0xff   :  { %3118 = vmatmul.bf16.gmra.mxu1 %v2387_v54  ;;  %v3399_v10 = vmax.f32 %v3080_v56, 0.0 }
 0x101   :  { %v3527_v28 = vpack.c.bf16 %v3399_v10, %v3399_v10 }
 0x102   :  { %1308 = vrot.lane.b32.xlu2 %v7436_v63, %s7707_s14  ;;  %2044 = vrot.lane.b32.xlu1 %v7548_v2, %s7707_s14 }
 0x103   :  { %1276 = vrot.lane.b32.xlu0 %v7420_v7, %s7707_s14  ;;  %v3673_v42 = vunpack.c.l.b16 %v3527_v28  ;;  %v7422_v7 = vld [vmem:[%s10120_s0 + $0x170] sm:$0xff] }
 0x104   :  { %v8420_v11 = vpop.f32.mrf.mxu0  ;;  %v3081_v15 = vpop.f32.mrf.mxu1 }
 0x105   :  { %v3082_v19 = vadd.f32 %v3081_v15, %v2753_v8  ;;  %v8424_v22 = vpop.permute.xlu1 %2022  ;;  %v8426_v24 = vpop.permute.xlu0 %1254  ;;  %v7328_v8 = vld [vmem:[%s10120_s0 + $0x58] sm:$0xff] }
 0x107   :  { %v3400_v29 = vmax.f32 %v3082_v19, 0.0  ;;  %2794 = vmatmul.bf16.gmra.mxu0 %v2135_v18  ;;  %v2139_v18 = vsel %vm2096_vm0, %v7328_v8, %v8071_v25  ;;  %v7363_v25 = vld [vmem:[%s10120_s0 + $0x190] sm:$0xff] }
 0x109   :  { %v3528_v38 = vpack.c.bf16 %v3400_v29, %v3400_v29  ;;  %v7550_v29 = vld [vmem:[%s10120_s0 + $0x1b8] sm:$0xff] }
 0x10a   :  { %2046 = vrot.lane.b32.xlu2 %v7549_v44, %s7707_s14  ;;  %1278 = vrot.lane.b32.xlu1 %v7421_v27, %s7707_s14  ;;  %v7566_v44 = vld [vmem:[%s10120_s0 + $0x248] sm:$0xff]  ;;  %v7438_v27 = vld [vmem:[%s10120_s0 + $0x200] sm:$0xff] }
 0x10b   :  { %v3674_v46 = vunpack.c.l.b16 %v3528_v38  ;;  %2076 = vrot.lane.b32.xlu0 %v7564_v52, %s7707_s14  ;;  %v7456_v52 = vld [vmem:[%s10120_s0 + $0xa0] sm:$0xff]  ;;  %v7491_v38 = vld [vmem:[%s10120_s0 + $0x1d8] sm:$0xff] }
 0x10c   :  { %v8446_v47 = vpop.f32.mrf.mxu0  ;;  %v8448_v48 = vpop.f32.mrf.mxu1 }
 0x10d   :  { %v8452_v54 = vpack.c.b16 %v3674_v46, %v3673_v42  ;;  %v1289_v56 = vpop.permute.xlu1 %1288  ;;  %v8454_v63 = vpop.permute.xlu0 %2024  ;;  %v2279_v46 = vsel %vm2096_vm0, %v7363_v25, %v1291_v37  ;;  %v7424_v25 = vld [vmem:[%s10120_s0 + $0x180] sm:$0xff]  ;;  %v7567_v37 = vld [vmem:[%s10120_s0 + $0x250] sm:$0xff] }
 0x10e   :  { %v2275_v2 = vsel %vm2096_vm0, %v7362_v39, %v1289_v56 }
 0x10f   :  { %2969 = vmatmul.bf16.vlgmr.msra.gmra.mxu2 %v2275_v2  ;;  %3123 = vmatmul.bf16.gmra.mxu1 %v2391_v51  ;;  %v2395_v51 = vsel %vm2096_vm0, %v7456_v52, %v8166_v61  ;;  %v7439_v2 = vld [vmem:[%s10120_s0 + $0x208] sm:$0xff]  ;;  %v7329_v61 = vld [vmem:[%s10120_s0 + $0x60] sm:$0xff]  ;;  %v8540_v52 = vpop.permute.xlu2 %2028 }
 0x110   :  { %10139 = vst [vmem:[#allocation4_spill] sm:$0xff] %v8540_v52 }
 0x112   :  { %1280 = vrot.lane.b32.xlu2 %v7422_v7, %s7707_s14  ;;  %2078 = vrot.lane.b32.xlu1 %v7565_v17, %s7707_s14  ;;  %v7551_v7 = vld [vmem:[%s10120_s0 + $0x1c0] sm:$0xff] }
 0x113   :  { %1310 = vrot.lane.b32.xlu0 %v7437_v50, %s7707_s14  ;;  %v7423_v50 = vld [vmem:[%s10120_s0 + $0x178] sm:$0xff] }
 0x114   :  { %v8472_v10 = vpop.f32.mrf.mxu0  ;;  %v8474_v15 = vpop.f32.mrf.mxu1 }
 0x115   :  { %v8478_v19 = vpop.permute.xlu0 %1258  ;;  %v8486_v28 = vpop.permute.xlu1 %2026 }
 0x116   :  { %10137 = vst [vmem:[#allocation2_spill] sm:$0xff] %v8486_v28  ;;  %v2758_v28 = vadd.f32 %v8386_v43, %v8446_v47  ;;  %v7331_v47 = vld [vmem:[%s10120_s0 + $0x70] sm:$0xff] }
 0x117   :  { %2799 = vmatmul.bf16.gmra.mxu0 %v2139_v18 }
 0x11a   :  { %2080 = vrot.lane.b32.xlu2 %v7566_v44, %s7707_s14  ;;  %1312 = vrot.lane.b32.xlu1 %v7438_v27, %s7707_s14  ;;  %v2143_v27 = vsel %vm2096_vm0, %v7329_v61, %v8163_v58  ;;  %v7457_v58 = vld [vmem:[%s10120_s0 + $0xa8] sm:$0xff] }
 0x11b   :  { %2048 = vrot.lane.b32.xlu0 %v7550_v29, %s7707_s14  ;;  %v7552_v29 = vld [vmem:[%s10120_s0 + $0x1c8] sm:$0xff] }
 0x11c   :  { %v8503_v39 = vpop.f32.mrf.mxu0  ;;  %v8505_v42 = vpop.f32.mrf.mxu1 }
 0x11d   :  { %v2059_v56 = vpop.permute.xlu0 %2058  ;;  %v8523_v8 = vpop.permute.xlu1 %1260 }
 0x11e   :  { %v2535_v17 = vsel %vm2096_vm0, %v7491_v38, %v2059_v56  ;;  %10138 = vst [vmem:[#allocation3_spill] sm:$0xff] %v8523_v8  ;;  %v7364_v38 = vld [vmem:[%s10120_s0 + $0x198] sm:$0xff] }
 0x11f   :  { %2974 = vmatmul.bf16.gmra.mxu2 %v2279_v46  ;;  %3128 = vmatmul.bf16.gmra.mxu1 %v2395_v51  ;;  %v7492_v46 = vld [vmem:[%s10120_s0 + $0x1e0] sm:$0xff] }
 0x120   :  { %3303 = vmatmul.bf16.gmra.mxu3 %v2535_v17 }
 0x122   :  { %1314 = vrot.lane.b32.xlu2 %v7439_v2, %s7707_s14  ;;  %2050 = vrot.lane.b32.xlu1 %v7551_v7, %s7707_s14 }
 0x123   :  { %1282 = vrot.lane.b32.xlu0 %v7423_v50, %s7707_s14  ;;  %v2399_v50 = vsel %vm2096_vm0, %v7457_v58, %v8093_v33  ;;  %v7330_v33 = vld [vmem:[%s10120_s0 + $0x68] sm:$0xff] }
 0x124   :  { %v8528_v18 = vpop.f32.mrf.mxu0  ;;  %v8530_v44 = vpop.f32.mrf.mxu1 }
 0x125   :  { %v2061_v51 = vpop.permute.xlu1 %2060  ;;  %v1293_v56 = vpop.permute.xlu0 %1292 }
 0x126   :  { %v2283_v17 = vsel %vm2096_vm0, %v7364_v38, %v1293_v56  ;;  %v2539_v61 = vsel %vm2096_vm0, %v7492_v46, %v2061_v51  ;;  %v2147_v46 = vsel %vm2096_vm0, %v7330_v33, %v8189_v6  ;;  %v7569_v51 = vld [vmem:[%s10120_s0 + $0x260] sm:$0xff]  ;;  %v7441_v56 = vld [vmem:[%s10120_s0 + $0x218] sm:$0xff]  ;;  %v7458_v6 = vld [vmem:[%s10120_s0 + $0xb0] sm:$0xff] }
 0x127   :  { %2804 = vmatmul.bf16.gmra.mxu0 %v2143_v27  ;;  %v7425_v27 = vld [vmem:[%s10120_s0 + $0x188] sm:$0xff]  ;;  %v2403_v52 = vsel %vm2096_vm0, %v7458_v6, %v8185_v4  ;;  %v7442_v4 = vld [vmem:[%s10120_s0 + $0x220] sm:$0xff] }
 0x12a   :  { %2052 = vrot.lane.b32.xlu2 %v7552_v29, %s7707_s14  ;;  %1284 = vrot.lane.b32.xlu1 %v7424_v25, %s7707_s14  ;;  %v7568_v29 = vld [vmem:[%s10120_s0 + $0x258] sm:$0xff]  ;;  %v7440_v25 = vld [vmem:[%s10120_s0 + $0x210] sm:$0xff] }
 0x12b   :  { %2082 = vrot.lane.b32.xlu0 %v7567_v37, %s7707_s14  ;;  %v8577_v37 = vpop.permute.xlu2 %1262 }
 0x12c   :  { %v8557_v2 = vpop.f32.mrf.mxu0  ;;  %v8559_v7 = vpop.f32.mrf.mxu1  ;;  %10140 = vst [vmem:[#allocation5_spill] sm:$0xff] %v8577_v37 }
 0x12d   :  { %v1295_v33 = vpop.permute.xlu1 %1294 }
 0x12f   :  { %2979 = vmatmul.bf16.gmra.mxu2 %v2283_v17  ;;  %3133 = vmatmul.bf16.gmra.mxu1 %v2399_v50  ;;  %v8590_v17 = vpop.permute.xlu0 %2030  ;;  %v7553_v50 = vld [vmem:[%s10120_s0 + $0x1d0] sm:$0xff] }
 0x130   :  { %3308 = vmatmul.bf16.gmra.mxu3 %v2539_v61  ;;  %10141 = vst [vmem:[#allocation6_spill] sm:$0xff] %v8590_v17  ;;  %v7365_v61 = vld [vmem:[%s10120_s0 + $0x1a0] sm:$0xff] }
 0x131   :  { %v2287_v37 = vsel %vm2096_vm0, %v7365_v61, %v1295_v33  ;;  %v7572_v33 = vld [vmem:[%s10120_s0 + $0x278] sm:$0xff] }
 0x132   :  { %1286 = vrot.lane.b32.xlu2 %v7425_v27, %s7707_s14  ;;  %2084 = vrot.lane.b32.xlu1 %v7568_v29, %s7707_s14  ;;  %v7493_v29 = vld [vmem:[%s10120_s0 + $0x1e8] sm:$0xff] }
 0x133   :  { %1316 = vrot.lane.b32.xlu0 %v7440_v25, %s7707_s14  ;;  %v2063_v25 = vpop.permute.xlu2 %2062 }
 0x134   :  { %v2770_v38 = vpop.f32.mrf.mxu0  ;;  %v3096_v58 = vpop.f32.mrf.mxu1  ;;  %v2543_v8 = vsel %vm2096_vm0, %v7493_v29, %v2063_v25  ;;  %v2768_v25 = vadd.f32 %v8386_v43, %v8557_v2 }
 0x135   :  { %v2771_v27 = vadd.f32 %v8386_v43, %v2770_v38 }
 0x137   :  { %2809 = vmatmul.bf16.gmra.mxu0 %v2147_v46  ;;  %v8629_v61 = vpop.permute.xlu0 %1264 }
 0x13a   :  { %2086 = vrot.lane.b32.xlu2 %v7569_v51, %s7707_s14  ;;  %1318 = vrot.lane.b32.xlu1 %v7441_v56, %s7707_s14  ;;  %v7443_v51 = vld [vmem:[%s10120_s0 + $0x228] sm:$0xff] }
 0x13b   :  { %2054 = vrot.lane.b32.xlu0 %v7553_v50, %s7707_s14  ;;  %v7570_v56 = vld [vmem:[%s10120_s0 + $0x268] sm:$0xff]  ;;  %v3087_v50 = vadd.f32 %v8474_v15, %v2758_v28 }
 0x13c   :  { %v2772_v46 = vpop.f32.mrf.mxu0  ;;  %v3099_v17 = vpop.f32.mrf.mxu1 }
 0x13d   :  { %v3100_v38 = vadd.f32 %v3099_v17, %v2771_v27  ;;  %v2756_v17 = vadd.f32 %v8386_v43, %v8420_v11  ;;  %v3402_v11 = vmax.f32 %v3087_v50, 0.0  ;;  %v7459_v50 = vld [vmem:[%s10120_s0 + $0xb8] sm:$0xff] }
 0x13f   :  { %2984 = vmatmul.bf16.gmra.mxu2 %v2287_v37  ;;  %3138 = vmatmul.bf16.gmra.mxu1 %v2403_v52  ;;  %v3085_v6 = vadd.f32 %v8448_v48, %v2756_v17  ;;  %v2773_v52 = vadd.f32 %v8386_v43, %v2772_v46  ;;  %v3407_v37 = vmax.f32 %v3100_v38, 0.0  ;;  %v2766_v48 = vadd.f32 %v8386_v43, %v8528_v18  ;;  %v7444_v46 = vld [vmem:[%s10120_s0 + $0x230] sm:$0xff] }
 0x140   :  { %3313 = vmatmul.bf16.gmra.mxu3 %v2543_v8  ;;  %v2151_v8 = vsel %vm2096_vm0, %v7331_v47, %v8116_v41  ;;  %v2763_v38 = vadd.f32 %v8386_v43, %v8503_v39  ;;  %v8650_v41 = vpop.permute.xlu1 %2032  ;;  %v7571_v18 = vld [vmem:[%s10120_s0 + $0x270] sm:$0xff]  ;;  %v3530_v2 = vpack.c.bf16 %v3402_v11, %v3402_v11  ;;  %v2761_v39 = vadd.f32 %v8386_v43, %v8472_v10 }
 0x141   :  { %v3401_v29 = vmax.f32 %v3085_v6, 0.0  ;;  %v7366_v17 = vld [vmem:[%s10120_s0 + $0x1b0] sm:$0xff]  ;;  %v3095_v11 = vadd.f32 %v8559_v7, %v2766_v48  ;;  %v2407_v7 = vsel %vm2096_vm0, %v7459_v50, %v8212_v14  ;;  %v7332_v50 = vld [vmem:[%s10120_s0 + $0x78] sm:$0xff] }
 0x142   :  { %1322 = vrot.lane.b32.xlu2 %v7443_v51, %s7707_s14  ;;  %2088 = vrot.lane.b32.xlu1 %v7570_v56, %s7707_s14  ;;  %v3535_v51 = vpack.c.bf16 %v3407_v37, %v3407_v37  ;;  %v3092_v47 = vadd.f32 %v8530_v44, %v2763_v38 }
 0x143   :  { %1320 = vrot.lane.b32.xlu0 %v7442_v4, %s7707_s14  ;;  %v3097_v4 = vadd.f32 %v3096_v58, %v2768_v25  ;;  %v7494_v58 = vld [vmem:[%s10120_s0 + $0x1f8] sm:$0xff]  ;;  %v3529_v37 = vpack.c.bf16 %v3401_v29, %v3401_v29 }
 0x144   :  { %v2775_v15 = vpop.f32.mrf.mxu0  ;;  %v3101_v28 = vpop.f32.mrf.mxu1  ;;  %v3677_v10 = vunpack.c.l.b16 %v3535_v51  ;;  %v3404_v48 = vmax.f32 %v3092_v47, 0.0 }
 0x145   :  { %v3102_v27 = vadd.f32 %v3101_v28, %v2773_v52  ;;  %v2776_v6 = vadd.f32 %v8386_v43, %v2775_v15  ;;  %v3090_v28 = vadd.f32 %v8505_v42, %v2761_v39  ;;  %v3719_v15 = vunpack.c.l.b16 %v3530_v2 }
 0x146   :  { %v3406_v25 = vmax.f32 %v3097_v4, 0.0  ;;  %v3718_v51 = vunpack.c.l.b16 %v3529_v37  ;;  %v3405_v39 = vmax.f32 %v3095_v11, 0.0  ;;  %v7445_v4 = vld [vmem:[%s10120_s0 + $0x238] sm:$0xff]  ;;  %v3532_v47 = vpack.c.bf16 %v3404_v48, %v3404_v48 }
 0x147   :  { %v3408_v56 = vmax.f32 %v3102_v27, 0.0  ;;  %2814 = vmatmul.bf16.gmra.mxu0 %v2151_v8  ;;  %v1297_v8 = vpop.permute.xlu2 %1296  ;;  %v2065_v27 = vpop.permute.xlu0 %2064  ;;  %v3403_v2 = vmax.f32 %v3090_v28, 0.0 }
 0x148   :  { %v2291_v29 = vsel %vm2096_vm0, %v7366_v17, %v1297_v8  ;;  %v3534_v14 = vpack.c.bf16 %v3406_v25, %v3406_v25  ;;  %v3736_v17 = vpack.c.b16 %v3719_v15, %v3718_v51 }
 0x149   :  { %v3536_v52 = vpack.c.bf16 %v3408_v56, %v3408_v56 }
 0x14a   :  { %2092 = vrot.lane.b32.xlu2 %v7572_v33, %s7707_s14  ;;  %1324 = vrot.lane.b32.xlu1 %v7444_v46, %s7707_s14  ;;  %v2547_v46 = vsel %vm2096_vm0, %v7494_v58, %v2065_v27  ;;  %v3531_v58 = vpack.c.bf16 %v3403_v2, %v3403_v2  ;;  %v3721_v28 = vunpack.c.l.b16 %v3534_v14  ;;  %v2155_v27 = vsel %vm2096_vm0, %v7332_v50, %v8208_v12 }
 0x14b   :  { %v3678_v44 = vunpack.c.l.b16 %v3536_v52  ;;  %2090 = vrot.lane.b32.xlu0 %v7571_v18, %s7707_s14  ;;  %v7573_v18 = vld [vmem:[%s10120_s0 + $0x280] sm:$0xff]  ;;  %v3533_v52 = vpack.c.bf16 %v3405_v39, %v3405_v39 }
 0x14c   :  { %v2777_v38 = vpop.f32.mrf.mxu0  ;;  %v3104_v56 = vpop.f32.mrf.mxu1 }
 0x14d   :  { %v3105_v33 = vadd.f32 %v3104_v56, %v2776_v6  ;;  %v8677_v42 = vpack.c.b16 %v3678_v44, %v3677_v10  ;;  %v8688_v6 = vpop.permute.xlu1 %1266  ;;  %v2778_v37 = vadd.f32 %v8386_v43, %v2777_v38  ;;  %v3676_v44 = vunpack.c.l.b16 %v3532_v47  ;;  %v7367_v38 = vld [vmem:[%s10120_s0 + $0x1b8] sm:$0xff] }
 0x14e   :  { %v3720_v25 = vunpack.c.l.b16 %v3533_v52  ;;  %v3675_v56 = vunpack.c.l.b16 %v3531_v58 }
 0x14f   :  { %2989 = vmatmul.bf16.gmra.mxu2 %v2291_v29  ;;  %3143 = vmatmul.bf16.gmra.mxu1 %v2407_v7  ;;  %v3409_v11 = vmax.f32 %v3105_v33, 0.0  ;;  %v8696_v29 = vpop.permute.xlu2 %2034  ;;  %v7460_v33 = vld [vmem:[%s10120_s0 + $0xc0] sm:$0xff] }
 0x150   :  { %3318 = vmatmul.bf16.gmra.mxu3 %v2547_v46  ;;  %v8698_v46 = vpack.c.b16 %v3721_v28, %v3720_v25  ;;  %v8707_v39 = vpack.c.b16 %v3676_v44, %v3675_v56  ;;  %v2411_v58 = vsel %vm2096_vm0, %v7460_v33, %v8139_v49  ;;  %v7368_v33 = vld [vmem:[%s10120_s0 + $0x1c0] sm:$0xff] }
 0x151   :  { %v3537_v7 = vpack.c.bf16 %v3409_v11, %v3409_v11 }
 0x152   :  { %2094 = vrot.lane.b32.xlu1 %v7573_v18, %s7707_s14  ;;  %3745 = vrot.lane.b32.xlu2 %v3736_v17, %s7708_s25  ;;  %v7495_v18 = vld [vmem:[%s10120_s0 + $0x200] sm:$0xff] }
 0x153   :  { %1326 = vrot.lane.b32.xlu0 %v7445_v4, %s7707_s14  ;;  %v1299_v4 = vpop.permute.xlu0 %1298  ;;  %v3722_v14 = vunpack.c.l.b16 %v3537_v7 }
 0x154   :  { %v2780_v8 = vpop.f32.mrf.mxu0  ;;  %v3106_v10 = vpop.f32.mrf.mxu1  ;;  %v2295_v52 = vsel %vm2096_vm0, %v7367_v38, %v1299_v4 }
 0x155   :  { %v3107_v15 = vadd.f32 %v3106_v10, %v2778_v37  ;;  %v2781_v12 = vadd.f32 %v8386_v43, %v2780_v8  ;;  %v2067_v2 = vpop.permute.xlu1 %2066  ;;  %v7333_v8 = vld [vmem:[%s10120_s0 + $0x80] sm:$0xff] }
 0x156   :  { %v2551_v11 = vsel %vm2096_vm0, %v7495_v18, %v2067_v2  ;;  %v2159_v49 = vsel %vm2096_vm0, %v7333_v8, %v8235_v23  ;;  %v7496_v23 = vld [vmem:[%s10120_s0 + $0x208] sm:$0xff] }
 0x157   :  { %v3410_v48 = vmax.f32 %v3107_v15, 0.0  ;;  %2819 = vmatmul.bf16.gmra.mxu0 %v2155_v27  ;;  %v8725_v10 = vpop.permute.xlu2 %1268 }
 0x159   :  { %v3538_v51 = vpack.c.bf16 %v3410_v48, %v3410_v48 }
 0x15a   :  { %3811 = vrot.lane.b32.xlu1 %v8698_v46, %s7709_s16 }
 0x15b   :  { %v3723_v17 = vunpack.c.l.b16 %v3538_v51  ;;  %3778 = vrot.lane.b32.xlu0 %v8707_v39, %s7707_s14  ;;  %v8730_v7 = vpop.permute.xlu0 %2036 }
 0x15c   :  { %v2782_v50 = vpop.f32.mrf.mxu0  ;;  %v3109_v47 = vpop.f32.mrf.mxu1 }
 0x15d   :  { %v3110_v37 = vadd.f32 %v3109_v47, %v2781_v12  ;;  %v8720_v28 = vpack.c.b16 %v3723_v17, %v3722_v14  ;;  %v2783_v27 = vadd.f32 %v8386_v43, %v2782_v50  ;;  %v7461_v12 = vld [vmem:[%s10120_s0 + $0xc8] sm:$0xff]  ;;  %v1301_v4 = vpop.permute.xlu1 %1300 }
 0x15f   :  { %2994 = vmatmul.bf16.gmra.mxu2 %v2295_v52  ;;  %3148 = vmatmul.bf16.gmra.mxu1 %v2411_v58  ;;  %v3411_v44 = vmax.f32 %v3110_v37, 0.0  ;;  %v2069_v2 = vpop.permute.xlu2 %2068  ;;  %v2299_v52 = vsel %vm2096_vm0, %v7368_v33, %v1301_v4  ;;  %v2415_v58 = vsel %vm2096_vm0, %v7461_v12, %v8231_v21 }
 0x160   :  { %3323 = vmatmul.bf16.gmra.mxu3 %v2551_v11  ;;  %v2555_v11 = vsel %vm2096_vm0, %v7496_v23, %v2069_v2 }
 0x161   :  { %v3539_v48 = vpack.c.bf16 %v3411_v44, %v3411_v44 }
 0x163   :  { %v3769_v14 = vunpack.c.l.b16 %v3539_v48  ;;  %v8751_v44 = vpop.permute.xlu0 %1270 }
 0x164   :  { %v2785_v15 = vpop.f32.mrf.mxu0  ;;  %v3111_v25 = vpop.f32.mrf.mxu1 }
 0x165   :  { %v3112_v56 = vadd.f32 %v3111_v25, %v2783_v27  ;;  %v2786_v51 = vadd.f32 %v8386_v43, %v2785_v15  ;;  %v7334_v27 = vld [vmem:[%s10120_s0 + $0x90] sm:$0xff] }
 0x166   :  { %v2163_v21 = vsel %vm2096_vm0, %v7334_v27, %v8161_v57  ;;  %v7497_v57 = vld [vmem:[%s10120_s0 + $0x210] sm:$0xff] }
 0x167   :  { %v3412_v38 = vmax.f32 %v3112_v56, 0.0  ;;  %2824 = vmatmul.bf16.gmra.mxu0 %v2159_v49  ;;  %v1303_v4 = vpop.permute.xlu2 %1302 }
 0x169   :  { %v3540_v18 = vpack.c.bf16 %v3412_v38, %v3412_v38  ;;  %v8756_v38 = vpop.permute.xlu1 %2038 }
 0x16b   :  { %v3770_v17 = vunpack.c.l.b16 %v3540_v18  ;;  %v7462_v18 = vld [vmem:[%s10120_s0 + $0xd8] sm:$0xff] }
 0x16c   :  { %v2787_v50 = vpop.f32.mrf.mxu0  ;;  %v3114_v47 = vpop.f32.mrf.mxu1 }
 0x16d   :  { %v3115_v37 = vadd.f32 %v3114_v47, %v2786_v51  ;;  %v8746_v8 = vpack.c.b16 %v3770_v17, %v3769_v14  ;;  %v2788_v15 = vadd.f32 %v8386_v43, %v2787_v50  ;;  %v7369_v51 = vld [vmem:[%s10120_s0 + $0x1c8] sm:$0xff]  ;;  %v2071_v14 = vpop.permute.xlu0 %2070 }
 0x16e   :  { %v2559_v27 = vsel %vm2096_vm0, %v7497_v57, %v2071_v14  ;;  %v7463_v57 = vld [vmem:[%s10120_s0 + $0xe0] sm:$0xff]  ;;  %v7498_v14 = vld [vmem:[%s10120_s0 + $0x218] sm:$0xff] }
 0x16f   :  { %2999 = vmatmul.bf16.gmra.mxu2 %v2299_v52  ;;  %3153 = vmatmul.bf16.gmra.mxu1 %v2415_v58  ;;  %v3413_v25 = vmax.f32 %v3115_v37, 0.0  ;;  %v2303_v58 = vsel %vm2096_vm0, %v7369_v51, %v1303_v4  ;;  %v2419_v37 = vsel %vm2096_vm0, %v7462_v18, %v8258_v32  ;;  %v8782_v51 = vpop.permute.xlu2 %2040 }
 0x170   :  { %3328 = vmatmul.bf16.gmra.mxu3 %v2555_v11  ;;  %10143 = vst [vmem:[#allocation8_spill] sm:$0xff] %v8782_v51 }
 0x171   :  { %v3541_v33 = vpack.c.bf16 %v3413_v25, %v3413_v25  ;;  %v7335_v25 = vld [vmem:[%s10120_s0 + $0x98] sm:$0xff] }
 0x172   :  { %v2167_v32 = vsel %vm2096_vm0, %v7335_v25, %v8254_v30 }
 0x173   :  { %v3802_v17 = vunpack.c.l.b16 %v3541_v33 }
 0x174   :  { %v2790_v49 = vpop.f32.mrf.mxu0  ;;  %v3116_v56 = vpop.f32.mrf.mxu1 }
 0x175   :  { %v3117_v48 = vadd.f32 %v3116_v56, %v2788_v15  ;;  %v2791_v23 = vadd.f32 %v8386_v43, %v2790_v49  ;;  %v8777_v49 = vpop.permute.xlu1 %1272 }
 0x176   :  { %10142 = vst [vmem:[#allocation7_spill] sm:$0xff] %v8777_v49 }
 0x177   :  { %v3414_v12 = vmax.f32 %v3117_v48, 0.0  ;;  %2829 = vmatmul.bf16.gmra.mxu0 %v2163_v21 }
 0x179   :  { %v3542_v2 = vpack.c.bf16 %v3414_v12, %v3414_v12 }
 0x17b   :  { %v3803_v50 = vunpack.c.l.b16 %v3542_v2  ;;  %v7370_v2 = vld [vmem:[%s10120_s0 + $0x1d0] sm:$0xff] }
 0x17c   :  { %v2792_v47 = vpop.f32.mrf.mxu0  ;;  %v3119_v52 = vpop.f32.mrf.mxu1 }
 0x17d   :  { %v3120_v11 = vadd.f32 %v3119_v52, %v2791_v23  ;;  %v8772_v15 = vpack.c.b16 %v3803_v50, %v3802_v17  ;;  %v2793_v56 = vadd.f32 %v8386_v43, %v2792_v47  ;;  %v2073_v30 = vpop.permute.xlu1 %2072  ;;  %v1305_v17 = vpop.permute.xlu0 %1304 }
 0x17f   :  { %3004 = vmatmul.bf16.gmra.mxu2 %v2303_v58  ;;  %3158 = vmatmul.bf16.gmra.mxu1 %v2419_v37  ;;  %v3415_v21 = vmax.f32 %v3120_v11, 0.0  ;;  %v2307_v11 = vsel %vm2096_vm0, %v7370_v2, %v1305_v17 }
 0x180   :  { %3333 = vmatmul.bf16.gmra.mxu3 %v2559_v27  ;;  %v2423_v27 = vsel %vm2096_vm0, %v7463_v57, %v8183_v3 }
 0x181   :  { %v3543_v18 = vpack.c.bf16 %v3415_v21, %v3415_v21 }
 0x183   :  { %v3847_v50 = vunpack.c.l.b16 %v3543_v18 }
 0x184   :  { %v2795_v48 = vpop.f32.mrf.mxu0  ;;  %v3121_v33 = vpop.f32.mrf.mxu1 }
 0x185   :  { %v3122_v12 = vadd.f32 %v3121_v33, %v2793_v56  ;;  %v2796_v47 = vadd.f32 %v8386_v43, %v2795_v48  ;;  %v2563_v56 = vsel %vm2096_vm0, %v7498_v14, %v2073_v30  ;;  %v3299_v33 = vpop.f32.mrf.mxu3  ;;  %v7336_v48 = vld [vmem:[%s10120_s0 + $0xa0] sm:$0xff]  ;;  %v8809_v17 = vpop.permute.xlu0 %2042 }
 0x186   :  { %10145 = vst [vmem:[#allocation10_spill] sm:$0xff] %v8809_v17 }
 0x187   :  { %v3416_v23 = vmax.f32 %v3122_v12, 0.0  ;;  %2834 = vmatmul.bf16.gmra.mxu0 %v2167_v32  ;;  %v8803_v32 = vpop.permute.xlu2 %1274 }
 0x188   :  { %10144 = vst [vmem:[#allocation9_spill] sm:$0xff] %v8803_v32 }
 0x189   :  { %v3544_v4 = vpack.c.bf16 %v3416_v23, %v3416_v23 }
 0x18b   :  { %v3848_v52 = vunpack.c.l.b16 %v3544_v4  ;;  %v2171_v4 = vsel %vm2096_vm0, %v7336_v48, %v8281_v45  ;;  %v7499_v45 = vld [vmem:[%s10120_s0 + $0x220] sm:$0xff] }
 0x18c   :  { %v2797_v58 = vpop.f32.mrf.mxu0  ;;  %v3124_v37 = vpop.f32.mrf.mxu1 }
 0x18d   :  { %v8797_v25 = vpack.c.b16 %v3848_v52, %v3847_v50  ;;  %v3125_v21 = vadd.f32 %v3124_v37, %v2796_v47  ;;  %v2798_v18 = vadd.f32 %v8386_v43, %v2797_v58  ;;  %v7371_v52 = vld [vmem:[%s10120_s0 + $0x1d8] sm:$0xff]  ;;  %v7464_v58 = vld [vmem:[%s10120_s0 + $0xe8] sm:$0xff] }
 0x18f   :  { %3009 = vmatmul.bf16.gmra.mxu2 %v2307_v11  ;;  %3163 = vmatmul.bf16.gmra.mxu1 %v2423_v27  ;;  %v3417_v23 = vmax.f32 %v3125_v21, 0.0  ;;  %v3301_v27 = vpop.f32.mrf.mxu3  ;;  %v2075_v21 = vpop.permute.xlu2 %2074 }
 0x190   :  { %3338 = vmatmul.bf16.gmra.mxu3 %v2563_v56  ;;  %v2567_v17 = vsel %vm2096_vm0, %v7499_v45, %v2075_v21 }
 0x191   :  { %v3545_v50 = vpack.c.bf16 %v3417_v23, %v3417_v23 }
 0x192   :  { %v2970_v12 = vpop.f32.mrf.mxu2 }
 0x193   :  { %v2971_v3 = vadd.f32 %v8386_v43, %v2970_v12  ;;  %v3892_v48 = vunpack.c.l.b16 %v3545_v50  ;;  %v8830_v50 = vpop.permute.xlu0 %1276 }
 0x194   :  { %v2800_v2 = vpop.f32.mrf.mxu0  ;;  %v3126_v57 = vpop.f32.mrf.mxu1 }
 0x195   :  { %v3300_v14 = vadd.f32 %v3299_v33, %v2971_v3  ;;  %v3127_v30 = vadd.f32 %v3126_v57, %v2798_v18  ;;  %v1307_v33 = vpop.permute.xlu1 %1306  ;;  %v2801_v12 = vadd.f32 %v8386_v43, %v2800_v2  ;;  %v7337_v2 = vld [vmem:[%s10120_s0 + $0xa8] sm:$0xff] }
 0x197   :  { %v3418_v47 = vmax.f32 %v3127_v30, 0.0  ;;  %2839 = vmatmul.bf16.gmra.mxu0 %v2171_v4  ;;  %v3487_v37 = vmax.f32 %v3300_v14, 0.0  ;;  %v2311_v4 = vsel %vm2096_vm0, %v7371_v52, %v1307_v33  ;;  %v2427_v14 = vsel %vm2096_vm0, %v7464_v58, %v8277_v40 }
 0x199   :  { %v3546_v11 = vpack.c.bf16 %v3418_v47, %v3418_v47  ;;  %v3615_v30 = vpack.c.bf16 %v3487_v37, %v3487_v37 }
 0x19a   :  { %v2972_v56 = vpop.f32.mrf.mxu2 }
 0x19b   :  { %v3893_v18 = vunpack.c.l.b16 %v3546_v11  ;;  %v2973_v23 = vadd.f32 %v8386_v43, %v2972_v56  ;;  %v3863_v52 = vunpack.c.l.b16 %v3615_v30 }
 0x19c   :  { %v2802_v3 = vpop.f32.mrf.mxu0  ;;  %v3129_v57 = vpop.f32.mrf.mxu1 }
 0x19d   :  { %v3302_v47 = vadd.f32 %v3301_v27, %v2973_v23  ;;  %v3910_v32 = vpack.c.b16 %v3893_v18, %v3892_v48  ;;  %v3130_v49 = vadd.f32 %v3129_v57, %v2801_v12  ;;  %v2803_v11 = vadd.f32 %v8386_v43, %v2802_v3  ;;  %v8838_v18 = vpop.permute.xlu1 %2044 }
 0x19f   :  { %v3488_v51 = vmax.f32 %v3302_v47, 0.0  ;;  %3014 = vmatmul.bf16.gmra.mxu2 %v2311_v4  ;;  %3168 = vmatmul.bf16.gmra.mxu1 %v2427_v14  ;;  %v3419_v27 = vmax.f32 %v3130_v49, 0.0  ;;  %v7372_v49 = vld [vmem:[%s10120_s0 + $0x1e0] sm:$0xff]  ;;  %v7500_v4 = vld [vmem:[%s10120_s0 + $0x228] sm:$0xff]  ;;  %v1309_v14 = vpop.permute.xlu2 %1308  ;;  %v2077_v47 = vpop.permute.xlu0 %2076 }
 0x1a0   :  { %3343 = vmatmul.bf16.gmra.mxu3 %v2567_v17  ;;  %3919 = vrot.lane.b32.xlu2 %v3910_v32, %s7708_s25  ;;  %v2175_v32 = vsel %vm2096_vm0, %v7337_v2, %v8206_v60  ;;  %v7465_v60 = vld [vmem:[%s10120_s0 + $0xf0] sm:$0xff] }
 0x1a1   :  { %v3616_v40 = vpack.c.bf16 %v3488_v51, %v3488_v51  ;;  %v3547_v51 = vpack.c.bf16 %v3419_v27, %v3419_v27  ;;  %v2315_v27 = vsel %vm2096_vm0, %v7372_v49, %v1309_v14 }
 0x1a2   :  { %v2975_v58 = vpop.f32.mrf.mxu2 }
 0x1a3   :  { %v3864_v37 = vunpack.c.l.b16 %v3616_v40  ;;  %v2976_v45 = vadd.f32 %v8386_v43, %v2975_v58  ;;  %v3304_v56 = vpop.f32.mrf.mxu3  ;;  %v3849_v2 = vunpack.c.l.b16 %v3547_v51 }
 0x1a4   :  { %v2805_v21 = vpop.f32.mrf.mxu0  ;;  %v3131_v17 = vpop.f32.mrf.mxu1 }
 0x1a5   :  { %v8836_v33 = vpack.c.b16 %v3864_v37, %v3863_v52  ;;  %v3305_v48 = vadd.f32 %v3304_v56, %v2976_v45  ;;  %v3132_v12 = vadd.f32 %v3131_v17, %v2803_v11  ;;  %v2431_v45 = vsel %vm2096_vm0, %v7465_v60, %v8304_v55  ;;  %v7338_v55 = vld [vmem:[%s10120_s0 + $0xb0] sm:$0xff] }
 0x1a7   :  { %v3420_v23 = vmax.f32 %v3132_v12, 0.0  ;;  %2844 = vmatmul.bf16.gmra.mxu0 %v2175_v32  ;;  %v3489_v3 = vmax.f32 %v3305_v48, 0.0  ;;  %v2571_v32 = vsel %vm2096_vm0, %v7500_v4, %v2077_v47 }
 0x1a8   :  { %3747 = vrot.lane.b32.xlu2 %v8698_v46, %s7708_s25  ;;  %v2806_v46 = vadd.f32 %v8386_v43, %v2805_v21  ;;  %v8859_v21 = vpop.permute.xlu1 %1278 }
 0x1a9   :  { %v3548_v57 = vpack.c.bf16 %v3420_v23, %v3420_v23  ;;  %v3617_v56 = vpack.c.bf16 %v3489_v3, %v3489_v3 }
 0x1aa   :  { %v2977_v30 = vpop.f32.mrf.mxu2 }
 0x1ab   :  { %v3850_v52 = vunpack.c.l.b16 %v3548_v57  ;;  %v2978_v40 = vadd.f32 %v8386_v43, %v2977_v30  ;;  %v3306_v58 = vpop.f32.mrf.mxu3  ;;  %v3908_v23 = vunpack.c.l.b16 %v3617_v56 }
 0x1ac   :  { %v2807_v37 = vpop.f32.mrf.mxu0  ;;  %v3134_v11 = vpop.f32.mrf.mxu1 }
 0x1ad   :  { %v3307_v17 = vadd.f32 %v3306_v58, %v2978_v40  ;;  %v8857_v48 = vpack.c.b16 %v3850_v52, %v3849_v2  ;;  %v3135_v51 = vadd.f32 %v3134_v11, %v2806_v46  ;;  %v2808_v57 = vadd.f32 %v8386_v43, %v2807_v37  ;;  %v8872_v11 = vpop.permute.xlu2 %2046  ;;  %v7373_v37 = vld [vmem:[%s10120_s0 + $0x1e8] sm:$0xff] }
 0x1ae   :  { %v2179_v46 = vsel %vm2096_vm0, %v7338_v55, %v8300_v53  ;;  %v7466_v53 = vld [vmem:[%s10120_s0 + $0xf8] sm:$0xff]  ;;  %v1311_v55 = vpop.permute.xlu0 %1310 }
 0x1af   :  { %v3490_v12 = vmax.f32 %v3307_v17, 0.0  ;;  %3019 = vmatmul.bf16.gmra.mxu2 %v2315_v27  ;;  %3173 = vmatmul.bf16.gmra.mxu1 %v2431_v45  ;;  %v3421_v4 = vmax.f32 %v3135_v51, 0.0 }
 0x1b0   :  { %3348 = vmatmul.bf16.gmra.mxu3 %v2571_v32  ;;  %3952 = vrot.lane.b32.xlu0 %v8857_v48, %s7707_s14  ;;  %v7501_v32 = vld [vmem:[%s10120_s0 + $0x230] sm:$0xff] }
 0x1b1   :  { %v3618_v49 = vpack.c.bf16 %v3490_v12, %v3490_v12  ;;  %v3549_v27 = vpack.c.bf16 %v3421_v4, %v3421_v4  ;;  %v2079_v12 = vpop.permute.xlu1 %2078 }
 0x1b2   :  { %v2980_v60 = vpop.f32.mrf.mxu2 }
 0x1b3   :  { %v3909_v3 = vunpack.c.l.b16 %v3618_v49  ;;  %v2981_v14 = vadd.f32 %v8386_v43, %v2980_v60  ;;  %v3309_v30 = vpop.f32.mrf.mxu3 }
 0x1b4   :  { %v2810_v47 = vpop.f32.mrf.mxu0  ;;  %v3136_v2 = vpop.f32.mrf.mxu1 }
 0x1b5   :  { %v8870_v52 = vpack.c.b16 %v3909_v3, %v3908_v23  ;;  %v3310_v40 = vadd.f32 %v3309_v30, %v2981_v14  ;;  %v3137_v58 = vadd.f32 %v3136_v2, %v2808_v57  ;;  %v3894_v23 = vunpack.c.l.b16 %v3549_v27 }
 0x1b6   :  { %v2811_v49 = vadd.f32 %v8386_v43, %v2810_v47  ;;  %v2319_v30 = vsel %vm2096_vm0, %v7373_v37, %v1311_v55  ;;  %v2435_v2 = vsel %vm2096_vm0, %v7466_v53, %v8229_v20  ;;  %v8891_v47 = vpop.permute.xlu2 %1280  ;;  %v7339_v37 = vld [vmem:[%s10120_s0 + $0xb8] sm:$0xff] }
 0x1b7   :  { %10146 = vst [vmem:[#allocation11_spill] sm:$0xff] %v8870_v52  ;;  %v3422_v45 = vmax.f32 %v3137_v58, 0.0  ;;  %2849 = vmatmul.bf16.gmra.mxu0 %v2179_v46  ;;  %v3491_v56 = vmax.f32 %v3310_v40, 0.0  ;;  %v2575_v58 = vsel %vm2096_vm0, %v7501_v32, %v2079_v12 }
 0x1b8   :  { %3780 = vrot.lane.b32.xlu0 %v8677_v42, %s7707_s14 }
 0x1b9   :  { %v3550_v17 = vpack.c.bf16 %v3422_v45, %v3422_v45  ;;  %v3619_v46 = vpack.c.bf16 %v3491_v56, %v3491_v56 }
 0x1ba   :  { %v2982_v51 = vpop.f32.mrf.mxu2 }
 0x1bb   :  { %v3895_v60 = vunpack.c.l.b16 %v3550_v17  ;;  %v2983_v3 = vadd.f32 %v8386_v43, %v2982_v51  ;;  %v3311_v57 = vpop.f32.mrf.mxu3  ;;  %v3947_v17 = vunpack.c.l.b16 %v3619_v46 }
 0x1bc   :  { %v2812_v4 = vpop.f32.mrf.mxu0  ;;  %v3139_v14 = vpop.f32.mrf.mxu1 }
 0x1bd   :  { %v3312_v40 = vadd.f32 %v3311_v57, %v2983_v3  ;;  %v3911_v45 = vpack.c.b16 %v3895_v60, %v3894_v23  ;;  %v3140_v27 = vadd.f32 %v3139_v14, %v2811_v49  ;;  %v2813_v32 = vadd.f32 %v8386_v43, %v2812_v4 }
 0x1be   :  { %v2183_v60 = vsel %vm2096_vm0, %v7339_v37, %v8327_v5  ;;  %v7467_v5 = vld [vmem:[%s10120_s0 + $0x100] sm:$0xff] }
 0x1bf   :  { %v3492_v52 = vmax.f32 %v3312_v40, 0.0  ;;  %3024 = vmatmul.bf16.gmra.mxu2 %v2319_v30  ;;  %3178 = vmatmul.bf16.gmra.mxu1 %v2435_v2  ;;  %v3423_v12 = vmax.f32 %v3140_v27, 0.0  ;;  %v7502_v40 = vld [vmem:[%s10120_s0 + $0x240] sm:$0xff]  ;;  %v1313_v27 = vpop.permute.xlu1 %1312 }
 0x1c0   :  { %3353 = vmatmul.bf16.gmra.mxu3 %v2575_v58  ;;  %3985 = vrot.lane.b32.xlu1 %v3911_v45, %s7709_s16  ;;  %v2081_v58 = vpop.permute.xlu2 %2080 }
 0x1c1   :  { %v3620_v20 = vpack.c.bf16 %v3492_v52, %v3492_v52  ;;  %3921 = vrot.lane.b32.xlu2 %v3911_v45, %s7708_s25  ;;  %v8904_v52 = vpop.permute.xlu0 %2048  ;;  %v3551_v30 = vpack.c.bf16 %v3423_v12, %v3423_v12 }
 0x1c2   :  { %v2985_v53 = vpop.f32.mrf.mxu2 }
 0x1c3   :  { %v3948_v56 = vunpack.c.l.b16 %v3620_v20  ;;  %v2986_v51 = vadd.f32 %v8386_v43, %v2985_v53  ;;  %v3314_v55 = vpop.f32.mrf.mxu3  ;;  %v7374_v43 = vld [vmem:[%s10120_s0 + $0x1f8] sm:$0xff]  ;;  %v3851_v37 = vunpack.c.l.b16 %v3551_v30 }
 0x1c4   :  { %v2815_v23 = vpop.f32.mrf.mxu0  ;;  %v3141_v49 = vpop.f32.mrf.mxu1 }
 0x1c5   :  { %v8902_v3 = vpack.c.b16 %v3948_v56, %v3947_v17  ;;  %v3315_v57 = vadd.f32 %v3314_v55, %v2986_v51  ;;  %v3142_v14 = vadd.f32 %v3141_v49, %v2813_v32  ;;  %v8922_v17 = vld [vmem:[%s10122_s2] ss:$0 sm:$0xff]  ;;  %v2323_v51 = vsel %vm2096_vm0, %v7374_v43, %v1313_v27 }
 0x1c6   :  { %v2816_v20 = vadd.f32 %v8922_v17, %v2815_v23  ;;  %v2439_v55 = vsel %vm2096_vm0, %v7467_v5, %v8323_v0  ;;  %v7340_v23 = vld [vmem:[%s10120_s0 + $0xc0] sm:$0xff] }
 0x1c7   :  { %v3424_v2 = vmax.f32 %v3142_v14, 0.0  ;;  %2854 = vmatmul.bf16.gmra.mxu0 %v2183_v60  ;;  %v3493_v4 = vmax.f32 %v3315_v57, 0.0  ;;  %v2579_v57 = vsel %vm2096_vm0, %v7502_v40, %v2081_v58 }
 0x1c8   :  { %3813 = vrot.lane.b32.xlu1 %v8720_v28, %s7709_s16 }
 0x1c9   :  { %v3552_v46 = vpack.c.bf16 %v3424_v2, %v3424_v2  ;;  %3749 = vrot.lane.b32.xlu2 %v8720_v28, %s7708_s25  ;;  %v3621_v49 = vpack.c.bf16 %v3493_v4, %v3493_v4  ;;  %v8937_v43 = vpop.permute.xlu0 %1282 }
 0x1ca   :  { %v2987_v45 = vpop.f32.mrf.mxu2 }
 0x1cb   :  { %v3852_v53 = vunpack.c.l.b16 %v3552_v46  ;;  %v2988_v56 = vadd.f32 %v8922_v17, %v2987_v45  ;;  %v3316_v32 = vpop.f32.mrf.mxu3  ;;  %v3980_v0 = vunpack.c.l.b16 %v3621_v49 }
 0x1cc   :  { %v2817_v28 = vpop.f32.mrf.mxu0  ;;  %v3144_v12 = vpop.f32.mrf.mxu1 }
 0x1cd   :  { %v3317_v60 = vadd.f32 %v3316_v32, %v2988_v56  ;;  %v8930_v14 = vpack.c.b16 %v3852_v53, %v3851_v37  ;;  %v3145_v2 = vadd.f32 %v3144_v12, %v2816_v20  ;;  %v2818_v40 = vadd.f32 %v8922_v17, %v2817_v28  ;;  %v7375_v28 = vld [vmem:[%s10120_s0 + $0x200] sm:$0xff] }
 0x1ce   :  { %v2187_v53 = vsel %vm2096_vm0, %v7340_v23, %v8252_v26  ;;  %v7468_v26 = vld [vmem:[%s10120_s0 + $0x108] sm:$0xff] }
 0x1cf   :  { %v3494_v30 = vmax.f32 %v3317_v60, 0.0  ;;  %3029 = vmatmul.bf16.gmra.mxu2 %v2323_v51  ;;  %3183 = vmatmul.bf16.gmra.mxu1 %v2439_v55  ;;  %v3425_v58 = vmax.f32 %v3145_v2, 0.0  ;;  %v8945_v51 = vpop.permute.xlu1 %2050  ;;  %v1315_v2 = vpop.permute.xlu2 %1314 }
 0x1d0   :  { %3358 = vmatmul.bf16.gmra.mxu3 %v2579_v57  ;;  %3954 = vrot.lane.b32.xlu0 %v8930_v14, %s7707_s14 }
 0x1d1   :  { %v3622_v5 = vpack.c.bf16 %v3494_v30, %v3494_v30  ;;  %v3553_v55 = vpack.c.bf16 %v3425_v58, %v3425_v58  ;;  %v7503_v30 = vld [vmem:[%s10120_s0 + $0x248] sm:$0xff] }
 0x1d2   :  { %v2990_v4 = vpop.f32.mrf.mxu2 }
 0x1d3   :  { %v3981_v46 = vunpack.c.l.b16 %v3622_v5  ;;  %v2991_v45 = vadd.f32 %v8922_v17, %v2990_v4  ;;  %v3319_v27 = vpop.f32.mrf.mxu3  ;;  %v3896_v5 = vunpack.c.l.b16 %v3553_v55 }
 0x1d4   :  { %v2820_v37 = vpop.f32.mrf.mxu0  ;;  %v3146_v20 = vpop.f32.mrf.mxu1 }
 0x1d5   :  { %v8943_v56 = vpack.c.b16 %v3981_v46, %v3980_v0  ;;  %v3320_v32 = vadd.f32 %v3319_v27, %v2991_v45  ;;  %v3147_v12 = vadd.f32 %v3146_v20, %v2818_v40  ;;  %v2083_v0 = vpop.permute.xlu0 %2082  ;;  %v2327_v27 = vsel %vm2096_vm0, %v7375_v28, %v1315_v2  ;;  %v7341_v28 = vld [vmem:[%s10120_s0 + $0xc8] sm:$0xff] }
 0x1d6   :  { %v2443_v20 = vsel %vm2096_vm0, %v7468_v26, %v8350_v16 }
 0x1d7   :  { %10147 = vst [vmem:[#allocation12_spill] sm:$0xff] %v8943_v56  ;;  %v3426_v49 = vmax.f32 %v3147_v12, 0.0  ;;  %2859 = vmatmul.bf16.gmra.mxu0 %v2187_v53  ;;  %v3495_v60 = vmax.f32 %v3320_v32, 0.0  ;;  %v2583_v12 = vsel %vm2096_vm0, %v7503_v30, %v2083_v0 }
 0x1d8   :  { %3782 = vrot.lane.b32.xlu0 %v8746_v8, %s7707_s14  ;;  %v2821_v8 = vadd.f32 %v8922_v17, %v2820_v37  ;;  %v8964_v37 = vpop.permute.xlu1 %1284 }
 0x1d9   :  { %v3554_v57 = vpack.c.bf16 %v3426_v49, %v3426_v49  ;;  %v3623_v53 = vpack.c.bf16 %v3495_v60, %v3495_v60 }
 0x1da   :  { %v2992_v23 = vpop.f32.mrf.mxu2 }
 0x1db   :  { %v3897_v4 = vunpack.c.l.b16 %v3554_v57  ;;  %v2993_v46 = vadd.f32 %v8922_v17, %v2992_v23  ;;  %v3321_v40 = vpop.f32.mrf.mxu3  ;;  %v4009_v57 = vunpack.c.l.b16 %v3623_v53 }
 0x1dc   :  { %v2822_v58 = vpop.f32.mrf.mxu0  ;;  %v3149_v45 = vpop.f32.mrf.mxu1 }
 0x1dd   :  { %v3322_v32 = vadd.f32 %v3321_v40, %v2993_v46  ;;  %v3912_v49 = vpack.c.b16 %v3897_v4, %v3896_v5  ;;  %v3150_v55 = vadd.f32 %v3149_v45, %v2821_v8  ;;  %v2823_v30 = vadd.f32 %v8922_v17, %v2822_v58  ;;  %v7376_v58 = vld [vmem:[%s10120_s0 + $0x208] sm:$0xff] }
 0x1de   :  { %v2191_v4 = vsel %vm2096_vm0, %v7341_v28, %v8346_v13  ;;  %v7469_v13 = vld [vmem:[%s10120_s0 + $0x110] sm:$0xff]  ;;  %v1317_v28 = vpop.permute.xlu0 %1316 }
 0x1df   :  { %v3496_v56 = vmax.f32 %v3322_v32, 0.0  ;;  %3034 = vmatmul.bf16.gmra.mxu2 %v2327_v27  ;;  %3188 = vmatmul.bf16.gmra.mxu1 %v2443_v20  ;;  %v3427_v2 = vmax.f32 %v3150_v55, 0.0 }
 0x1e0   :  { %3363 = vmatmul.bf16.gmra.mxu3 %v2583_v12  ;;  %3987 = vrot.lane.b32.xlu1 %v3912_v49, %s7709_s16  ;;  %v7504_v12 = vld [vmem:[%s10120_s0 + $0x250] sm:$0xff] }
 0x1e1   :  { %v3624_v16 = vpack.c.bf16 %v3496_v56, %v3496_v56  ;;  %3923 = vrot.lane.b32.xlu2 %v3912_v49, %s7708_s25  ;;  %v8977_v56 = vpop.permute.xlu2 %2052  ;;  %v3555_v27 = vpack.c.bf16 %v3427_v2, %v3427_v2  ;;  %v2085_v49 = vpop.permute.xlu1 %2084 }
 0x1e2   :  { %v2995_v26 = vpop.f32.mrf.mxu2 }
 0x1e3   :  { %v4010_v60 = vunpack.c.l.b16 %v3624_v16  ;;  %v2996_v23 = vadd.f32 %v8922_v17, %v2995_v26  ;;  %v3324_v0 = vpop.f32.mrf.mxu3 }
 0x1e4   :  { %v2825_v5 = vpop.f32.mrf.mxu0  ;;  %v3151_v8 = vpop.f32.mrf.mxu1 }
 0x1e5   :  { %v8975_v46 = vpack.c.b16 %v4010_v60, %v4009_v57  ;;  %v3325_v40 = vadd.f32 %v3324_v0, %v2996_v23  ;;  %v3152_v45 = vadd.f32 %v3151_v8, %v2823_v30  ;;  %v3943_v57 = vunpack.c.l.b16 %v3555_v27 }
 0x1e6   :  { %v2331_v23 = vsel %vm2096_vm0, %v7376_v58, %v1317_v28  ;;  %v2447_v0 = vsel %vm2096_vm0, %v7469_v13, %v8275_v1  ;;  %v7342_v58 = vld [vmem:[%s10120_s0 + $0xd8] sm:$0xff] }
 0x1e7   :  { %10148 = vst [vmem:[#allocation13_spill] sm:$0xff] %v8975_v46  ;;  %v3428_v20 = vmax.f32 %v3152_v45, 0.0  ;;  %2864 = vmatmul.bf16.gmra.mxu0 %v2191_v4  ;;  %v3497_v53 = vmax.f32 %v3325_v40, 0.0  ;;  %v2587_v40 = vsel %vm2096_vm0, %v7504_v12, %v2085_v49 }
 0x1e8   :  { %3815 = vrot.lane.b32.xlu1 %v8772_v15, %s7709_s16  ;;  %v2826_v15 = vadd.f32 %v8922_v17, %v2825_v5 }
 0x1e9   :  { %v3556_v32 = vpack.c.bf16 %v3428_v20, %v3428_v20  ;;  %v3625_v8 = vpack.c.bf16 %v3497_v53, %v3497_v53  ;;  %v8996_v5 = vpop.permute.xlu2 %1286 }
 0x1ea   :  { %v2997_v55 = vpop.f32.mrf.mxu2 }
 0x1eb   :  { %v3944_v16 = vunpack.c.l.b16 %v3556_v32  ;;  %v2998_v26 = vadd.f32 %v8922_v17, %v2997_v55  ;;  %v3326_v60 = vpop.f32.mrf.mxu3  ;;  %v4024_v32 = vunpack.c.l.b16 %v3625_v8  ;;  %v7470_v8 = vld [vmem:[%s10120_s0 + $0x120] sm:$0xff] }
 0x1ec   :  { %v2827_v30 = vpop.f32.mrf.mxu0  ;;  %v3154_v2 = vpop.f32.mrf.mxu1 }
 0x1ed   :  { %v3327_v4 = vadd.f32 %v3326_v60, %v2998_v26  ;;  %v3949_v45 = vpack.c.b16 %v3944_v16, %v3943_v57  ;;  %v3155_v27 = vadd.f32 %v3154_v2, %v2826_v15  ;;  %v2828_v12 = vadd.f32 %v8922_v17, %v2827_v30  ;;  %v7377_v30 = vld [vmem:[%s10120_s0 + $0x210] sm:$0xff] }
 0x1ee   :  { %v2195_v16 = vsel %vm2096_vm0, %v7342_v58, %v8374_v35  ;;  %v1319_v58 = vpop.permute.xlu1 %1318 }
 0x1ef   :  { %v3498_v20 = vmax.f32 %v3327_v4, 0.0  ;;  %3039 = vmatmul.bf16.gmra.mxu2 %v2331_v23  ;;  %3193 = vmatmul.bf16.gmra.mxu1 %v2447_v0  ;;  %v3429_v49 = vmax.f32 %v3155_v27, 0.0  ;;  %v7505_v4 = vld [vmem:[%s10120_s0 + $0x258] sm:$0xff] }
 0x1f0   :  { %3368 = vmatmul.bf16.gmra.mxu3 %v2587_v40  ;;  %3956 = vrot.lane.b32.xlu0 %v3949_v45, %s7707_s14 }
 0x1f1   :  { %v3626_v1 = vpack.c.bf16 %v3498_v20, %v3498_v20  ;;  %v3557_v23 = vpack.c.bf16 %v3429_v49, %v3429_v49  ;;  %v2087_v20 = vpop.permute.xlu2 %2086 }
 0x1f2   :  { %v3000_v13 = vpop.f32.mrf.mxu2 }
 0x1f3   :  { %v4025_v53 = vunpack.c.l.b16 %v3626_v1  ;;  %v3001_v55 = vadd.f32 %v8922_v17, %v3000_v13  ;;  %v3329_v28 = vpop.f32.mrf.mxu3 }
 0x1f4   :  { %v2830_v57 = vpop.f32.mrf.mxu0  ;;  %v3156_v15 = vpop.f32.mrf.mxu1 }
 0x1f5   :  { %v9006_v26 = vpack.c.b16 %v4025_v53, %v4024_v32  ;;  %v3330_v60 = vadd.f32 %v3329_v28, %v3001_v55  ;;  %v3157_v2 = vadd.f32 %v3156_v15, %v2828_v12  ;;  %v2831_v40 = vadd.f32 %v8922_v17, %v2830_v57 }
 0x1f6   :  { %v3976_v32 = vunpack.c.l.b16 %v3557_v23  ;;  %v2335_v55 = vsel %vm2096_vm0, %v7377_v30, %v1319_v58  ;;  %v2451_v28 = vsel %vm2096_vm0, %v7470_v8, %v8372_v31  ;;  %v2591_v15 = vsel %vm2096_vm0, %v7505_v4, %v2087_v20  ;;  %v7343_v23 = vld [vmem:[%s10120_s0 + $0xe0] sm:$0xff]  ;;  %v9027_v30 = vpop.permute.xlu0 %2054 }
 0x1f7   :  { %v3430_v0 = vmax.f32 %v3157_v2, 0.0  ;;  %2869 = vmatmul.bf16.gmra.mxu0 %v2195_v16  ;;  %v3499_v35 = vmax.f32 %v3330_v60, 0.0 }
 0x1f9   :  { %v3558_v45 = vpack.c.bf16 %v3430_v0, %v3430_v0  ;;  %v3627_v16 = vpack.c.bf16 %v3499_v35, %v3499_v35 }
 0x1fa   :  { %v3002_v27 = vpop.f32.mrf.mxu2 }
 0x1fb   :  { %v3977_v1 = vunpack.c.l.b16 %v3558_v45  ;;  %v3003_v13 = vadd.f32 %v8922_v17, %v3002_v27  ;;  %v3331_v53 = vpop.f32.mrf.mxu3  ;;  %v4011_v45 = vunpack.c.l.b16 %v3627_v16 }
 0x1fc   :  { %v2832_v12 = vpop.f32.mrf.mxu0  ;;  %v3159_v49 = vpop.f32.mrf.mxu1 }
 0x1fd   :  { %v3332_v57 = vadd.f32 %v3331_v53, %v3003_v13  ;;  %v3160_v60 = vadd.f32 %v3159_v49, %v2831_v40  ;;  %v3982_v2 = vpack.c.b16 %v3977_v1, %v3976_v32  ;;  %v2833_v35 = vadd.f32 %v8922_v17, %v2832_v12  ;;  %v7378_v12 = vld [vmem:[%s10120_s0 + $0x218] sm:$0xff] }
 0x1fe   :  { %v2199_v1 = vsel %vm2096_vm0, %v7343_v23, %v8298_v36  ;;  %v7506_v36 = vld [vmem:[%s10120_s0 + $0x260] sm:$0xff] }
 0x1ff   :  { %v3500_v0 = vmax.f32 %v3332_v57, 0.0  ;;  %3044 = vmatmul.bf16.gmra.mxu2 %v2335_v55  ;;  %3198 = vmatmul.bf16.gmra.mxu1 %v2451_v28  ;;  %v3431_v40 = vmax.f32 %v3160_v60, 0.0  ;;  %v2089_v60 = vpop.permute.xlu1 %2088 }
 0x200   :  { %3373 = vmatmul.bf16.gmra.mxu3 %v2591_v15  ;;  %3989 = vrot.lane.b32.xlu1 %v3982_v2, %s7709_s16  ;;  %v7471_v15 = vld [vmem:[%s10120_s0 + $0x128] sm:$0xff] }
 0x201   :  { %v3628_v31 = vpack.c.bf16 %v3500_v0, %v3500_v0  ;;  %v3559_v55 = vpack.c.bf16 %v3431_v40, %v3431_v40  ;;  %v1321_v0 = vpop.permute.xlu0 %1320 }
 0x202   :  { %v3005_v8 = vpop.f32.mrf.mxu2 }
 0x203   :  { %v4012_v4 = vunpack.c.l.b16 %v3628_v31  ;;  %v3006_v20 = vadd.f32 %v8922_v17, %v3005_v8  ;;  %v3334_v27 = vpop.f32.mrf.mxu3  ;;  %v3679_v23 = vunpack.c.l.b16 %v3559_v55 }
 0x204   :  { %v2835_v58 = vpop.f32.mrf.mxu0  ;;  %v3161_v32 = vpop.f32.mrf.mxu1 }
 0x205   :  { %v9033_v13 = vpack.c.b16 %v4012_v4, %v4011_v45  ;;  %v3335_v53 = vadd.f32 %v3334_v27, %v3006_v20  ;;  %v3162_v49 = vadd.f32 %v3161_v32, %v2833_v35  ;;  %v2836_v45 = vadd.f32 %v8922_v17, %v2835_v58  ;;  %v7344_v58 = vld [vmem:[%s10120_s0 + $0xe8] sm:$0xff] }
 0x206   :  { %v2339_v20 = vsel %vm2096_vm0, %v7378_v12, %v1321_v0  ;;  %v2455_v27 = vsel %vm2096_vm0, %v7471_v15, %v8402_v62  ;;  %v7597_v12 = vld [vmem:[%s10123_s3 + $0x38] sm:$0xff] }
 0x207   :  { %v3432_v28 = vmax.f32 %v3162_v49, 0.0  ;;  %2874 = vmatmul.bf16.gmra.mxu0 %v2199_v1  ;;  %v3501_v16 = vmax.f32 %v3335_v53, 0.0  ;;  %v2595_v49 = vsel %vm2096_vm0, %v7506_v36, %v2089_v60  ;;  %v7605_v62 = vld [vmem:[%s10123_s3 + $0x78] sm:$0xff]  ;;  %4573 = vmatpush.bf16.msrb.mxu2 %v7597_v12 }
 0x208   :  { %4627 = vmatpush.bf16.msrb.mxu3 %v7605_v62  ;;  %v7507_v62 = vld [vmem:[%s10120_s0 + $0x268] sm:$0xff] }
 0x209   :  { %v3560_v57 = vpack.c.bf16 %v3432_v28, %v3432_v28  ;;  %v3629_v32 = vpack.c.bf16 %v3501_v16, %v3501_v16 }
 0x20a   :  { %v3007_v2 = vpop.f32.mrf.mxu2 }
 0x20b   :  { %v3680_v31 = vunpack.c.l.b16 %v3560_v57  ;;  %v3008_v8 = vadd.f32 %v8922_v17, %v3007_v2  ;;  %v3336_v4 = vpop.f32.mrf.mxu3  ;;  %v4026_v15 = vunpack.c.l.b16 %v3629_v32 }
 0x20c   :  { %v2837_v35 = vpop.f32.mrf.mxu0  ;;  %v3164_v40 = vpop.f32.mrf.mxu1 }
 0x20d   :  { %v9049_v1 = vpack.c.b16 %v3680_v31, %v3679_v23  ;;  %v3337_v53 = vadd.f32 %v3336_v4, %v3008_v8  ;;  %v3165_v28 = vadd.f32 %v3164_v40, %v2836_v45  ;;  %v2838_v60 = vadd.f32 %v8922_v17, %v2837_v35  ;;  %v7596_v4 = vld [vmem:[%s10123_s3 + $0x30] sm:$0xff] }
 0x20e   :  { %v2203_v8 = vsel %vm2096_vm0, %v7344_v58, %v8400_v59  ;;  %v7604_v40 = vld [vmem:[%s10123_s3 + $0x70] sm:$0xff]  ;;  %4574 = vmatpush.bf16.msrb.mxu2 %v7596_v4  ;;  %v7379_v59 = vld [vmem:[%s10120_s0 + $0x220] sm:$0xff] }
 0x20f   :  { %v3502_v55 = vmax.f32 %v3337_v53, 0.0  ;;  %3049 = vmatmul.bf16.gmra.mxu2 %v2339_v20  ;;  %3203 = vmatmul.bf16.gmra.mxu1 %v2455_v27  ;;  %v3433_v2 = vmax.f32 %v3165_v28, 0.0  ;;  %v7603_v28 = vld [vmem:[%s10123_s3 + $0x68] sm:$0xff] }
 0x210   :  { %3378 = vmatmul.bf16.gmra.mxu3 %v2595_v49  ;;  %v7472_v49 = vld [vmem:[%s10120_s0 + $0x130] sm:$0xff] }
 0x211   :  { %v3630_v16 = vpack.c.bf16 %v3502_v55, %v3502_v55  ;;  %4628 = vmatpush.bf16.msrb.mxu3 %v7604_v40  ;;  %v3561_v32 = vpack.c.bf16 %v3433_v2, %v3433_v2  ;;  %v7595_v55 = vld [vmem:[%s10123_s3 + $0x28] sm:$0xff]  ;;  %v2459_v40 = vsel %vm2096_vm0, %v7472_v49, %v8321_v34  ;;  %v7345_v34 = vld [vmem:[%s10120_s0 + $0xf0] sm:$0xff]  ;;  %v7593_v49 = vld [vmem:[%s10123_s3 + $0x18] sm:$0xff] }
 0x212   :  { %v3010_v57 = vpop.f32.mrf.mxu2  ;;  %4575 = vmatpush.bf16.msrb.mxu2 %v7595_v55 }
 0x213   :  { %v4027_v36 = vunpack.c.l.b16 %v3630_v16  ;;  %v3011_v0 = vadd.f32 %v8922_v17, %v3010_v57  ;;  %v3339_v23 = vpop.f32.mrf.mxu3  ;;  %v2091_v57 = vpop.permute.xlu0 %2090 }
 0x214   :  { %v2840_v45 = vpop.f32.mrf.mxu0  ;;  %v3166_v31 = vpop.f32.mrf.mxu1 }
 0x215   :  { %v9071_v20 = vpack.c.b16 %v4027_v36, %v4026_v15  ;;  %v3340_v35 = vadd.f32 %v3339_v23, %v3011_v0  ;;  %v3167_v27 = vadd.f32 %v3166_v31, %v2838_v60  ;;  %v1323_v15 = vpop.permute.xlu2 %1322  ;;  %4629 = vmatpush.bf16.msrb.mxu3 %v7603_v28  ;;  %v3724_v36 = vunpack.c.l.b16 %v3561_v32 }
 0x216   :  { %v2841_v60 = vadd.f32 %v8922_v17, %v2840_v45  ;;  %v2343_v4 = vsel %vm2096_vm0, %v7379_v59, %v1323_v15 }
 0x217   :  { %v3434_v53 = vmax.f32 %v3167_v27, 0.0  ;;  %2879 = vmatmul.bf16.gmra.mxu0 %v2203_v8  ;;  %v3503_v58 = vmax.f32 %v3340_v35, 0.0  ;;  %v7594_v35 = vld [vmem:[%s10123_s3 + $0x20] sm:$0xff] }
 0x218   :  { %v7602_v27 = vld [vmem:[%s10123_s3 + $0x60] sm:$0xff]  ;;  %4576 = vmatpush.bf16.msrb.mxu2 %v7594_v35 }
 0x219   :  { %v3562_v12 = vpack.c.bf16 %v3434_v53, %v3434_v53  ;;  %v3631_v45 = vpack.c.bf16 %v3503_v58, %v3503_v58  ;;  %v2599_v53 = vsel %vm2096_vm0, %v7507_v62, %v2091_v57  ;;  %4630 = vmatpush.bf16.msrb.mxu3 %v7602_v27  ;;  %v7601_v58 = vld [vmem:[%s10123_s3 + $0x58] sm:$0xff] }
 0x21a   :  { %v3012_v16 = vpop.f32.mrf.mxu2 }
 0x21b   :  { %v3725_v2 = vunpack.c.l.b16 %v3562_v12  ;;  %v3013_v0 = vadd.f32 %v8922_v17, %v3012_v16  ;;  %v3341_v23 = vpop.f32.mrf.mxu3  ;;  %v4013_v12 = vunpack.c.l.b16 %v3631_v45 }
 0x21c   :  { %v2842_v31 = vpop.f32.mrf.mxu0  ;;  %v3169_v8 = vpop.f32.mrf.mxu1  ;;  %4577 = vmatpush.bf16.msrb.mxu2 %v7593_v49  ;;  %v7508_v49 = vld [vmem:[%s10120_s0 + $0x270] sm:$0xff] }
 0x21d   :  { %v3342_v32 = vadd.f32 %v3341_v23, %v3013_v0  ;;  %v3739_v55 = vpack.c.b16 %v3725_v2, %v3724_v36  ;;  %v3170_v59 = vadd.f32 %v3169_v8, %v2841_v60  ;;  %4631 = vmatpush.bf16.msrb.mxu3 %v7601_v58  ;;  %v2843_v57 = vadd.f32 %v8922_v17, %v2842_v31  ;;  %v2093_v58 = vpop.permute.xlu2 %2092 }
 0x21e   :  { %v2207_v8 = vsel %vm2096_vm0, %v7345_v34, %v8426_v24  ;;  %v7380_v24 = vld [vmem:[%s10120_s0 + $0x228] sm:$0xff] }
 0x21f   :  { %v3504_v28 = vmax.f32 %v3342_v32, 0.0  ;;  %3054 = vmatmul.bf16.gmra.mxu2 %v2343_v4  ;;  %3208 = vmatmul.bf16.gmra.mxu1 %v2459_v40  ;;  %v3435_v36 = vmax.f32 %v3170_v59, 0.0  ;;  %v7592_v4 = vld [vmem:[%s10123_s3 + $0x10] sm:$0xff] }
 0x220   :  { %3383 = vmatmul.bf16.gmra.mxu3 %v2599_v53  ;;  %3751 = vrot.lane.b32.xlu2 %v3739_v55, %s7708_s25  ;;  %v7600_v40 = vld [vmem:[%s10123_s3 + $0x50] sm:$0xff]  ;;  %v7473_v53 = vld [vmem:[%s10120_s0 + $0x138] sm:$0xff]  ;;  %v7591_v55 = vld [vmem:[%s10123_s3 + $0x8] sm:$0xff] }
 0x221   :  { %v3632_v62 = vpack.c.bf16 %v3504_v28, %v3504_v28  ;;  %4578 = vmatpush.bf16.msrb.mxu2 %v7592_v4  ;;  %4632 = vmatpush.bf16.msrb.mxu3 %v7600_v40  ;;  %v3563_v45 = vpack.c.bf16 %v3435_v36, %v3435_v36  ;;  %v7599_v28 = vld [vmem:[%s10123_s3 + $0x48] sm:$0xff]  ;;  %v2463_v4 = vsel %vm2096_vm0, %v7473_v53, %v8424_v22  ;;  %v7590_v40 = vld [vmem:[%s10123_s3] sm:$0xff]  ;;  %v7346_v22 = vld [vmem:[%s10120_s0 + $0xf8] sm:$0xff] }
 0x222   :  { %v3015_v15 = vpop.f32.mrf.mxu2 }
 0x223   :  { %v4014_v16 = vunpack.c.l.b16 %v3632_v62  ;;  %v3016_v60 = vadd.f32 %v8922_v17, %v3015_v15  ;;  %v3344_v2 = vpop.f32.mrf.mxu3  ;;  %v1325_v62 = vpop.permute.xlu1 %1324  ;;  %v3681_v15 = vunpack.c.l.b16 %v3563_v45 }
 0x224   :  { %v2845_v0 = vpop.f32.mrf.mxu0  ;;  %v3171_v23 = vpop.f32.mrf.mxu1 }
 0x225   :  { %v9120_v35 = vpack.c.b16 %v4014_v16, %v4013_v12  ;;  %v3345_v31 = vadd.f32 %v3344_v2, %v3016_v60  ;;  %v3172_v27 = vadd.f32 %v3171_v23, %v2843_v57  ;;  %4579 = vmatpush.bf16.msrb.mxu2 %v7591_v55  ;;  %4633 = vmatpush.bf16.msrb.mxu3 %v7599_v28 }
 0x226   :  { %v2846_v16 = vadd.f32 %v8922_v17, %v2845_v0 }
 0x227   :  { %v3436_v32 = vmax.f32 %v3172_v27, 0.0  ;;  %2884 = vmatmul.bf16.gmra.mxu0 %v2207_v8  ;;  %v3505_v59 = vmax.f32 %v3345_v31, 0.0  ;;  %v2347_v8 = vsel %vm2096_vm0, %v7380_v24, %v1325_v62  ;;  %v7598_v31 = vld [vmem:[%s10123_s3 + $0x40] sm:$0xff] }
 0x229   :  { %v3564_v34 = vpack.c.bf16 %v3436_v32, %v3436_v32  ;;  %v3633_v0 = vpack.c.bf16 %v3505_v59, %v3505_v59  ;;  %v2603_v32 = vsel %vm2096_vm0, %v7508_v49, %v2093_v58  ;;  %4580 = vmatpush.bf16.msrb.mxu2 %v7590_v40  ;;  %4634 = vmatpush.bf16.msrb.mxu3 %v7598_v31 }
 0x22a   :  { %v3017_v12 = vpop.f32.mrf.mxu2 }
 0x22b   :  { %v3682_v57 = vunpack.c.l.b16 %v3564_v34  ;;  %v3018_v36 = vadd.f32 %v8922_v17, %v3017_v12  ;;  %v3346_v60 = vpop.f32.mrf.mxu3  ;;  %v4028_v53 = vunpack.c.l.b16 %v3633_v0  ;;  %v7474_v0 = vld [vmem:[%s10120_s0 + $0x140] sm:$0xff] }
 0x22c   :  { %v2847_v2 = vpop.f32.mrf.mxu0  ;;  %v3174_v23 = vpop.f32.mrf.mxu1 }
 0x22d   :  { %v9148_v27 = vpack.c.b16 %v3682_v57, %v3681_v15  ;;  %v3347_v45 = vadd.f32 %v3346_v60, %v3018_v36  ;;  %v3175_v55 = vadd.f32 %v3174_v23, %v2846_v16  ;;  %v2848_v49 = vadd.f32 %v8922_v17, %v2847_v2  ;;  %v7381_v2 = vld [vmem:[%s10120_s0 + $0x230] sm:$0xff] }
 0x22e   :  { %v2211_v57 = vsel %vm2096_vm0, %v7346_v22, %v8344_v9  ;;  %v7509_v9 = vld [vmem:[%s10120_s0 + $0x278] sm:$0xff] }
 0x22f   :  { %v3506_v24 = vmax.f32 %v3347_v45, 0.0  ;;  %3059 = vmatmul.bf16.gmra.mxu2 %v2347_v8  ;;  %3213 = vmatmul.bf16.gmra.mxu1 %v2463_v4  ;;  %v3437_v58 = vmax.f32 %v3175_v55, 0.0  ;;  %v1327_v8 = vpop.permute.xlu0 %1326  ;;  %v2095_v4 = vpop.permute.xlu1 %2094 }
 0x230   :  { %3388 = vmatmul.bf16.gmra.mxu3 %v2603_v32  ;;  %3784 = vrot.lane.b32.xlu0 %v9148_v27, %s7707_s14 }
 0x231   :  { %v3634_v28 = vpack.c.bf16 %v3506_v24, %v3506_v24  ;;  %v3565_v40 = vpack.c.bf16 %v3437_v58, %v3437_v58  ;;  %v2351_v58 = vsel %vm2096_vm0, %v7381_v2, %v1327_v8 }
 0x232   :  { %v3020_v59 = vpop.f32.mrf.mxu2 }
 0x233   :  { %v4029_v34 = vunpack.c.l.b16 %v3634_v28  ;;  %v3021_v12 = vadd.f32 %v8922_v17, %v3020_v59  ;;  %v3349_v62 = vpop.f32.mrf.mxu3  ;;  %v3726_v22 = vunpack.c.l.b16 %v3565_v40 }
 0x234   :  { %v2850_v15 = vpop.f32.mrf.mxu0  ;;  %v3176_v16 = vpop.f32.mrf.mxu1 }
 0x235   :  { %v9160_v36 = vpack.c.b16 %v4029_v34, %v4028_v53  ;;  %v3350_v60 = vadd.f32 %v3349_v62, %v3021_v12  ;;  %v3177_v23 = vadd.f32 %v3176_v16, %v2848_v49  ;;  %v2851_v32 = vadd.f32 %v8922_v17, %v2850_v15 }
 0x236   :  { %v2467_v12 = vsel %vm2096_vm0, %v7474_v0, %v8454_v63  ;;  %v2607_v62 = vsel %vm2096_vm0, %v7509_v9, %v2095_v4  ;;  %v7347_v63 = vld [vmem:[%s10120_s0 + $0x100] sm:$0xff] }
 0x237   :  { %10149 = vst [vmem:[#allocation14_spill] sm:$0xff] %v9160_v36  ;;  %v3438_v31 = vmax.f32 %v3177_v23, 0.0  ;;  %2889 = vmatmul.bf16.gmra.mxu0 %v2211_v57  ;;  %v3507_v45 = vmax.f32 %v3350_v60, 0.0  ;;  %v3746_v23 = vpop.permute.xlu2 %3745  ;;  %v3812_v8 = vpop.permute.xlu1 %3811 }
 0x239   :  { %v3566_v24 = vpack.c.bf16 %v3438_v31, %v3438_v31  ;;  %v3635_v16 = vpack.c.bf16 %v3507_v45, %v3507_v45  ;;  %v3779_v31 = vpop.permute.xlu0 %3778 }
 0x23a   :  { %v3022_v55 = vpop.f32.mrf.mxu2 }
 0x23b   :  { %v3727_v53 = vunpack.c.l.b16 %v3566_v24  ;;  %v3023_v28 = vadd.f32 %v8922_v17, %v3022_v55  ;;  %v3351_v59 = vpop.f32.mrf.mxu3  ;;  %v4041_v4 = vunpack.c.l.b16 %v3635_v16 }
 0x23c   :  { %v2852_v34 = vpop.f32.mrf.mxu0  ;;  %v3179_v49 = vpop.f32.mrf.mxu1 }
 0x23d   :  { %v9177_v57 = vpack.c.b16 %v3727_v53, %v3726_v22  ;;  %v3352_v15 = vadd.f32 %v3351_v59, %v3023_v28  ;;  %v3180_v60 = vadd.f32 %v3179_v49, %v2851_v32  ;;  %v2853_v45 = vadd.f32 %v8922_v17, %v2852_v34 }
 0x23e   :  { %v2215_v28 = vsel %vm2096_vm0, %v7347_v63, %v8478_v19  ;;  %v4122_v19 = vsel %vm4119_vm1, %v8452_v54, %v3746_v23 }
 0x23f   :  { %v3508_v40 = vmax.f32 %v3352_v15, 0.0  ;;  %3064 = vmatmul.bf16.gmra.mxu2 %v2351_v58  ;;  %3218 = vmatmul.bf16.gmra.mxu1 %v2467_v12  ;;  %v3439_v32 = vmax.f32 %v3180_v60, 0.0  ;;  %v3920_v12 = vpop.permute.xlu2 %3919  ;;  %v7475_v15 = vld [vmem:[%s10120_s0 + $0x148] sm:$0xff]  ;;  %v3986_v60 = vpop.permute.xlu1 %3985 }
 0x240   :  { %3393 = vmatmul.bf16.gmra.mxu3 %v2607_v62  ;;  %3817 = vrot.lane.b32.xlu1 %v9177_v57, %s7709_s16 }
 0x241   :  { %v3636_v2 = vpack.c.bf16 %v3508_v40, %v3508_v40  ;;  %v3567_v62 = vpack.c.bf16 %v3439_v32, %v3439_v32  ;;  %v3953_v34 = vpop.permute.xlu0 %3952 }
 0x242   :  { %v3025_v0 = vpop.f32.mrf.mxu2 }
 0x243   :  { %v4042_v9 = vunpack.c.l.b16 %v3636_v2  ;;  %v3026_v24 = vadd.f32 %v8922_v17, %v3025_v0  ;;  %v3354_v55 = vpop.f32.mrf.mxu3  ;;  %v3683_v0 = vunpack.c.l.b16 %v3567_v62  ;;  %v7348_v62 = vld [vmem:[%s10120_s0 + $0x108] sm:$0xff] }
 0x244   :  { %v2855_v22 = vpop.f32.mrf.mxu0  ;;  %v3181_v53 = vpop.f32.mrf.mxu1 }
 0x245   :  { %v9188_v59 = vpack.c.b16 %v4042_v9, %v4041_v4  ;;  %v9190_v49 = vadd.f32 %v3354_v55, %v3026_v24  ;;  %v3182_v58 = vadd.f32 %v3181_v53, %v2853_v45  ;;  %v2856_v40 = vadd.f32 %v8922_v17, %v2855_v22  ;;  %v10154_v55 = vld [vmem:[#allocation2_spill] sm:$0xff] }
 0x246   :  { %v4148_v4 = vsel %vm2096_vm0, %v4122_v19, %v3779_v31  ;;  %v2471_v53 = vsel %vm2096_vm0, %v7475_v15, %v10154_v55  ;;  %v4195_v22 = vsel %vm4119_vm1, %v8797_v25, %v3920_v12 }
 0x247   :  { %10150 = vst [vmem:[#allocation15_spill] sm:$0xff] %v9188_v59  ;;  %v3440_v16 = vmax.f32 %v3182_v58, 0.0  ;;  %2894 = vmatmul.bf16.gmra.mxu0 %v2215_v28  ;;  %v4221_v23 = vsel %vm2096_vm0, %v4195_v22, %v3953_v34  ;;  %v4167_v31 = vsel %vm4165_vm2, %v4148_v4, %v3812_v8  ;;  %v3814_v25 = vpop.permute.xlu1 %3813  ;;  %v7476_v22 = vld [vmem:[%s10120_s0 + $0x150] sm:$0xff] }
 0x248   :  { %10151 = vst [vmem:[#allocation16_spill] sm:$0xff] %v9190_v49  ;;  %v4239_v58 = vsel %vm4165_vm2, %v4221_v23, %v3986_v60  ;;  %v10155_v60 = vld [vmem:[#allocation3_spill] sm:$0xff] }
 0x249   :  { %v3568_v2 = vpack.c.bf16 %v3440_v16, %v3440_v16  ;;  %v3748_v16 = vpop.permute.xlu2 %3747  ;;  %v3781_v15 = vpop.permute.xlu0 %3780 }
 0x24a   :  { %v9198_v63 = vpop.f32.mrf.mxu2 }
 0x24b   :  { %10152 = vst [vmem:[#allocation17_spill] sm:$0xff] %v9198_v63  ;;  %v3684_v9 = vunpack.c.l.b16 %v3568_v2  ;;  %v9201_v45 = vpop.f32.mrf.mxu3 }
 0x24c   :  { %10153 = vst [vmem:[#allocation18_spill] sm:$0xff] %v9201_v45  ;;  %v2857_v32 = vpop.f32.mrf.mxu0  ;;  %v3184_v24 = vpop.f32.mrf.mxu1 }
 0x24d   :  { %v9207_v28 = vpack.c.b16 %v3684_v9, %v3683_v0  ;;  %v3185_v54 = vadd.f32 %v3184_v24, %v2856_v40  ;;  %v2858_v12 = vadd.f32 %v8922_v17, %v2857_v32  ;;  %v2219_v0 = vsel %vm2096_vm0, %v7348_v62, %v10155_v60 }
 0x24f   :  { %3223 = vmatmul.bf16.gmra.mxu1 %v2471_v53  ;;  %4581 = vmatmul.bf16.vlgmr.msrb.gmra.mxu2 %v4167_v31  ;;  %v3441_v40 = vmax.f32 %v3185_v54, 0.0 }
 0x250   :  { %4635 = vmatmul.bf16.vlgmr.msrb.gmra.mxu3 %v4239_v58 }
 0x251   :  { %v3569_v55 = vpack.c.bf16 %v3441_v40, %v3441_v40  ;;  %v3922_v32 = vpop.permute.xlu2 %3921  ;;  %v3955_v31 = vpop.permute.xlu0 %3954 }
 0x252   :  { %v3030_v2 = vpop.f32.mrf.mxu2  ;;  %v3988_v46 = vpop.permute.xlu1 %3987 }
 0x253   :  { %v3031_v34 = vadd.f32 %v8922_v17, %v3030_v2  ;;  %v3359_v19 = vpop.f32.mrf.mxu3  ;;  %v3728_v2 = vunpack.c.l.b16 %v3569_v55 }
 0x254   :  { %v2860_v8 = vpop.f32.mrf.mxu0  ;;  %v3186_v4 = vpop.f32.mrf.mxu1 }
 0x255   :  { %v9219_v9 = vadd.f32 %v3359_v19, %v3031_v34  ;;  %v3187_v24 = vadd.f32 %v3186_v4, %v2858_v12  ;;  %v2861_v54 = vadd.f32 %v8922_v17, %v2860_v8  ;;  %v4125_v12 = vsel %vm4119_vm1, %v8707_v39, %v3748_v16  ;;  %v10159_v4 = vld [vmem:[#allocation4_spill] sm:$0xff] }
 0x256   :  { %v2475_v60 = vsel %vm2096_vm0, %v7476_v22, %v10159_v4  ;;  %v4198_v8 = vsel %vm4119_vm1, %v8857_v48, %v3922_v32  ;;  %v7349_v16 = vld [vmem:[%s10120_s0 + $0x110] sm:$0xff] }
 0x257   :  { %10156 = vst [vmem:[#allocation2_spill] sm:$0xff] %v9219_v9  ;;  %v3442_v53 = vmax.f32 %v3187_v24, 0.0  ;;  %2899 = vmatmul.bf16.gmra.mxu0 %v2219_v0  ;;  %v4150_v0 = vsel %vm2096_vm0, %v4125_v12, %v3781_v15 }
 0x259   :  { %v3570_v23 = vpack.c.bf16 %v3442_v53, %v3442_v53  ;;  %v4223_v53 = vsel %vm2096_vm0, %v4198_v8, %v3955_v31  ;;  %v3783_v4 = vpop.permute.xlu0 %3782 }
 0x25a   :  { %v9225_v58 = vpop.f32.mrf.mxu2  ;;  %v4242_v39 = vsel %vm4165_vm2, %v4223_v53, %v3988_v46  ;;  %v3816_v53 = vpop.permute.xlu1 %3815 }
 0x25b   :  { %10157 = vst [vmem:[#allocation3_spill] sm:$0xff] %v9225_v58  ;;  %v3729_v62 = vunpack.c.l.b16 %v3570_v23  ;;  %v9227_v34 = vpop.f32.mrf.mxu3  ;;  %v4170_v23 = vsel %vm4165_vm2, %v4150_v0, %v3814_v25 }
 0x25c   :  { %10158 = vst [vmem:[#allocation19_spill] sm:$0xff] %v9227_v34  ;;  %v2862_v40 = vpop.f32.mrf.mxu0  ;;  %v3189_v19 = vpop.f32.mrf.mxu1 }
 0x25d   :  { %v9236_v24 = vpack.c.b16 %v3729_v62, %v3728_v2  ;;  %v3190_v55 = vadd.f32 %v3189_v19, %v2861_v54  ;;  %v2863_v48 = vadd.f32 %v8922_v17, %v2862_v40  ;;  %v10160_v62 = vld [vmem:[#allocation5_spill] sm:$0xff]  ;;  %v3750_v19 = vpop.permute.xlu2 %3749 }
 0x25e   :  { %v2223_v25 = vsel %vm2096_vm0, %v7349_v16, %v10160_v62  ;;  %v7477_v40 = vld [vmem:[%s10120_s0 + $0x158] sm:$0xff] }
 0x25f   :  { %3228 = vmatmul.bf16.gmra.mxu1 %v2475_v60  ;;  %4586 = vmatmul.bf16.gmra.mxu2 %v4170_v23  ;;  %v3443_v15 = vmax.f32 %v3190_v55, 0.0 }
 0x260   :  { %4640 = vmatmul.bf16.gmra.mxu3 %v4242_v39 }
 0x261   :  { %v3571_v60 = vpack.c.bf16 %v3443_v15, %v3443_v15 }
 0x262   :  { %v3035_v22 = vpop.f32.mrf.mxu2 }
 0x263   :  { %v3036_v32 = vadd.f32 %v8922_v17, %v3035_v22  ;;  %v3364_v54 = vpop.f32.mrf.mxu3  ;;  %v3771_v39 = vunpack.c.l.b16 %v3571_v60  ;;  %v3957_v60 = vpop.permute.xlu0 %3956 }
 0x264   :  { %v2865_v2 = vpop.f32.mrf.mxu0  ;;  %v3191_v31 = vpop.f32.mrf.mxu1 }
 0x265   :  { %v9248_v12 = vadd.f32 %v3364_v54, %v3036_v32  ;;  %v3192_v46 = vadd.f32 %v3191_v31, %v2863_v48  ;;  %v2866_v0 = vadd.f32 %v8922_v17, %v2865_v2  ;;  %v4128_v48 = vsel %vm4119_vm1, %v8677_v42, %v3750_v19  ;;  %v10161_v54 = vld [vmem:[#allocation6_spill] sm:$0xff] }
 0x266   :  { %v2479_v31 = vsel %vm2096_vm0, %v7477_v40, %v10161_v54  ;;  %v4152_v62 = vsel %vm2096_vm0, %v4128_v48, %v3783_v4  ;;  %v7350_v42 = vld [vmem:[%s10120_s0 + $0x120] sm:$0xff] }
 0x267   :  { %v3444_v8 = vmax.f32 %v3192_v46, 0.0  ;;  %2904 = vmatmul.bf16.gmra.mxu0 %v2223_v25  ;;  %v3924_v46 = vpop.permute.xlu2 %3923  ;;  %v2227_v54 = vsel %vm2096_vm0, %v7350_v42, %v8629_v61 }
 0x268   :  { %v4201_v19 = vsel %vm4119_vm1, %v8930_v14, %v3924_v46  ;;  %v7478_v46 = vld [vmem:[%s10120_s0 + $0x168] sm:$0xff] }
 0x269   :  { %v3572_v55 = vpack.c.bf16 %v3444_v8, %v3444_v8  ;;  %v4173_v8 = vsel %vm4165_vm2, %v4152_v62, %v3816_v53  ;;  %v4225_v40 = vsel %vm2096_vm0, %v4201_v19, %v3957_v60 }
 0x26a   :  { %v9254_v23 = vpop.f32.mrf.mxu2 }
 0x26b   :  { %v3772_v16 = vunpack.c.l.b16 %v3572_v55  ;;  %v9256_v22 = vpop.f32.mrf.mxu3 }
 0x26c   :  { %v2867_v15 = vpop.f32.mrf.mxu0  ;;  %v3194_v32 = vpop.f32.mrf.mxu1 }
 0x26d   :  { %v9263_v25 = vpack.c.b16 %v3772_v16, %v3771_v39  ;;  %v3195_v2 = vadd.f32 %v3194_v32, %v2866_v0  ;;  %v2868_v0 = vadd.f32 %v8922_v17, %v2867_v15  ;;  %v9286_v17 = vld [vmem:[%s10122_s2] ss:$0 sm:$0xff] }
 0x26f   :  { %3233 = vmatmul.bf16.gmra.mxu1 %v2479_v31  ;;  %4591 = vmatmul.bf16.gmra.mxu2 %v4173_v8  ;;  %v3445_v39 = vmax.f32 %v3195_v2, 0.0 }
 0x271   :  { %v3573_v14 = vpack.c.bf16 %v3445_v39, %v3445_v39 }
 0x272   :  { %v3990_v55 = vpop.permute.xlu1 %3989  ;;  %v9272_v4 = vpop.f32.mrf.mxu2 }
 0x273   :  { %v9275_v16 = vpop.f32.mrf.mxu3  ;;  %v4245_v53 = vsel %vm4165_vm2, %v4225_v40, %v3990_v55  ;;  %v3804_v60 = vunpack.c.l.b16 %v3573_v14  ;;  %v2483_v55 = vsel %vm2096_vm0, %v7478_v46, %v8650_v41 }
 0x274   :  { %4645 = vmatmul.bf16.gmra.mxu3 %v4245_v53  ;;  %v2870_v48 = vpop.f32.mrf.mxu0  ;;  %v3196_v32 = vpop.f32.mrf.mxu1  ;;  %v7351_v53 = vld [vmem:[%s10120_s0 + $0x128] sm:$0xff] }
 0x275   :  { %v3197_v31 = vadd.f32 %v3196_v32, %v2868_v0  ;;  %v2871_v15 = vadd.f32 %v9286_v17, %v2870_v48  ;;  %v2231_v41 = vsel %vm2096_vm0, %v7351_v53, %v8688_v6 }
 0x277   :  { %v3446_v62 = vmax.f32 %v3197_v31, 0.0  ;;  %2909 = vmatmul.bf16.gmra.mxu0 %v2227_v54 }
 0x279   :  { %v3574_v2 = vpack.c.bf16 %v3446_v62, %v3446_v62 }
 0x27a   :  { %v9289_v8 = vpop.f32.mrf.mxu2 }
 0x27b   :  { %v3805_v61 = vunpack.c.l.b16 %v3574_v2  ;;  %v9291_v42 = vpop.f32.mrf.mxu3 }
 0x27c   :  { %v2872_v19 = vpop.f32.mrf.mxu0  ;;  %v3199_v40 = vpop.f32.mrf.mxu1 }
 0x27d   :  { %v9295_v0 = vpack.c.b16 %v3805_v61, %v3804_v60  ;;  %v3200_v39 = vadd.f32 %v3199_v40, %v2871_v15  ;;  %v2873_v32 = vadd.f32 %v9286_v17, %v2872_v19  ;;  %v7479_v60 = vld [vmem:[%s10120_s0 + $0x170] sm:$0xff] }
 0x27e   :  { %v2487_v6 = vsel %vm2096_vm0, %v7479_v60, %v8696_v29 }
 0x27f   :  { %3238 = vmatmul.bf16.gmra.mxu1 %v2483_v55  ;;  %v3447_v54 = vmax.f32 %v3200_v39, 0.0 }
 0x281   :  { %v3575_v2 = vpack.c.bf16 %v3447_v54, %v3447_v54  ;;  %v7352_v54 = vld [vmem:[%s10120_s0 + $0x130] sm:$0xff] }
 0x282   :  { %v9300_v48 = vpop.f32.mrf.mxu2  ;;  %v2235_v29 = vsel %vm2096_vm0, %v7352_v54, %v8725_v10 }
 0x283   :  { %v9303_v31 = vpop.f32.mrf.mxu3  ;;  %v3853_v19 = vunpack.c.l.b16 %v3575_v2 }
 0x284   :  { %v2875_v14 = vpop.f32.mrf.mxu0  ;;  %v3201_v62 = vpop.f32.mrf.mxu1 }
 0x285   :  { %v3202_v46 = vadd.f32 %v3201_v62, %v2873_v32  ;;  %v2876_v55 = vadd.f32 %v9286_v17, %v2875_v14 }
 0x287   :  { %v3448_v15 = vmax.f32 %v3202_v46, 0.0  ;;  %2914 = vmatmul.bf16.gmra.mxu0 %v2231_v41 }
 0x289   :  { %v3576_v61 = vpack.c.bf16 %v3448_v15, %v3448_v15 }
 0x28a   :  { %v9310_v40 = vpop.f32.mrf.mxu2 }
 0x28b   :  { %v3854_v39 = vunpack.c.l.b16 %v3576_v61  ;;  %v9313_v9 = vpop.f32.mrf.mxu3 }
 0x28c   :  { %v2877_v34 = vpop.f32.mrf.mxu0  ;;  %v3204_v58 = vpop.f32.mrf.mxu1 }
 0x28d   :  { %v9317_v53 = vpack.c.b16 %v3854_v39, %v3853_v19  ;;  %v3205_v32 = vadd.f32 %v3204_v58, %v2876_v55  ;;  %v2878_v14 = vadd.f32 %v9286_v17, %v2877_v34  ;;  %v7480_v19 = vld [vmem:[%s10120_s0 + $0x178] sm:$0xff] }
 0x28e   :  { %v2491_v10 = vsel %vm2096_vm0, %v7480_v19, %v8730_v7 }
 0x28f   :  { %3243 = vmatmul.bf16.gmra.mxu1 %v2487_v6  ;;  %v3449_v41 = vmax.f32 %v3205_v32, 0.0 }
 0x291   :  { %v3577_v61 = vpack.c.bf16 %v3449_v41, %v3449_v41  ;;  %v7353_v41 = vld [vmem:[%s10120_s0 + $0x138] sm:$0xff] }
 0x292   :  { %v9322_v62 = vpop.f32.mrf.mxu2  ;;  %v2239_v7 = vsel %vm2096_vm0, %v7353_v41, %v8751_v44 }
 0x293   :  { %v9325_v46 = vpop.f32.mrf.mxu3  ;;  %v3898_v34 = vunpack.c.l.b16 %v3577_v61 }
 0x294   :  { %v2880_v2 = vpop.f32.mrf.mxu0  ;;  %v3206_v15 = vpop.f32.mrf.mxu1 }
 0x295   :  { %v3207_v60 = vadd.f32 %v3206_v15, %v2878_v14  ;;  %v2881_v6 = vadd.f32 %v9286_v17, %v2880_v2 }
 0x297   :  { %v3450_v58 = vmax.f32 %v3207_v60, 0.0  ;;  %2919 = vmatmul.bf16.gmra.mxu0 %v2235_v29 }
 0x299   :  { %v3578_v55 = vpack.c.bf16 %v3450_v58, %v3450_v58 }
 0x29a   :  { %v9332_v39 = vpop.f32.mrf.mxu2 }
 0x29b   :  { %v3899_v32 = vunpack.c.l.b16 %v3578_v55  ;;  %v9335_v49 = vpop.f32.mrf.mxu3 }
 0x29c   :  { %v2882_v59 = vpop.f32.mrf.mxu0  ;;  %v3209_v36 = vpop.f32.mrf.mxu1 }
 0x29d   :  { %v3913_v54 = vpack.c.b16 %v3899_v32, %v3898_v34  ;;  %v3210_v14 = vadd.f32 %v3209_v36, %v2881_v6  ;;  %v2883_v2 = vadd.f32 %v9286_v17, %v2882_v59  ;;  %v7481_v34 = vld [vmem:[%s10120_s0 + $0x180] sm:$0xff] }
 0x29f   :  { %3248 = vmatmul.bf16.gmra.mxu1 %v2491_v10  ;;  %3925 = vrot.lane.b32.xlu2 %v3913_v54, %s7708_s25  ;;  %v3451_v29 = vmax.f32 %v3210_v14, 0.0 }
 0x2a1   :  { %v3579_v19 = vpack.c.bf16 %v3451_v29, %v3451_v29 }
 0x2a2   :  { %v9343_v15 = vpop.f32.mrf.mxu2 }
 0x2a3   :  { %v9346_v60 = vpop.f32.mrf.mxu3  ;;  %v3855_v32 = vunpack.c.l.b16 %v3579_v19 }
 0x2a4   :  { %v2885_v61 = vpop.f32.mrf.mxu0  ;;  %v3211_v58 = vpop.f32.mrf.mxu1 }
 0x2a5   :  { %v3212_v36 = vadd.f32 %v3211_v58, %v2883_v2  ;;  %v2886_v10 = vadd.f32 %v9286_v17, %v2885_v61  ;;  %v2495_v2 = vsel %vm2096_vm0, %v7481_v34, %v8756_v38  ;;  %v3785_v58 = vpop.permute.xlu0 %3784  ;;  %v7354_v61 = vld [vmem:[%s10120_s0 + $0x140] sm:$0xff] }
 0x2a7   :  { %v3452_v55 = vmax.f32 %v3212_v36, 0.0  ;;  %2924 = vmatmul.bf16.gmra.mxu0 %v2239_v7  ;;  %3753 = vrot.lane.b32.xlu2 %v9177_v57, %s7708_s25  ;;  %v3752_v57 = vpop.permute.xlu2 %3751 }
 0x2a8   :  { %v4131_v36 = vsel %vm4119_vm1, %v9049_v1, %v3752_v57 }
 0x2a9   :  { %v3580_v59 = vpack.c.bf16 %v3452_v55, %v3452_v55  ;;  %v4154_v19 = vsel %vm2096_vm0, %v4131_v36, %v3785_v58 }
 0x2aa   :  { %v9355_v6 = vpop.f32.mrf.mxu2 }
 0x2ab   :  { %v3856_v54 = vunpack.c.l.b16 %v3580_v59  ;;  %v9358_v14 = vpop.f32.mrf.mxu3 }
 0x2ac   :  { %10162 = vst [vmem:[#allocation4_spill] sm:$0xff] %v9358_v14  ;;  %v2887_v44 = vpop.f32.mrf.mxu0  ;;  %v3214_v41 = vpop.f32.mrf.mxu1 }
 0x2ad   :  { %v9362_v29 = vpack.c.b16 %v3856_v54, %v3855_v32  ;;  %v3215_v7 = vadd.f32 %v3214_v41, %v2886_v10  ;;  %v2888_v34 = vadd.f32 %v9286_v17, %v2887_v44  ;;  %v7482_v44 = vld [vmem:[%s10120_s0 + $0x188] sm:$0xff] }
 0x2af   :  { %3253 = vmatmul.bf16.gmra.mxu1 %v2495_v2  ;;  %3958 = vrot.lane.b32.xlu0 %v9362_v29, %s7707_s14  ;;  %v3453_v59 = vmax.f32 %v3215_v7, 0.0  ;;  %v10165_v2 = vld [vmem:[#allocation7_spill] sm:$0xff] }
 0x2b0   :  { %v2243_v1 = vsel %vm2096_vm0, %v7354_v61, %v10165_v2 }
 0x2b1   :  { %v3581_v58 = vpack.c.bf16 %v3453_v59, %v3453_v59  ;;  %v10167_v59 = vld [vmem:[#allocation8_spill] sm:$0xff] }
 0x2b2   :  { %v3818_v55 = vpop.permute.xlu1 %3817  ;;  %v9372_v38 = vpop.f32.mrf.mxu2 }
 0x2b3   :  { %v9375_v32 = vpop.f32.mrf.mxu3  ;;  %v9378_v10 = vsel %vm4165_vm2, %v4154_v19, %v3818_v55  ;;  %v3900_v55 = vunpack.c.l.b16 %v3581_v58 }
 0x2b4   :  { %10163 = vst [vmem:[#allocation5_spill] sm:$0xff] %v9375_v32  ;;  %4596 = vmatmul.bf16.gmra.mxu2 %v9378_v10  ;;  %v2890_v54 = vpop.f32.mrf.mxu0  ;;  %v3216_v41 = vpop.f32.mrf.mxu1 }
 0x2b5   :  { %10164 = vst [vmem:[#allocation6_spill] sm:$0xff] %v9378_v10  ;;  %v3217_v57 = vadd.f32 %v3216_v41, %v2888_v34  ;;  %v2891_v10 = vadd.f32 %v9286_v17, %v2890_v54  ;;  %v2499_v41 = vsel %vm2096_vm0, %v7482_v44, %v10167_v59 }
 0x2b7   :  { %v3454_v36 = vmax.f32 %v3217_v57, 0.0  ;;  %2929 = vmatmul.bf16.gmra.mxu0 %v2243_v1  ;;  %3786 = vrot.lane.b32.xlu0 %v9207_v28, %s7707_s14  ;;  %v7355_v57 = vld [vmem:[%s10120_s0 + $0x148] sm:$0xff] }
 0x2b9   :  { %v3582_v7 = vpack.c.bf16 %v3454_v36, %v3454_v36 }
 0x2ba   :  { %v9388_v19 = vpop.f32.mrf.mxu2 }
 0x2bb   :  { %v3901_v45 = vunpack.c.l.b16 %v3582_v7  ;;  %v9391_v63 = vpop.f32.mrf.mxu3 }
 0x2bc   :  { %10166 = vst [vmem:[#allocation7_spill] sm:$0xff] %v9391_v63  ;;  %v2892_v61 = vpop.f32.mrf.mxu0  ;;  %v3219_v34 = vpop.f32.mrf.mxu1 }
 0x2bd   :  { %v3914_v2 = vpack.c.b16 %v3901_v45, %v3900_v55  ;;  %v3220_v1 = vadd.f32 %v3219_v34, %v2891_v10  ;;  %v2893_v58 = vadd.f32 %v9286_v17, %v2892_v61  ;;  %v10170_v45 = vld [vmem:[#allocation9_spill] sm:$0xff]  ;;  %v7483_v61 = vld [vmem:[%s10120_s0 + $0x190] sm:$0xff] }
 0x2be   :  { %v2247_v10 = vsel %vm2096_vm0, %v7355_v57, %v10170_v45 }
 0x2bf   :  { %3258 = vmatmul.bf16.gmra.mxu1 %v2499_v41  ;;  %3991 = vrot.lane.b32.xlu1 %v3914_v2, %s7709_s16  ;;  %v3455_v36 = vmax.f32 %v3220_v1, 0.0 }
 0x2c0   :  { %3927 = vrot.lane.b32.xlu2 %v3914_v2, %s7708_s25 }
 0x2c1   :  { %v3583_v34 = vpack.c.bf16 %v3455_v36, %v3455_v36 }
 0x2c2   :  { %v9400_v54 = vpop.f32.mrf.mxu2 }
 0x2c3   :  { %10168 = vst [vmem:[#allocation8_spill] sm:$0xff] %v9400_v54  ;;  %v9403_v7 = vpop.f32.mrf.mxu3  ;;  %v3857_v1 = vunpack.c.l.b16 %v3583_v34  ;;  %v9428_v34 = vld [vmem:[%s10124_s4] ss:$0 sm:$0xff] }
 0x2c4   :  { %10169 = vst [vmem:[#allocation20_spill] sm:$0xff] %v9403_v7  ;;  %v2895_v63 = vpop.f32.mrf.mxu0  ;;  %v3221_v44 = vpop.f32.mrf.mxu1 }
 0x2c5   :  { %v3222_v55 = vadd.f32 %v3221_v44, %v2893_v58  ;;  %v2896_v57 = vadd.f32 %v9286_v17, %v2895_v63  ;;  %v7356_v63 = vld [vmem:[%s10120_s0 + $0x150] sm:$0xff] }
 0x2c7   :  { %v3456_v59 = vmax.f32 %v3222_v55, 0.0  ;;  %2934 = vmatmul.bf16.gmra.mxu0 %v2247_v10  ;;  %3819 = vrot.lane.b32.xlu1 %v9236_v24, %s7709_s16  ;;  %v10173_v10 = vld [vmem:[#allocation10_spill] sm:$0xff] }
 0x2c8   :  { %3755 = vrot.lane.b32.xlu2 %v9236_v24, %s7708_s25  ;;  %v2503_v55 = vsel %vm2096_vm0, %v7483_v61, %v10173_v10  ;;  %v2251_v10 = vsel %vm2096_vm0, %v7356_v63, %v8830_v50 }
 0x2c9   :  { %v3584_v41 = vpack.c.bf16 %v3456_v59, %v3456_v59 }
 0x2ca   :  { %v9414_v2 = vpop.f32.mrf.mxu2 }
 0x2cb   :  { %10171 = vst [vmem:[#allocation9_spill] sm:$0xff] %v9414_v2  ;;  %v3858_v58 = vunpack.c.l.b16 %v3584_v41  ;;  %v9417_v36 = vpop.f32.mrf.mxu3 }
 0x2cc   :  { %10172 = vst [vmem:[#allocation21_spill] sm:$0xff] %v9417_v36  ;;  %v2897_v44 = vpop.f32.mrf.mxu0  ;;  %v3224_v45 = vpop.f32.mrf.mxu1 }
 0x2cd   :  { %v9421_v7 = vpack.c.b16 %v3858_v58, %v3857_v1  ;;  %v3225_v24 = vadd.f32 %v3224_v45, %v2896_v57  ;;  %v2898_v41 = vadd.f32 %v9286_v17, %v2897_v44  ;;  %v7484_v44 = vld [vmem:[%s10120_s0 + $0x198] sm:$0xff] }
 0x2cf   :  { %3263 = vmatmul.bf16.gmra.mxu1 %v2503_v55  ;;  %3960 = vrot.lane.b32.xlu0 %v9421_v7, %s7707_s14  ;;  %v3457_v61 = vmax.f32 %v3225_v24, 0.0 }
 0x2d1   :  { %v3585_v2 = vpack.c.bf16 %v3457_v61, %v3457_v61 }
 0x2d2   :  { %v4582_v59 = vpop.f32.mrf.mxu2 }
 0x2d3   :  { %v4583_v1 = vadd.f32 %v9428_v34, %v4582_v59  ;;  %v4636_v57 = vpop.f32.mrf.mxu3  ;;  %v3902_v32 = vunpack.c.l.b16 %v3585_v2 }
 0x2d4   :  { %v2900_v58 = vpop.f32.mrf.mxu0  ;;  %v3226_v45 = vpop.f32.mrf.mxu1 }
 0x2d5   :  { %v9437_v55 = vadd.f32 %v4636_v57, %v4583_v1  ;;  %v3227_v36 = vadd.f32 %v3226_v45, %v2898_v41  ;;  %v2901_v14 = vadd.f32 %v9286_v17, %v2900_v58 }
 0x2d7   :  { %v3458_v54 = vmax.f32 %v3227_v36, 0.0  ;;  %2939 = vmatmul.bf16.gmra.mxu0 %v2251_v10  ;;  %3788 = vrot.lane.b32.xlu0 %v9263_v25, %s7707_s14  ;;  %v2507_v36 = vsel %vm2096_vm0, %v7484_v44, %v8838_v18 }
 0x2d9   :  { %v3586_v24 = vpack.c.bf16 %v3458_v54, %v3458_v54  ;;  %v7357_v54 = vld [vmem:[%s10120_s0 + $0x158] sm:$0xff] }
 0x2da   :  { %v9444_v59 = vpop.f32.mrf.mxu2 }
 0x2db   :  { %10174 = vst [vmem:[#allocation10_spill] sm:$0xff] %v9444_v59  ;;  %v3903_v50 = vunpack.c.l.b16 %v3586_v24  ;;  %v9447_v63 = vpop.f32.mrf.mxu3 }
 0x2dc   :  { %10175 = vst [vmem:[#allocation22_spill] sm:$0xff] %v9447_v63  ;;  %v2902_v41 = vpop.f32.mrf.mxu0  ;;  %v3229_v61 = vpop.f32.mrf.mxu1 }
 0x2dd   :  { %v3915_v1 = vpack.c.b16 %v3903_v50, %v3902_v32  ;;  %v3230_v25 = vadd.f32 %v3229_v61, %v2901_v14  ;;  %v2903_v57 = vadd.f32 %v9286_v17, %v2902_v41  ;;  %v2255_v14 = vsel %vm2096_vm0, %v7357_v54, %v8859_v21  ;;  %v7485_v41 = vld [vmem:[%s10120_s0 + $0x1a0] sm:$0xff] }
 0x2df   :  { %3268 = vmatmul.bf16.gmra.mxu1 %v2507_v36  ;;  %3993 = vrot.lane.b32.xlu1 %v3915_v1, %s7709_s16  ;;  %v3459_v58 = vmax.f32 %v3230_v25, 0.0 }
 0x2e0   :  { %3929 = vrot.lane.b32.xlu2 %v3915_v1, %s7708_s25 }
 0x2e1   :  { %v3587_v50 = vpack.c.bf16 %v3459_v58, %v3459_v58 }
 0x2e2   :  { %v4587_v2 = vpop.f32.mrf.mxu2 }
 0x2e3   :  { %v4588_v45 = vadd.f32 %v9428_v34, %v4587_v2  ;;  %v4641_v10 = vpop.f32.mrf.mxu3  ;;  %v3945_v25 = vunpack.c.l.b16 %v3587_v50 }
 0x2e4   :  { %v2905_v24 = vpop.f32.mrf.mxu0  ;;  %v3231_v18 = vpop.f32.mrf.mxu1 }
 0x2e5   :  { %v9460_v32 = vadd.f32 %v4641_v10, %v4588_v45  ;;  %v3232_v44 = vadd.f32 %v3231_v18, %v2903_v57  ;;  %v2906_v2 = vadd.f32 %v9286_v17, %v2905_v24  ;;  %v2511_v57 = vsel %vm2096_vm0, %v7485_v41, %v8872_v11  ;;  %v7358_v18 = vld [vmem:[%s10120_s0 + $0x168] sm:$0xff] }
 0x2e6   :  { %v2259_v11 = vsel %vm2096_vm0, %v7358_v18, %v8891_v47 }
 0x2e7   :  { %10176 = vst [vmem:[#allocation23_spill] sm:$0xff] %v9460_v32  ;;  %v3460_v61 = vmax.f32 %v3232_v44, 0.0  ;;  %2944 = vmatmul.bf16.gmra.mxu0 %v2255_v14  ;;  %3821 = vrot.lane.b32.xlu1 %v9295_v0, %s7709_s16 }
 0x2e9   :  { %v3588_v36 = vpack.c.bf16 %v3460_v61, %v3460_v61 }
 0x2ea   :  { %v9467_v1 = vpop.f32.mrf.mxu2 }
 0x2eb   :  { %v3946_v21 = vunpack.c.l.b16 %v3588_v36  ;;  %v9472_v10 = vpop.f32.mrf.mxu3 }
 0x2ec   :  { %v2907_v54 = vpop.f32.mrf.mxu0  ;;  %v3234_v45 = vpop.f32.mrf.mxu1  ;;  %10177 = vst [vmem:[#allocation24_spill] sm:$0xff] %v9472_v10 }
 0x2ed   :  { %v3950_v58 = vpack.c.b16 %v3946_v21, %v3945_v25  ;;  %v3235_v0 = vadd.f32 %v3234_v45, %v2906_v2  ;;  %v2908_v14 = vadd.f32 %v9286_v17, %v2907_v54  ;;  %v7486_v54 = vld [vmem:[%s10120_s0 + $0x1b0] sm:$0xff] }
 0x2ee   :  { %v2515_v18 = vsel %vm2096_vm0, %v7486_v54, %v8904_v52 }
 0x2ef   :  { %3273 = vmatmul.bf16.gmra.mxu1 %v2511_v57  ;;  %3962 = vrot.lane.b32.xlu0 %v3950_v58, %s7707_s14  ;;  %v3461_v24 = vmax.f32 %v3235_v0, 0.0 }
 0x2f1   :  { %v3589_v25 = vpack.c.bf16 %v3461_v24, %v3461_v24 }
 0x2f2   :  { %v4592_v44 = vpop.f32.mrf.mxu2 }
 0x2f3   :  { %v4593_v36 = vadd.f32 %v9428_v34, %v4592_v44  ;;  %v3978_v0 = vunpack.c.l.b16 %v3589_v25  ;;  %v7359_v44 = vld [vmem:[%s10120_s0 + $0x170] sm:$0xff] }
 0x2f4   :  { %v2910_v50 = vpop.f32.mrf.mxu0  ;;  %v3236_v61 = vpop.f32.mrf.mxu1 }
 0x2f5   :  { %v3237_v41 = vadd.f32 %v3236_v61, %v2908_v14  ;;  %v2911_v57 = vadd.f32 %v9286_v17, %v2910_v50 }
 0x2f7   :  { %v3462_v2 = vmax.f32 %v3237_v41, 0.0  ;;  %v4646_v21 = vpop.f32.mrf.mxu3  ;;  %2949 = vmatmul.bf16.gmra.mxu0 %v2259_v11 }
 0x2f8   :  { %v9482_v45 = vadd.f32 %v4646_v21, %v4593_v36  ;;  %v2263_v36 = vsel %vm2096_vm0, %v7359_v44, %v8937_v43 }
 0x2f9   :  { %v3590_v58 = vpack.c.bf16 %v3462_v2, %v3462_v2 }
 0x2fa   :  { %10178 = vst [vmem:[#allocation25_spill] sm:$0xff] %v9482_v45 }
 0x2fb   :  { %v3979_v63 = vunpack.c.l.b16 %v3590_v58 }
 0x2fc   :  { %v2912_v59 = vpop.f32.mrf.mxu0  ;;  %v3239_v47 = vpop.f32.mrf.mxu1 }
 0x2fd   :  { %v3983_v14 = vpack.c.b16 %v3979_v63, %v3978_v0  ;;  %v3240_v24 = vadd.f32 %v3239_v47, %v2911_v57  ;;  %v2913_v61 = vadd.f32 %v9286_v17, %v2912_v59  ;;  %v7487_v63 = vld [vmem:[%s10120_s0 + $0x1b8] sm:$0xff] }
 0x2fe   :  { %v2519_v47 = vsel %vm2096_vm0, %v7487_v63, %v8945_v51  ;;  %v7488_v51 = vld [vmem:[%s10120_s0 + $0x1c0] sm:$0xff] }
 0x2ff   :  { %3278 = vmatmul.bf16.gmra.mxu1 %v2515_v18  ;;  %3995 = vrot.lane.b32.xlu1 %v3983_v14, %s7709_s16  ;;  %v3463_v50 = vmax.f32 %v3240_v24, 0.0  ;;  %v7360_v14 = vld [vmem:[%s10120_s0 + $0x178] sm:$0xff] }
 0x301   :  { %v3591_v2 = vpack.c.bf16 %v3463_v50, %v3463_v50 }
 0x303   :  { %v3685_v54 = vunpack.c.l.b16 %v3591_v2 }
 0x304   :  { %v2915_v11 = vpop.f32.mrf.mxu0  ;;  %v3241_v41 = vpop.f32.mrf.mxu1 }
 0x305   :  { %v3242_v25 = vadd.f32 %v3241_v41, %v2913_v61  ;;  %v2916_v57 = vadd.f32 %v9286_v17, %v2915_v11  ;;  %v2267_v11 = vsel %vm2096_vm0, %v7360_v14, %v8964_v37 }
 0x307   :  { %v3464_v52 = vmax.f32 %v3242_v25, 0.0  ;;  %2954 = vmatmul.bf16.gmra.mxu0 %v2263_v36 }
 0x309   :  { %v3592_v21 = vpack.c.bf16 %v3464_v52, %v3464_v52 }
 0x30b   :  { %v3686_v58 = vunpack.c.l.b16 %v3592_v21 }
 0x30c   :  { %v2917_v59 = vpop.f32.mrf.mxu0  ;;  %v3244_v0 = vpop.f32.mrf.mxu1 }
 0x30d   :  { %v9503_v18 = vpack.c.b16 %v3686_v58, %v3685_v54  ;;  %v3245_v43 = vadd.f32 %v3244_v0, %v2916_v57  ;;  %v2918_v24 = vadd.f32 %v9286_v17, %v2917_v59  ;;  %v2523_v58 = vsel %vm2096_vm0, %v7488_v51, %v8977_v56  ;;  %v7361_v0 = vld [vmem:[%s10120_s0 + $0x180] sm:$0xff] }
 0x30f   :  { %3283 = vmatmul.bf16.gmra.mxu1 %v2519_v47  ;;  %v3465_v44 = vmax.f32 %v3245_v43, 0.0 }
 0x311   :  { %v3593_v36 = vpack.c.bf16 %v3465_v44, %v3465_v44  ;;  %v2271_v44 = vsel %vm2096_vm0, %v7361_v0, %v8996_v5 }
 0x313   :  { %v3730_v52 = vunpack.c.l.b16 %v3593_v36  ;;  %v3926_v36 = vpop.permute.xlu2 %3925 }
 0x314   :  { %v2920_v61 = vpop.f32.mrf.mxu0  ;;  %v3246_v50 = vpop.f32.mrf.mxu1 }
 0x315   :  { %v3247_v41 = vadd.f32 %v3246_v50, %v2918_v24  ;;  %v2921_v63 = vadd.f32 %v9286_v17, %v2920_v61 }
 0x317   :  { %v3466_v25 = vmax.f32 %v3247_v41, 0.0  ;;  %2959 = vmatmul.bf16.gmra.mxu0 %v2267_v11  ;;  %v7489_v11 = vld [vmem:[%s10120_s0 + $0x1c8] sm:$0xff] }
 0x318   :  { %v2527_v5 = vsel %vm2096_vm0, %v7489_v11, %v9027_v30 }
 0x319   :  { %v3594_v2 = vpack.c.bf16 %v3466_v25, %v3466_v25 }
 0x31b   :  { %v3731_v21 = vunpack.c.l.b16 %v3594_v2 }
 0x31c   :  { %v2922_v54 = vpop.f32.mrf.mxu0  ;;  %v3249_v57 = vpop.f32.mrf.mxu1 }
 0x31d   :  { %v3742_v59 = vpack.c.b16 %v3731_v21, %v3730_v52  ;;  %v3250_v37 = vadd.f32 %v3249_v57, %v2921_v63  ;;  %v2923_v47 = vadd.f32 %v9286_v17, %v2922_v54 }
 0x31f   :  { %3288 = vmatmul.bf16.gmra.mxu1 %v2523_v58  ;;  %3757 = vrot.lane.b32.xlu2 %v3742_v59, %s7708_s25  ;;  %v3467_v43 = vmax.f32 %v3250_v37, 0.0  ;;  %v4204_v58 = vsel %vm4119_vm1, %v9317_v53, %v3926_v36 }
 0x321   :  { %v3595_v50 = vpack.c.bf16 %v3467_v43, %v3467_v43  ;;  %v3959_v51 = vpop.permute.xlu0 %3958 }
 0x322   :  { %v4227_v59 = vsel %vm2096_vm0, %v4204_v58, %v3959_v51 }
 0x323   :  { %v3687_v25 = vunpack.c.l.b16 %v3595_v50 }
 0x324   :  { %v2925_v14 = vpop.f32.mrf.mxu0  ;;  %v3251_v24 = vpop.f32.mrf.mxu1 }
 0x325   :  { %v3252_v61 = vadd.f32 %v3251_v24, %v2923_v47  ;;  %v2926_v2 = vadd.f32 %v9286_v17, %v2925_v14  ;;  %v3754_v24 = vpop.permute.xlu2 %3753 }
 0x326   :  { %v4134_v53 = vsel %vm4119_vm1, %v9148_v27, %v3754_v24 }
 0x327   :  { %v3468_v56 = vmax.f32 %v3252_v61, 0.0  ;;  %2964 = vmatmul.bf16.gmra.mxu0 %v2271_v44 }
 0x329   :  { %v3596_v41 = vpack.c.bf16 %v3468_v56, %v3468_v56  ;;  %v3787_v61 = vpop.permute.xlu0 %3786 }
 0x32a   :  { %v4156_v11 = vsel %vm2096_vm0, %v4134_v53, %v3787_v61 }
 0x32b   :  { %v3688_v52 = vunpack.c.l.b16 %v3596_v41 }
 0x32c   :  { %v2927_v63 = vpop.f32.mrf.mxu0  ;;  %v3254_v21 = vpop.f32.mrf.mxu1 }
 0x32d   :  { %v9530_v54 = vpack.c.b16 %v3688_v52, %v3687_v25  ;;  %v3255_v57 = vadd.f32 %v3254_v21, %v2926_v2  ;;  %v2928_v47 = vadd.f32 %v9286_v17, %v2927_v63 }
 0x32f   :  { %3293 = vmatmul.bf16.gmra.mxu1 %v2527_v5  ;;  %3790 = vrot.lane.b32.xlu0 %v9530_v54, %s7707_s14  ;;  %v3469_v43 = vmax.f32 %v3255_v57, 0.0 }
 0x331   :  { %v3992_v37 = vpop.permute.xlu1 %3991  ;;  %v3597_v50 = vpack.c.bf16 %v3469_v43, %v3469_v43 }
 0x332   :  { %v9538_v0 = vsel %vm4165_vm2, %v4227_v59, %v3992_v37 }
 0x333   :  { %4650 = vmatmul.bf16.gmra.mxu3 %v9538_v0  ;;  %v3732_v2 = vunpack.c.l.b16 %v3597_v50 }
 0x334   :  { %v2930_v30 = vpop.f32.mrf.mxu0  ;;  %v3256_v14 = vpop.f32.mrf.mxu1 }
 0x335   :  { %v3257_v44 = vadd.f32 %v3256_v14, %v2928_v47  ;;  %v2931_v41 = vadd.f32 %v9286_v17, %v2930_v30 }
 0x337   :  { %v3470_v56 = vmax.f32 %v3257_v44, 0.0  ;;  %v3928_v44 = vpop.permute.xlu2 %3927 }
 0x339   :  { %v3598_v36 = vpack.c.bf16 %v3470_v56, %v3470_v56  ;;  %v3820_v25 = vpop.permute.xlu1 %3819 }
 0x33a   :  { %v9547_v51 = vsel %vm4165_vm2, %v4156_v11, %v3820_v25  ;;  %v4207_v25 = vsel %vm4119_vm1, %v9362_v29, %v3928_v44 }
 0x33b   :  { %v3733_v52 = vunpack.c.l.b16 %v3598_v36  ;;  %4601 = vmatmul.bf16.gmra.mxu2 %v9547_v51 }
 0x33c   :  { %v2932_v63 = vpop.f32.mrf.mxu0  ;;  %v3259_v21 = vpop.f32.mrf.mxu1 }
 0x33d   :  { %v9550_v5 = vpack.c.b16 %v3733_v52, %v3732_v2  ;;  %v3260_v57 = vadd.f32 %v3259_v21, %v2931_v41  ;;  %v2933_v27 = vadd.f32 %v9286_v17, %v2932_v63 }
 0x33f   :  { %3823 = vrot.lane.b32.xlu1 %v9550_v5, %s7709_s16  ;;  %v3471_v58 = vmax.f32 %v3260_v57, 0.0 }
 0x341   :  { %v3599_v43 = vpack.c.bf16 %v3471_v58, %v3471_v58  ;;  %v3961_v50 = vpop.permute.xlu0 %3960 }
 0x342   :  { %v4229_v2 = vsel %vm2096_vm0, %v4207_v25, %v3961_v50 }
 0x343   :  { %v3689_v61 = vunpack.c.l.b16 %v3599_v43 }
 0x344   :  { %v2935_v59 = vpop.f32.mrf.mxu0  ;;  %v3261_v37 = vpop.f32.mrf.mxu1 }
 0x345   :  { %v3262_v47 = vadd.f32 %v3261_v37, %v2933_v27  ;;  %v2936_v14 = vadd.f32 %v9286_v17, %v2935_v59  ;;  %v3756_v59 = vpop.permute.xlu2 %3755 }
 0x346   :  { %v4137_v29 = vsel %vm4119_vm1, %v9207_v28, %v3756_v59 }
 0x347   :  { %v3472_v30 = vmax.f32 %v3262_v47, 0.0 }
 0x349   :  { %v3600_v24 = vpack.c.bf16 %v3472_v30, %v3472_v30  ;;  %v3789_v47 = vpop.permute.xlu0 %3788 }
 0x34b   :  { %v3690_v56 = vunpack.c.l.b16 %v3600_v24 }
 0x34c   :  { %v2937_v53 = vpop.f32.mrf.mxu0  ;;  %v3264_v11 = vpop.f32.mrf.mxu1 }
 0x34d   :  { %v9556_v41 = vpack.c.b16 %v3690_v56, %v3689_v61  ;;  %v3265_v36 = vadd.f32 %v3264_v11, %v2936_v14  ;;  %v2938_v21 = vadd.f32 %v9286_v17, %v2937_v53  ;;  %v4158_v14 = vsel %vm2096_vm0, %v4137_v29, %v3789_v47 }
 0x34f   :  { %v3473_v57 = vmax.f32 %v3265_v36, 0.0 }
 0x351   :  { %v3994_v52 = vpop.permute.xlu1 %3993  ;;  %v3601_v43 = vpack.c.bf16 %v3473_v57, %v3473_v57 }
 0x352   :  { %v9562_v63 = vsel %vm4165_vm2, %v4229_v2, %v3994_v52 }
 0x353   :  { %4655 = vmatmul.bf16.gmra.mxu3 %v9562_v63  ;;  %v3734_v56 = vunpack.c.l.b16 %v3601_v43 }
 0x354   :  { %v2940_v27 = vpop.f32.mrf.mxu0  ;;  %v3266_v58 = vpop.f32.mrf.mxu1 }
 0x355   :  { %v3267_v37 = vadd.f32 %v3266_v58, %v2938_v21  ;;  %v2941_v24 = vadd.f32 %v9286_v17, %v2940_v27 }
 0x357   :  { %v3474_v30 = vmax.f32 %v3267_v37, 0.0 }
 0x359   :  { %v3602_v44 = vpack.c.bf16 %v3474_v30, %v3474_v30  ;;  %v3822_v61 = vpop.permute.xlu1 %3821 }
 0x35a   :  { %v9571_v50 = vsel %vm4165_vm2, %v4158_v14, %v3822_v61 }
 0x35b   :  { %v3735_v53 = vunpack.c.l.b16 %v3602_v44  ;;  %4606 = vmatmul.bf16.gmra.mxu2 %v9571_v50  ;;  %v3930_v44 = vpop.permute.xlu2 %3929 }
 0x35c   :  { %v2942_v11 = vpop.f32.mrf.mxu0  ;;  %v3269_v36 = vpop.f32.mrf.mxu1 }
 0x35d   :  { %v9574_v25 = vpack.c.b16 %v3735_v53, %v3734_v56  ;;  %v3270_v2 = vadd.f32 %v3269_v36, %v2941_v24  ;;  %v2943_v28 = vadd.f32 %v9286_v17, %v2942_v11  ;;  %v4210_v53 = vsel %vm4119_vm1, %v9421_v7, %v3930_v44 }
 0x35f   :  { %v3475_v52 = vmax.f32 %v3270_v2, 0.0 }
 0x361   :  { %v3603_v58 = vpack.c.bf16 %v3475_v52, %v3475_v52  ;;  %v3963_v24 = vpop.permute.xlu0 %3962 }
 0x362   :  { %v4231_v11 = vsel %vm2096_vm0, %v4210_v53, %v3963_v24 }
 0x363   :  { %v3773_v43 = vunpack.c.l.b16 %v3603_v58 }
 0x364   :  { %v2945_v21 = vpop.f32.mrf.mxu0  ;;  %v3271_v57 = vpop.f32.mrf.mxu1 }
 0x365   :  { %v3272_v27 = vadd.f32 %v3271_v57, %v2943_v28  ;;  %v2946_v37 = vadd.f32 %v9286_v17, %v2945_v21 }
 0x367   :  { %v3476_v59 = vmax.f32 %v3272_v27, 0.0 }
 0x369   :  { %v3604_v47 = vpack.c.bf16 %v3476_v59, %v3476_v59 }
 0x36b   :  { %v3774_v30 = vunpack.c.l.b16 %v3604_v47 }
 0x36c   :  { %v2947_v29 = vpop.f32.mrf.mxu0  ;;  %v3274_v14 = vpop.f32.mrf.mxu1 }
 0x36d   :  { %v9578_v61 = vpack.c.b16 %v3774_v30, %v3773_v43  ;;  %v3275_v56 = vadd.f32 %v3274_v14, %v2946_v37  ;;  %v2948_v28 = vadd.f32 %v9286_v17, %v2947_v29 }
 0x36f   :  { %v3477_v52 = vmax.f32 %v3275_v56, 0.0 }
 0x371   :  { %v3996_v36 = vpop.permute.xlu1 %3995  ;;  %v3605_v58 = vpack.c.bf16 %v3477_v52, %v3477_v52 }
 0x372   :  { %v9584_v2 = vsel %vm4165_vm2, %v4231_v11, %v3996_v36 }
 0x373   :  { %4660 = vmatmul.bf16.gmra.mxu3 %v9584_v2  ;;  %v3806_v7 = vunpack.c.l.b16 %v3605_v58 }
 0x374   :  { %v2950_v21 = vpop.f32.mrf.mxu0  ;;  %v3276_v57 = vpop.f32.mrf.mxu1 }
 0x375   :  { %v3277_v27 = vadd.f32 %v3276_v57, %v2948_v28  ;;  %v2951_v37 = vadd.f32 %v9286_v17, %v2950_v21 }
 0x377   :  { %v3478_v59 = vmax.f32 %v3277_v27, 0.0 }
 0x379   :  { %v3606_v47 = vpack.c.bf16 %v3478_v59, %v3478_v59 }
 0x37b   :  { %v3807_v43 = vunpack.c.l.b16 %v3606_v47 }
 0x37c   :  { %v2952_v30 = vpop.f32.mrf.mxu0  ;;  %v3279_v14 = vpop.f32.mrf.mxu1 }
 0x37d   :  { %v9589_v44 = vpack.c.b16 %v3807_v43, %v3806_v7  ;;  %v3280_v24 = vadd.f32 %v3279_v14, %v2951_v37  ;;  %v2953_v29 = vadd.f32 %v9286_v17, %v2952_v30 }
 0x37f   :  { %v3479_v56 = vmax.f32 %v3280_v24, 0.0 }
 0x381   :  { %v3607_v45 = vpack.c.bf16 %v3479_v56, %v3479_v56 }
 0x383   :  { %v3859_v57 = vunpack.c.l.b16 %v3607_v45 }
 0x384   :  { %v2955_v53 = vpop.f32.mrf.mxu0  ;;  %v3281_v11 = vpop.f32.mrf.mxu1 }
 0x385   :  { %v3282_v36 = vadd.f32 %v3281_v11, %v2953_v29  ;;  %v2956_v21 = vadd.f32 %v9286_v17, %v2955_v53 }
 0x387   :  { %v3480_v28 = vmax.f32 %v3282_v36, 0.0 }
 0x389   :  { %v3608_v52 = vpack.c.bf16 %v3480_v28, %v3480_v28 }
 0x38b   :  { %v3860_v27 = vunpack.c.l.b16 %v3608_v52 }
 0x38c   :  { %v2957_v58 = vpop.f32.mrf.mxu0  ;;  %v3284_v59 = vpop.f32.mrf.mxu1 }
 0x38d   :  { %v9593_v47 = vpack.c.b16 %v3860_v27, %v3859_v57  ;;  %v3285_v7 = vadd.f32 %v3284_v59, %v2956_v21  ;;  %v2958_v37 = vadd.f32 %v9286_v17, %v2957_v58 }
 0x38f   :  { %v3481_v43 = vmax.f32 %v3285_v7, 0.0 }
 0x391   :  { %v3609_v10 = vpack.c.bf16 %v3481_v43, %v3481_v43  ;;  %v9601_v43 = vpop.f32.mrf.mxu2 }
 0x393   :  { %v3904_v11 = vunpack.c.l.b16 %v3609_v10 }
 0x394   :  { %v2960_v30 = vpop.f32.mrf.mxu0  ;;  %v3286_v14 = vpop.f32.mrf.mxu1 }
 0x395   :  { %v3287_v24 = vadd.f32 %v3286_v14, %v2958_v37  ;;  %v2961_v45 = vadd.f32 %v9286_v17, %v2960_v30 }
 0x397   :  { %v3482_v29 = vmax.f32 %v3287_v24, 0.0 }
 0x399   :  { %v3610_v56 = vpack.c.bf16 %v3482_v29, %v3482_v29 }
 0x39b   :  { %v3905_v36 = vunpack.c.l.b16 %v3610_v56  ;;  %v3758_v56 = vpop.permute.xlu2 %3757 }
 0x39c   :  { %v2962_v53 = vpop.f32.mrf.mxu0  ;;  %v3289_v28 = vpop.f32.mrf.mxu1 }
 0x39d   :  { %v3916_v52 = vpack.c.b16 %v3905_v36, %v3904_v11  ;;  %v3290_v32 = vadd.f32 %v3289_v28, %v2961_v45  ;;  %v2963_v57 = vadd.f32 %v9286_v17, %v2962_v53  ;;  %v7613_v28 = vld [vmem:[%s10123_s3 + $0xb8] sm:$0xff] }
 0x39e   :  { %4681 = vmatpush.bf16.msra.mxu2 %v7613_v28 }
 0x39f   :  { %3931 = vrot.lane.b32.xlu2 %v3916_v52, %s7708_s25  ;;  %v3483_v21 = vmax.f32 %v3290_v32, 0.0  ;;  %v9606_v32 = vpop.f32.mrf.mxu3  ;;  %v7621_v52 = vld [vmem:[%s10123_s3 + $0xf8] sm:$0xff] }
 0x3a0   :  { %4735 = vmatpush.bf16.msra.mxu3 %v7621_v52  ;;  %v3041_v52 = vadd.f32 %v9286_v17, %v9272_v4 }
 0x3a1   :  { %v3611_v7 = vpack.c.bf16 %v3483_v21, %v3483_v21  ;;  %v3791_v45 = vpop.permute.xlu0 %3790 }
 0x3a3   :  { %v3861_v30 = vunpack.c.l.b16 %v3611_v7 }
 0x3a4   :  { %v3291_v27 = vpop.f32.mrf.mxu1  ;;  %v2965_v59 = vpop.f32.mrf.mxu0 }
 0x3a5   :  { %v3292_v58 = vadd.f32 %v3291_v27, %v2963_v57  ;;  %v2966_v14 = vadd.f32 %v9286_v17, %v2965_v59  ;;  %v4597_v27 = vpop.f32.mrf.mxu2 }
 0x3a7   :  { %v3484_v37 = vmax.f32 %v3292_v58, 0.0  ;;  %3759 = vrot.lane.b32.xlu2 %v9550_v5, %s7708_s25  ;;  %v4140_v5 = vsel %vm4119_vm1, %v9503_v18, %v3758_v56 }
 0x3a8   :  { %v4160_v57 = vsel %vm2096_vm0, %v4140_v5, %v3791_v45 }
 0x3a9   :  { %v3612_v10 = vpack.c.bf16 %v3484_v37, %v3484_v37  ;;  %v4598_v37 = vadd.f32 %v9428_v34, %v4597_v27 }
 0x3ab   :  { %v3862_v24 = vunpack.c.l.b16 %v3612_v10 }
 0x3ac   :  { %v3294_v29 = vpop.f32.mrf.mxu1  ;;  %v2967_v53 = vpop.f32.mrf.mxu0 }
 0x3ad   :  { %v9604_v11 = vpack.c.b16 %v3862_v24, %v3861_v30  ;;  %v3295_v36 = vadd.f32 %v3294_v29, %v2966_v14  ;;  %v2968_v18 = vadd.f32 %v9286_v17, %v2967_v53  ;;  %v7620_v53 = vld [vmem:[%s10123_s3 + $0xf0] sm:$0xff]  ;;  %v9651_v27 = vpop.f32.mrf.mxu2 }
 0x3ae   :  { %4736 = vmatpush.bf16.msra.mxu3 %v7620_v53 }
 0x3af   :  { %3964 = vrot.lane.b32.xlu0 %v9604_v11, %s7707_s14  ;;  %v3485_v59 = vmax.f32 %v3295_v36, 0.0  ;;  %v7612_v36 = vld [vmem:[%s10123_s3 + $0xb0] sm:$0xff] }
 0x3b0   :  { %4682 = vmatpush.bf16.msra.mxu2 %v7612_v36 }
 0x3b1   :  { %v3824_v21 = vpop.permute.xlu1 %3823  ;;  %v3613_v14 = vpack.c.bf16 %v3485_v59, %v3485_v59 }
 0x3b2   :  { %v9620_v58 = vsel %vm4165_vm2, %v4160_v57, %v3824_v21  ;;  %v3043_v57 = vadd.f32 %v9286_v17, %v9289_v8  ;;  %v3038_v21 = vadd.f32 %v9286_v17, %v9254_v23  ;;  %v7611_v23 = vld [vmem:[%s10123_s3 + $0xa8] sm:$0xff]  ;;  %v3513_v17 = vmax.f32 %v9248_v12, 0.0 }
 0x3b3   :  { %4611 = vmatmul.bf16.gmra.mxu2 %v9620_v58  ;;  %v3906_v45 = vunpack.c.l.b16 %v3613_v14  ;;  %v9672_v14 = vld [vmem:[%s10122_s2] ss:$0 sm:$0xff] }
 0x3b4   :  { %v3296_v7 = vpop.f32.mrf.mxu1  ;;  %v3372_v59 = vadd.f32 %v9291_v42, %v3043_v57  ;;  %4683 = vmatpush.bf16.msra.mxu2 %v7611_v23  ;;  %v3048_v12 = vadd.f32 %v9672_v14, %v9310_v40  ;;  %v10180_v23 = vld [vmem:[#allocation12_spill] sm:$0xff] }
 0x3b5   :  { %v3297_v10 = vadd.f32 %v3296_v7, %v2968_v18  ;;  %v3370_v18 = vadd.f32 %v9275_v16, %v3041_v52 }
 0x3b6   :  { %v4651_v30 = vpop.f32.mrf.mxu3  ;;  %v3516_v16 = vmax.f32 %v3372_v59, 0.0  ;;  %v3377_v52 = vadd.f32 %v9313_v9, %v3048_v12 }
 0x3b7   :  { %v3486_v24 = vmax.f32 %v3297_v10, 0.0  ;;  %v9625_v29 = vadd.f32 %v4651_v30, %v4598_v37  ;;  %3792 = vrot.lane.b32.xlu0 %v9556_v41, %s7707_s14  ;;  %v3515_v4 = vmax.f32 %v3370_v18, 0.0  ;;  %v3641_v30 = vpack.c.bf16 %v3513_v17, %v3513_v17 }
 0x3b8   :  { %v3644_v37 = vpack.c.bf16 %v3516_v16, %v3516_v16  ;;  %v3056_v17 = vadd.f32 %v9672_v14, %v9343_v15  ;;  %v7618_v15 = vld [vmem:[%s10123_s3 + $0xe0] sm:$0xff] }
 0x3b9   :  { %v3614_v56 = vpack.c.bf16 %v3486_v24, %v3486_v24  ;;  %v3643_v42 = vpack.c.bf16 %v3515_v4, %v3515_v4  ;;  %v3046_v24 = vadd.f32 %v9672_v14, %v9300_v48  ;;  %v7619_v48 = vld [vmem:[%s10123_s3 + $0xe8] sm:$0xff]  ;;  %v4082_v36 = vunpack.c.l.b16 %v3641_v30 }
 0x3ba   :  { %4737 = vmatpush.bf16.msra.mxu3 %v7619_v48  ;;  %v3063_v30 = vadd.f32 %v9672_v14, %v9388_v19 }
 0x3bb   :  { %v3907_v5 = vunpack.c.l.b16 %v3614_v56  ;;  %v4069_v40 = vunpack.c.l.b16 %v3643_v42  ;;  %v3375_v53 = vadd.f32 %v9303_v31, %v3046_v24  ;;  %v10182_v24 = vld [vmem:[#allocation5_spill] sm:$0xff] }
 0x3bd   :  { %v3917_v28 = vpack.c.b16 %v3907_v5, %v3906_v45  ;;  %v3051_v45 = vadd.f32 %v9672_v14, %v9322_v62  ;;  %v3053_v5 = vadd.f32 %v9672_v14, %v9332_v39  ;;  %v4070_v62 = vunpack.c.l.b16 %v3644_v37 }
 0x3be   :  { %v9656_v7 = vpop.f32.mrf.mxu3  ;;  %v4602_v8 = vpop.f32.mrf.mxu2  ;;  %v3517_v59 = vmax.f32 %v3375_v53, 0.0  ;;  %4738 = vmatpush.bf16.msra.mxu3 %v7618_v15  ;;  %v10184_v53 = vld [vmem:[#allocation17_spill] sm:$0xff] }
 0x3bf   :  { %3997 = vrot.lane.b32.xlu1 %v3917_v28, %s7709_s16  ;;  %3966 = vrot.lane.b32.xlu0 %v8836_v33, %s7707_s14  ;;  %v4603_v10 = vadd.f32 %v9428_v34, %v4602_v8  ;;  %v3382_v57 = vadd.f32 %v9335_v49, %v3053_v5  ;;  %v7610_v49 = vld [vmem:[%s10123_s3 + $0xa0] sm:$0xff]  ;;  %v3061_v8 = vadd.f32 %v9672_v14, %v9372_v38  ;;  %v10181_v38 = vld [vmem:[#allocation4_spill] sm:$0xff]  ;;  %v10183_v5 = vld [vmem:[#allocation7_spill] sm:$0xff] }
 0x3c0   :  { %3933 = vrot.lane.b32.xlu2 %v3917_v28, %s7708_s25  ;;  %v3645_v9 = vpack.c.bf16 %v3517_v59, %v3517_v59  ;;  %4684 = vmatpush.bf16.msra.mxu2 %v7610_v49  ;;  %v3392_v48 = vadd.f32 %v10183_v5, %v3063_v30  ;;  %v7617_v5 = vld [vmem:[%s10123_s3 + $0xd8] sm:$0xff] }
 0x3c1   :  { %v3390_v19 = vadd.f32 %v10182_v24, %v3061_v8 }
 0x3c2   :  { %v4084_v16 = vunpack.c.l.b16 %v3645_v9  ;;  %4739 = vmatpush.bf16.msra.mxu3 %v7617_v5 }
 0x3c6   :  { %v9727_v12 = vpop.f32.mrf.mxu2 }
 0x3c7   :  { %3825 = vrot.lane.b32.xlu1 %v9574_v25, %s7709_s16  ;;  %3794 = vrot.lane.b32.xlu0 %v9578_v61, %s7707_s14  ;;  %v3367_v61 = vadd.f32 %v9256_v22, %v3038_v21  ;;  %v9697_v21 = vpack.c.b16 %v4070_v62, %v4069_v40 }
 0x3c8   :  { %3761 = vrot.lane.b32.xlu2 %v9574_v25, %s7708_s25  ;;  %v10179_v25 = vld [vmem:[#allocation11_spill] sm:$0xff] }
 0x3c9   :  { %v3514_v22 = vmax.f32 %v3367_v61, 0.0  ;;  %v3518_v61 = vmax.f32 %v3377_v52, 0.0  ;;  %v3028_v52 = vadd.f32 %v9672_v14, %v10184_v53 }
 0x3cb   :  { %v3646_v31 = vpack.c.bf16 %v3518_v61, %v3518_v61 }
 0x3cd   :  { %v4085_v42 = vunpack.c.l.b16 %v3646_v31 }
 0x3cf   :  { %3999 = vrot.lane.b32.xlu1 %v10179_v25, %s7709_s16  ;;  %3968 = vrot.lane.b32.xlu0 %v8902_v3, %s7707_s14  ;;  %v3642_v3 = vpack.c.bf16 %v3514_v22, %v3514_v22  ;;  %v3058_v22 = vadd.f32 %v9672_v14, %v9355_v6  ;;  %v3385_v6 = vadd.f32 %v9346_v60, %v3056_v17  ;;  %v7609_v60 = vld [vmem:[%s10123_s3 + $0x98] sm:$0xff] }
 0x3d0   :  { %3935 = vrot.lane.b32.xlu2 %v10179_v25, %s7708_s25  ;;  %4685 = vmatpush.bf16.msra.mxu2 %v7609_v60 }
 0x3d1   :  { %v4083_v39 = vunpack.c.l.b16 %v3642_v3  ;;  %v3387_v3 = vadd.f32 %v10181_v38, %v3058_v22  ;;  %v3521_v40 = vmax.f32 %v3385_v6, 0.0  ;;  %v10187_v22 = vld [vmem:[#allocation9_spill] sm:$0xff] }
 0x3d2   :  { %v3068_v8 = vadd.f32 %v9672_v14, %v10187_v22 }
 0x3d3   :  { %v4088_v18 = vpack.c.b16 %v4083_v39, %v4082_v36  ;;  %v3522_v62 = vmax.f32 %v3387_v3, 0.0  ;;  %v3523_v36 = vmax.f32 %v3390_v19, 0.0  ;;  %v10191_v3 = vld [vmem:[#allocation20_spill] sm:$0xff]  ;;  %v10192_v19 = vld [vmem:[#allocation21_spill] sm:$0xff] }
 0x3d6   :  { %v4656_v56 = vpop.f32.mrf.mxu3 }
 0x3d7   :  { %v9682_v28 = vadd.f32 %v4656_v56, %v4603_v10  ;;  %3827 = vrot.lane.b32.xlu1 %v9589_v44, %s7709_s16  ;;  %4044 = vrot.lane.b32.xlu0 %v9033_v13, %s7707_s14  ;;  %v3380_v44 = vadd.f32 %v9325_v46, %v3051_v45  ;;  %v4089_v56 = vpack.c.b16 %v4085_v42, %v4084_v16  ;;  %v10186_v16 = vld [vmem:[#allocation8_spill] sm:$0xff] }
 0x3d8   :  { %4033 = vrot.lane.b32.xlu2 %v9006_v26, %s7708_s25  ;;  %v3520_v26 = vmax.f32 %v3382_v57, 0.0  ;;  %v3650_v57 = vpack.c.bf16 %v3522_v62, %v3522_v62  ;;  %v3066_v17 = vadd.f32 %v9672_v14, %v10186_v16 }
 0x3d9   :  { %v3519_v25 = vmax.f32 %v3380_v44, 0.0  ;;  %v3649_v44 = vpack.c.bf16 %v3521_v40, %v3521_v40 }
 0x3da   :  { %v3648_v4 = vpack.c.bf16 %v3520_v26, %v3520_v26  ;;  %v4087_v49 = vunpack.c.l.b16 %v3650_v57  ;;  %v3395_v24 = vadd.f32 %v10191_v3, %v3066_v17 }
 0x3db   :  { %v3647_v46 = vpack.c.bf16 %v3519_v25, %v3519_v25  ;;  %v10185_v25 = vld [vmem:[#allocation18_spill] sm:$0xff]  ;;  %v4086_v9 = vunpack.c.l.b16 %v3649_v44 }
 0x3dc   :  { %v4072_v10 = vunpack.c.l.b16 %v3648_v4  ;;  %v3357_v26 = vadd.f32 %v10185_v25, %v3028_v52  ;;  %v3525_v62 = vmax.f32 %v3395_v24, 0.0  ;;  %v7616_v25 = vld [vmem:[%s10123_s3 + $0xd0] sm:$0xff] }
 0x3dd   :  { %v4071_v37 = vunpack.c.l.b16 %v3647_v46  ;;  %v4090_v6 = vpack.c.b16 %v4087_v49, %v4086_v9  ;;  %4740 = vmatpush.bf16.msra.mxu3 %v7616_v25 }
 0x3de   :  { %v9732_v39 = vpop.f32.mrf.mxu3  ;;  %v4607_v59 = vpop.f32.mrf.mxu2  ;;  %v3510_v15 = vmax.f32 %v3357_v26, 0.0  ;;  %v3653_v53 = vpack.c.bf16 %v3525_v62, %v3525_v62  ;;  %v7607_v26 = vld [vmem:[%s10123_s3 + $0x88] sm:$0xff] }
 0x3df   :  { %4001 = vrot.lane.b32.xlu1 %v10180_v23, %s7709_s16  ;;  %4102 = vrot.lane.b32.xlu0 %v9697_v21, %s7707_s14  ;;  %v9729_v45 = vpack.c.b16 %v4072_v10, %v4071_v37  ;;  %v4608_v23 = vadd.f32 %v9428_v34, %v4607_v59  ;;  %v10188_v37 = vld [vmem:[#allocation14_spill] sm:$0xff]  ;;  %v10189_v10 = vld [vmem:[#allocation15_spill] sm:$0xff]  ;;  %v10190_v34 = vld [vmem:[#allocation16_spill] sm:$0xff] }
 0x3e0   :  { %4091 = vrot.lane.b32.xlu2 %v4088_v18, %s7708_s25  ;;  %v3651_v18 = vpack.c.bf16 %v3523_v36, %v3523_v36  ;;  %v3509_v30 = vmax.f32 %v10190_v34, 0.0  ;;  %v3638_v40 = vpack.c.bf16 %v3510_v15, %v3510_v15  ;;  %v4110_v57 = vunpack.c.l.b16 %v3653_v53 }
 0x3e2   :  { %v4099_v31 = vunpack.c.l.b16 %v3651_v18  ;;  %v4053_v60 = vunpack.c.l.b16 %v3638_v40 }
 0x3e7   :  { %4055 = vrot.lane.b32.xlu1 %v9071_v20, %s7709_s16  ;;  %4046 = vrot.lane.b32.xlu0 %v9120_v35, %s7707_s14 }
 0x3e8   :  { %4035 = vrot.lane.b32.xlu2 %v9071_v20, %s7708_s25  ;;  %v3524_v20 = vmax.f32 %v3392_v48, 0.0  ;;  %v3637_v48 = vpack.c.bf16 %v3509_v30, %v3509_v30 }
 0x3ea   :  { %v3652_v61 = vpack.c.bf16 %v3524_v20, %v3524_v20  ;;  %v4052_v20 = vunpack.c.l.b16 %v3637_v48 }
 0x3ec   :  { %v4100_v4 = vunpack.c.l.b16 %v3652_v61  ;;  %v4054_v44 = vpack.c.b16 %v4053_v60, %v4052_v20  ;;  %v7608_v61 = vld [vmem:[%s10123_s3 + $0x90] sm:$0xff] }
 0x3ed   :  { %4686 = vmatpush.bf16.msra.mxu2 %v7608_v61 }
 0x3ee   :  { %v4101_v38 = vpack.c.b16 %v4100_v4, %v4099_v31  ;;  %v7606_v31 = vld [vmem:[%s10123_s3 + $0x80] sm:$0xff] }
 0x3ef   :  { %4113 = vrot.lane.b32.xlu1 %v4089_v56, %s7709_s16  ;;  %4104 = vrot.lane.b32.xlu0 %v9729_v45, %s7707_s14 }
 0x3f0   :  { %4093 = vrot.lane.b32.xlu2 %v4089_v56, %s7708_s25  ;;  %v3397_v56 = vadd.f32 %v10192_v19, %v3068_v8 }
 0x3f1   :  { %4687 = vmatpush.bf16.msra.mxu2 %v7607_v26  ;;  %v9824_v26 = vld [vmem:[%s10124_s4] ss:$0 sm:$0xff] }
 0x3f2   :  { %v3526_v36 = vmax.f32 %v3397_v56, 0.0 }
 0x3f4   :  { %v3654_v52 = vpack.c.bf16 %v3526_v36, %v3526_v36 }
 0x3f5   :  { %4688 = vmatpush.bf16.msra.mxu2 %v7606_v31 }
 0x3f6   :  { %v4661_v46 = vpop.f32.mrf.mxu3  ;;  %v4111_v18 = vunpack.c.l.b16 %v3654_v52 }
 0x3f7   :  { %v9749_v42 = vadd.f32 %v4661_v46, %v4608_v23  ;;  %4057 = vrot.lane.b32.xlu1 %v10188_v37, %s7709_s16  ;;  %4048 = vrot.lane.b32.xlu0 %v10189_v10, %s7707_s14  ;;  %v7615_v23 = vld [vmem:[%s10123_s3 + $0xc8] sm:$0xff]  ;;  %v7614_v46 = vld [vmem:[%s10123_s3 + $0xc0] sm:$0xff] }
 0x3f8   :  { %4037 = vrot.lane.b32.xlu2 %v10188_v37, %s7708_s25  ;;  %v4112_v59 = vpack.c.b16 %v4111_v18, %v4110_v57  ;;  %4741 = vmatpush.bf16.msra.mxu3 %v7615_v23 }
 0x3f9   :  { %v3932_v49 = vpop.permute.xlu2 %3931 }
 0x3fa   :  { %v4213_v4 = vsel %vm4119_vm1, %v9593_v47, %v3932_v49 }
 0x3fc   :  { %4742 = vmatpush.bf16.msra.mxu3 %v7614_v46 }
 0x3ff   :  { %4115 = vrot.lane.b32.xlu1 %v4090_v6, %s7709_s16  ;;  %4106 = vrot.lane.b32.xlu0 %v4101_v38, %s7707_s14 }
 0x400   :  { %4095 = vrot.lane.b32.xlu2 %v4090_v6, %s7708_s25 }
 0x401   :  { %v3760_v17 = vpop.permute.xlu2 %3759 }
 0x402   :  { %v4143_v10 = vsel %vm4119_vm1, %v9530_v54, %v3760_v17 }
 0x407   :  { %4059 = vrot.lane.b32.xlu1 %v4054_v44, %s7709_s16  ;;  %v10193_v44 = vld [vmem:[#allocation6_spill] sm:$0xff] }
 0x40f   :  { %4117 = vrot.lane.b32.xlu1 %v4112_v59, %s7709_s16 }
 0x41a   :  { %v3934_v34 = vpop.permute.xlu2 %3933 }
 0x41b   :  { %v4216_v47 = vsel %vm4119_vm1, %v9604_v11, %v3934_v34 }
 0x421   :  { %v3965_v9 = vpop.permute.xlu0 %3964 }
 0x422   :  { %v4233_v22 = vsel %vm2096_vm0, %v4213_v4, %v3965_v9  ;;  %v3762_v56 = vpop.permute.xlu2 %3761 }
 0x423   :  { %v4146_v54 = vsel %vm4119_vm1, %v9556_v41, %v3762_v56  ;;  %v10194_v41 = vld [vmem:[#allocation3_spill] sm:$0xff] }
 0x424   :  { %v3033_v57 = vadd.f32 %v9672_v14, %v10194_v41 }
 0x429   :  { %v3793_v16 = vpop.permute.xlu0 %3792 }
 0x42a   :  { %v4162_v30 = vsel %vm2096_vm0, %v4143_v10, %v3793_v16  ;;  %v3936_v36 = vpop.permute.xlu2 %3935 }
 0x42b   :  { %v4219_v11 = vsel %vm4119_vm1, %v8836_v33, %v3936_v36  ;;  %v9813_v33 = vpop.f32.mrf.mxu2 }
 0x431   :  { %v3998_v8 = vpop.permute.xlu1 %3997  ;;  %v3967_v6 = vpop.permute.xlu0 %3966 }
 0x432   :  { %v4257_v37 = vsel %vm4165_vm2, %v4233_v22, %v3998_v8  ;;  %v4235_v3 = vsel %vm2096_vm0, %v4216_v47, %v3967_v6  ;;  %v4034_v18 = vpop.permute.xlu2 %4033  ;;  %v10197_v22 = vld [vmem:[#allocation13_spill] sm:$0xff] }
 0x433   :  { %4665 = vmatmul.bf16.gmra.mxu3 %v4257_v37  ;;  %v4267_v8 = vsel %vm4119_vm1, %v10197_v22, %v4034_v18 }
 0x439   :  { %v3826_v15 = vpop.permute.xlu1 %3825  ;;  %v3795_v5 = vpop.permute.xlu0 %3794 }
 0x43a   :  { %v4188_v38 = vsel %vm4165_vm2, %v4162_v30, %v3826_v15  ;;  %v4164_v48 = vsel %vm2096_vm0, %v4146_v54, %v3795_v5  ;;  %v4092_v23 = vpop.permute.xlu2 %4091 }
 0x43b   :  { %4616 = vmatmul.bf16.gmra.mxu2 %v4188_v38 }
 0x441   :  { %v4000_v24 = vpop.permute.xlu1 %3999  ;;  %v3969_v20 = vpop.permute.xlu0 %3968 }
 0x442   :  { %v4260_v19 = vsel %vm4165_vm2, %v4235_v3, %v4000_v24  ;;  %v4237_v60 = vsel %vm2096_vm0, %v4219_v11, %v3969_v20  ;;  %v4036_v47 = vpop.permute.xlu2 %4035 }
 0x443   :  { %4670 = vmatmul.bf16.gmra.mxu3 %v4260_v19  ;;  %v4270_v36 = vsel %vm4119_vm1, %v9033_v13, %v4036_v47 }
 0x449   :  { %v3828_v40 = vpop.permute.xlu1 %3827 }
 0x44a   :  { %v4191_v62 = vsel %vm4165_vm2, %v4164_v48, %v3828_v40  ;;  %v4094_v20 = vpop.permute.xlu2 %4093 }
 0x44b   :  { %4621 = vmatmul.bf16.gmra.mxu2 %v4191_v62 }
 0x451   :  { %v4002_v53 = vpop.permute.xlu1 %4001 }
 0x452   :  { %v4263_v52 = vsel %vm4165_vm2, %v4237_v60, %v4002_v53 }
 0x453   :  { %4675 = vmatmul.bf16.gmra.mxu3 %v4263_v52 }
 0x459   :  { %v4056_v59 = vpop.permute.xlu1 %4055 }
 0x45b   :  { %4689 = vmatmul.bf16.vlgmr.msra.gmra.mxu2 %v10193_v44 }
 0x461   :  { %v4114_v16 = vpop.permute.xlu1 %4113 }
 0x463   :  { %4743 = vmatmul.bf16.vlgmr.msra.gmra.mxu3 %v9538_v0  ;;  %v4045_v0 = vpop.permute.xlu0 %4044 }
 0x469   :  { %v4058_v56 = vpop.permute.xlu1 %4057 }
 0x46b   :  { %4694 = vmatmul.bf16.gmra.mxu2 %v9547_v51  ;;  %v4612_v51 = vpop.f32.mrf.mxu2  ;;  %v4103_v9 = vpop.permute.xlu0 %4102 }
 0x46c   :  { %v4613_v14 = vadd.f32 %v9824_v26, %v4612_v51  ;;  %v4038_v51 = vpop.permute.xlu2 %4037 }
 0x473   :  { %4748 = vmatmul.bf16.gmra.mxu3 %v9562_v63  ;;  %v10195_v63 = vld [vmem:[#allocation19_spill] sm:$0xff]  ;;  %v9827_v46 = vpop.f32.mrf.mxu2  ;;  %v4047_v3 = vpop.permute.xlu0 %4046 }
 0x474   :  { %v3362_v61 = vadd.f32 %v10195_v63, %v3033_v57  ;;  %v4277_v11 = vsel %vm2096_vm0, %v4270_v36, %v4047_v3  ;;  %v4294_v57 = vsel %vm4119_vm1, %v9697_v21, %v4094_v20  ;;  %v10198_v3 = vld [vmem:[#allocation23_spill] sm:$0xff] }
 0x475   :  { %v4284_v53 = vsel %vm4165_vm2, %v4277_v11, %v4058_v56  ;;  %v10200_v11 = vld [vmem:[#allocation25_spill] sm:$0xff] }
 0x47b   :  { %4699 = vmatmul.bf16.gmra.mxu2 %v9571_v50  ;;  %v9818_v50 = vpop.f32.mrf.mxu3  ;;  %v4105_v60 = vpop.permute.xlu0 %4104 }
 0x47c   :  { %v4301_v18 = vsel %vm2096_vm0, %v4294_v57, %v4105_v60 }
 0x483   :  { %4753 = vmatmul.bf16.gmra.mxu3 %v9584_v2  ;;  %v10196_v2 = vld [vmem:[#allocation2_spill] sm:$0xff]  ;;  %v4049_v13 = vpop.permute.xlu0 %4048 }
 0x484   :  { %v3511_v25 = vmax.f32 %v10196_v2, 0.0 }
 0x486   :  { %v3639_v49 = vpack.c.bf16 %v3511_v25, %v3511_v25 }
 0x488   :  { %v4067_v10 = vunpack.c.l.b16 %v3639_v49 }
 0x48b   :  { %4704 = vmatmul.bf16.gmra.mxu2 %v9620_v58  ;;  %v3512_v58 = vmax.f32 %v3362_v61, 0.0 }
 0x48d   :  { %v3640_v31 = vpack.c.bf16 %v3512_v58, %v3512_v58  ;;  %v4273_v58 = vsel %vm4119_vm1, %v9120_v35, %v4038_v51 }
 0x48e   :  { %v4279_v21 = vsel %vm2096_vm0, %v4273_v58, %v4049_v13 }
 0x48f   :  { %v4068_v34 = vunpack.c.l.b16 %v3640_v31 }
 0x491   :  { %v4073_v15 = vpack.c.b16 %v4068_v34, %v4067_v10 }
 0x493   :  { %4758 = vmatmul.bf16.gmra.mxu3 %v4257_v37  ;;  %v4275_v37 = vsel %vm2096_vm0, %v4267_v8, %v4045_v0  ;;  %v4291_v24 = vsel %vm4119_vm1, %v4073_v15, %v4092_v23  ;;  %v4096_v23 = vpop.permute.xlu2 %4095 }
 0x494   :  { %v4281_v30 = vsel %vm4165_vm2, %v4275_v37, %v4056_v59  ;;  %v4297_v22 = vsel %vm4119_vm1, %v9729_v45, %v4096_v23 }
 0x49b   :  { %4709 = vmatmul.bf16.gmra.mxu2 %v4188_v38 }
 0x4a3   :  { %4763 = vmatmul.bf16.gmra.mxu3 %v4260_v19  ;;  %v4299_v19 = vsel %vm2096_vm0, %v4291_v24, %v4103_v9  ;;  %v4107_v9 = vpop.permute.xlu0 %4106 }
 0x4a4   :  { %v4305_v5 = vsel %vm4165_vm2, %v4299_v19, %v4114_v16  ;;  %v4303_v8 = vsel %vm2096_vm0, %v4297_v22, %v4107_v9  ;;  %v10199_v19 = vld [vmem:[#allocation24_spill] sm:$0xff] }
 0x4ab   :  { %4714 = vmatmul.bf16.gmra.mxu2 %v4191_v62 }
 0x4b3   :  { %4768 = vmatmul.bf16.gmra.mxu3 %v4263_v52  ;;  %v4116_v52 = vpop.permute.xlu1 %4115 }
 0x4b4   :  { %v4308_v0 = vsel %vm4165_vm2, %v4301_v18, %v4116_v52 }
 0x4b6   :  { %v4666_v4 = vpop.f32.mrf.mxu3 }
 0x4b7   :  { %v9829_v17 = vadd.f32 %v4666_v4, %v4613_v14 }
 0x4bb   :  { %4719 = vmatmul.bf16.gmra.mxu2 %v4281_v30  ;;  %v4060_v59 = vpop.permute.xlu1 %4059 }
 0x4bc   :  { %v4287_v14 = vsel %vm4165_vm2, %v4279_v21, %v4060_v59 }
 0x4be   :  { %v4617_v6 = vpop.f32.mrf.mxu2  ;;  %v9835_v38 = vpop.f32.mrf.mxu3 }
 0x4bf   :  { %v4618_v54 = vadd.f32 %v9824_v26, %v4617_v6 }
 0x4c3   :  { %4773 = vmatmul.bf16.gmra.mxu3 %v4305_v5  ;;  %v4118_v4 = vpop.permute.xlu1 %4117 }
 0x4c4   :  { %v4311_v35 = vsel %vm4165_vm2, %v4303_v8, %v4118_v4 }
 0x4c6   :  { %v9841_v48 = vpop.f32.mrf.mxu2  ;;  %v4671_v40 = vpop.f32.mrf.mxu3 }
 0x4c7   :  { %v9843_v62 = vadd.f32 %v4671_v40, %v4618_v54  ;;  %v7629_v40 = vld [vmem:[%s10125_s5 + $0x38] sm:$0xff] }
 0x4c8   :  { %5189 = vmatpush.bf16.msrb.mxu2 %v7629_v40 }
 0x4cb   :  { %4724 = vmatmul.bf16.gmra.mxu2 %v4284_v53 }
 0x4ce   :  { %v4622_v44 = vpop.f32.mrf.mxu2  ;;  %v9849_v41 = vpop.f32.mrf.mxu3 }
 0x4cf   :  { %v4623_v63 = vadd.f32 %v9824_v26, %v4622_v44 }
 0x4d3   :  { %4778 = vmatmul.bf16.gmra.mxu3 %v4308_v0 }
 0x4d6   :  { %v9856_v61 = vpop.f32.mrf.mxu2  ;;  %v4676_v2 = vpop.f32.mrf.mxu3 }
 0x4d7   :  { %v9858_v25 = vadd.f32 %v4676_v2, %v4623_v63  ;;  %v4595_v63 = vadd.f32 %v9824_v26, %v9601_v43 }
 0x4d9   :  { %v4649_v2 = vadd.f32 %v9606_v32, %v4595_v63 }
 0x4db   :  { %4729 = vmatmul.bf16.gmra.mxu2 %v4287_v14  ;;  %v7637_v14 = vld [vmem:[%s10125_s5 + $0x78] sm:$0xff] }
 0x4dc   :  { %5203 = vmatpush.bf16.msrb.mxu3 %v7637_v14 }
 0x4de   :  { %v9864_v49 = vpop.f32.mrf.mxu3  ;;  %v4690_v31 = vpop.f32.mrf.mxu2 }
 0x4df   :  { %v4691_v16 = vadd.f32 %v4690_v31, %v9437_v55  ;;  %v4590_v55 = vadd.f32 %v9824_v26, %v9467_v1 }
 0x4e1   :  { %v4644_v56 = vadd.f32 %v10199_v19, %v4590_v55  ;;  %v7636_v19 = vld [vmem:[%s10125_s5 + $0x70] sm:$0xff] }
 0x4e2   :  { %5204 = vmatpush.bf16.msrb.mxu3 %v7636_v19 }
 0x4e3   :  { %4783 = vmatmul.bf16.gmra.mxu3 %v4311_v35 }
 0x4e6   :  { %v9871_v37 = vpop.f32.mrf.mxu2  ;;  %v4744_v10 = vpop.f32.mrf.mxu3 }
 0x4e7   :  { %v9873_v34 = vadd.f32 %v4744_v10, %v4691_v16 }
 0x4ee   :  { %v4695_v30 = vpop.f32.mrf.mxu2  ;;  %v9875_v15 = vpop.f32.mrf.mxu3 }
 0x4ef   :  { %v4696_v45 = vadd.f32 %v4695_v30, %v10198_v3 }
 0x4f6   :  { %v4697_v6 = vpop.f32.mrf.mxu2  ;;  %v4749_v47 = vpop.f32.mrf.mxu3 }
 0x4f7   :  { %v4750_v24 = vadd.f32 %v4749_v47, %v4696_v45  ;;  %v4698_v5 = vadd.f32 %v4697_v6, %v4644_v56  ;;  %v7628_v6 = vld [vmem:[%s10125_s5 + $0x30] sm:$0xff]  ;;  %v4600_v47 = vadd.f32 %v9824_v26, %v9651_v27 }
 0x4f8   :  { %5190 = vmatpush.bf16.msrb.mxu2 %v7628_v6  ;;  %v7623_v6 = vld [vmem:[%s10125_s5 + $0x8] sm:$0xff] }
 0x4f9   :  { %v4791_v54 = vmax.f32 %v4750_v24, 0.0  ;;  %v4654_v3 = vadd.f32 %v9656_v7, %v4600_v47 }
 0x4fb   :  { %v4809_v52 = vpack.c.bf16 %v4791_v54, %v4791_v54 }
 0x4fd   :  { %v4832_v57 = vunpack.c.l.b16 %v4809_v52 }
 0x4fe   :  { %v4700_v36 = vpop.f32.mrf.mxu2  ;;  %v4751_v20 = vpop.f32.mrf.mxu3 }
 0x4ff   :  { %v4701_v60 = vadd.f32 %v4700_v36, %v10200_v11  ;;  %v4752_v53 = vadd.f32 %v4751_v20, %v4698_v5 }
 0x501   :  { %v4792_v44 = vmax.f32 %v4752_v53, 0.0 }
 0x503   :  { %v4810_v1 = vpack.c.bf16 %v4792_v44, %v4792_v44  ;;  %v7627_v44 = vld [vmem:[%s10125_s5 + $0x28] sm:$0xff] }
 0x504   :  { %5191 = vmatpush.bf16.msrb.mxu2 %v7627_v44 }
 0x505   :  { %v4833_v18 = vunpack.c.l.b16 %v4810_v1  ;;  %v4605_v1 = vadd.f32 %v9824_v26, %v9727_v12 }
 0x506   :  { %v4702_v0 = vpop.f32.mrf.mxu2  ;;  %v4754_v51 = vpop.f32.mrf.mxu3 }
 0x507   :  { %v4834_v13 = vpack.c.b16 %v4833_v18, %v4832_v57  ;;  %v4755_v59 = vadd.f32 %v4754_v51, %v4701_v60  ;;  %v4703_v58 = vadd.f32 %v4702_v0, %v4649_v2  ;;  %v7626_v2 = vld [vmem:[%s10125_s5 + $0x20] sm:$0xff] }
 0x508   :  { %5192 = vmatpush.bf16.msrb.mxu2 %v7626_v2 }
 0x509   :  { %4835 = vrot.lane.b32.xlu2 %v4834_v13, %s7707_s14  ;;  %v4793_v21 = vmax.f32 %v4755_v59, 0.0 }
 0x50b   :  { %v4811_v4 = vpack.c.bf16 %v4793_v21, %v4793_v21 }
 0x50d   :  { %v4839_v8 = vunpack.c.l.b16 %v4811_v4  ;;  %v7635_v4 = vld [vmem:[%s10125_s5 + $0x68] sm:$0xff] }
 0x50e   :  { %v4705_v23 = vpop.f32.mrf.mxu2  ;;  %v4756_v9 = vpop.f32.mrf.mxu3  ;;  %5205 = vmatpush.bf16.msrb.mxu3 %v7635_v4 }
 0x50f   :  { %v4757_v31 = vadd.f32 %v4756_v9, %v4703_v58  ;;  %v4706_v30 = vadd.f32 %v4705_v23, %v9625_v29 }
 0x511   :  { %v4794_v16 = vmax.f32 %v4757_v31, 0.0 }
 0x513   :  { %v4812_v22 = vpack.c.bf16 %v4794_v16, %v4794_v16  ;;  %v4610_v16 = vadd.f32 %v9824_v26, %v9813_v33 }
 0x515   :  { %v4840_v35 = vunpack.c.l.b16 %v4812_v22 }
 0x516   :  { %v4707_v43 = vpop.f32.mrf.mxu2  ;;  %v4759_v10 = vpop.f32.mrf.mxu3 }
 0x517   :  { %v9893_v32 = vpack.c.b16 %v4840_v35, %v4839_v8  ;;  %v4760_v55 = vadd.f32 %v4759_v10, %v4706_v30  ;;  %v4708_v45 = vadd.f32 %v4707_v43, %v4654_v3  ;;  %v7624_v8 = vld [vmem:[%s10125_s5 + $0x10] sm:$0xff]  ;;  %v4664_v35 = vadd.f32 %v9818_v50, %v4610_v16 }
 0x519   :  { %v4795_v24 = vmax.f32 %v4760_v55, 0.0 }
 0x51b   :  { %v4813_v40 = vpack.c.bf16 %v4795_v24, %v4795_v24 }
 0x51d   :  { %v4844_v27 = vunpack.c.l.b16 %v4813_v40  ;;  %v4615_v40 = vadd.f32 %v9824_v26, %v9827_v46 }
 0x51e   :  { %v4710_v29 = vpop.f32.mrf.mxu2  ;;  %v4761_v56 = vpop.f32.mrf.mxu3 }
 0x51f   :  { %v4711_v5 = vadd.f32 %v4710_v29, %v9682_v28  ;;  %v4762_v54 = vadd.f32 %v4761_v56, %v4708_v45  ;;  %v4659_v28 = vadd.f32 %v9732_v39, %v4605_v1  ;;  %v7625_v39 = vld [vmem:[%s10125_s5 + $0x18] sm:$0xff]  ;;  %v7622_v45 = vld [vmem:[%s10125_s5] sm:$0xff] }
 0x520   :  { %5193 = vmatpush.bf16.msrb.mxu2 %v7625_v39 }
 0x521   :  { %v4796_v36 = vmax.f32 %v4762_v54, 0.0 }
 0x523   :  { %v4814_v20 = vpack.c.bf16 %v4796_v36, %v4796_v36  ;;  %v10201_v36 = vld [vmem:[#allocation10_spill] sm:$0xff] }
 0x524   :  { %5194 = vmatpush.bf16.msrb.mxu2 %v7624_v8 }
 0x525   :  { %v4845_v11 = vunpack.c.l.b16 %v4814_v20  ;;  %v4585_v20 = vadd.f32 %v9824_v26, %v10201_v36  ;;  %v7648_v36 = vld [vmem:[%s10125_s5 + $0xd0] sm:$0xff] }
 0x526   :  { %v4712_v60 = vpop.f32.mrf.mxu2  ;;  %v4764_v53 = vpop.f32.mrf.mxu3 }
 0x527   :  { %v4846_v7 = vpack.c.b16 %v4845_v11, %v4844_v27  ;;  %v4765_v52 = vadd.f32 %v4764_v53, %v4711_v5  ;;  %v4713_v57 = vadd.f32 %v4712_v60, %v4659_v28  ;;  %v4669_v27 = vadd.f32 %v9835_v38, %v4615_v40  ;;  %v10202_v53 = vld [vmem:[#allocation22_spill] sm:$0xff]  ;;  %v7640_v40 = vld [vmem:[%s10125_s5 + $0x90] sm:$0xff] }
 0x528   :  { %5195 = vmatpush.bf16.msrb.mxu2 %v7623_v6 }
 0x529   :  { %4847 = vrot.lane.b32.xlu0 %v4846_v7, %s7707_s14  ;;  %v4797_v18 = vmax.f32 %v4765_v52, 0.0  ;;  %v4639_v7 = vadd.f32 %v10202_v53, %v4585_v20  ;;  %v7639_v20 = vld [vmem:[%s10125_s5 + $0x88] sm:$0xff]  ;;  %v7657_v53 = vld [vmem:[%s10125_s5 + $0x118] sm:$0xff] }
 0x52b   :  { %v4815_v59 = vpack.c.bf16 %v4797_v18, %v4797_v18  ;;  %v4693_v1 = vadd.f32 %v9871_v37, %v4639_v7  ;;  %v4789_v37 = vmax.f32 %v9873_v34, 0.0  ;;  %v7631_v34 = vld [vmem:[%s10125_s5 + $0x48] sm:$0xff] }
 0x52c   :  { %5196 = vmatpush.bf16.msrb.mxu2 %v7622_v45  ;;  %v7653_v45 = vld [vmem:[%s10125_s5 + $0xf8] sm:$0xff]  ;;  %v7647_v7 = vld [vmem:[%s10125_s5 + $0xc8] sm:$0xff] }
 0x52d   :  { %v4851_v21 = vunpack.c.l.b16 %v4815_v59  ;;  %v4747_v46 = vadd.f32 %v9875_v15, %v4693_v1  ;;  %v7632_v15 = vld [vmem:[%s10125_s5 + $0x50] sm:$0xff]  ;;  %v4807_v39 = vpack.c.bf16 %v4789_v37, %v4789_v37  ;;  %v7654_v1 = vld [vmem:[%s10125_s5 + $0x100] sm:$0xff] }
 0x52e   :  { %v4715_v0 = vpop.f32.mrf.mxu2  ;;  %v4766_v51 = vpop.f32.mrf.mxu3 }
 0x52f   :  { %v4767_v13 = vadd.f32 %v4766_v51, %v4713_v57  ;;  %v4716_v9 = vadd.f32 %v4715_v0, %v9749_v42  ;;  %v4790_v59 = vmax.f32 %v4747_v46, 0.0  ;;  %v4827_v8 = vunpack.c.l.b16 %v4807_v39  ;;  %v7660_v39 = vld [vmem:[%s10128_s7 + $0x10] sm:$0xff] }
 0x531   :  { %v4798_v63 = vmax.f32 %v4767_v13, 0.0 }
 0x533   :  { %v4816_v58 = vpack.c.bf16 %v4798_v63, %v4798_v63 }
 0x535   :  { %v4852_v12 = vunpack.c.l.b16 %v4816_v58  ;;  %v7633_v58 = vld [vmem:[%s10125_s5 + $0x58] sm:$0xff] }
 0x536   :  { %v4717_v14 = vpop.f32.mrf.mxu2  ;;  %v4769_v23 = vpop.f32.mrf.mxu3 }
 0x537   :  { %v9919_v31 = vpack.c.b16 %v4852_v12, %v4851_v21  ;;  %v4770_v22 = vadd.f32 %v4769_v23, %v4716_v9  ;;  %v4718_v42 = vadd.f32 %v4717_v14, %v4664_v35  ;;  %v4620_v21 = vadd.f32 %v9824_v26, %v9841_v48 }
 0x538   :  { %v4808_v14 = vpack.c.bf16 %v4790_v59, %v4790_v59 }
 0x539   :  { %v4799_v43 = vmax.f32 %v4770_v22, 0.0 }
 0x53a   :  { %v4828_v16 = vunpack.c.l.b16 %v4808_v14 }
 0x53b   :  { %v4817_v55 = vpack.c.bf16 %v4799_v43, %v4799_v43  ;;  %v7630_v43 = vld [vmem:[%s10125_s5 + $0x40] sm:$0xff] }
 0x53d   :  { %v4856_v24 = vunpack.c.l.b16 %v4817_v55 }
 0x53e   :  { %v4720_v10 = vpop.f32.mrf.mxu2  ;;  %v4771_v30 = vpop.f32.mrf.mxu3 }
 0x53f   :  { %v4721_v47 = vadd.f32 %v4720_v10, %v9829_v17  ;;  %v4772_v33 = vadd.f32 %v4771_v30, %v4718_v42  ;;  %v7634_v17 = vld [vmem:[%s10125_s5 + $0x60] sm:$0xff] }
 0x540   :  { %5206 = vmatpush.bf16.msrb.mxu3 %v7634_v17  ;;  %v7649_v17 = vld [vmem:[%s10125_s5 + $0xd8] sm:$0xff] }
 0x541   :  { %v4800_v3 = vmax.f32 %v4772_v33, 0.0 }
 0x543   :  { %v4818_v50 = vpack.c.bf16 %v4800_v3, %v4800_v3  ;;  %v7645_v3 = vld [vmem:[%s10125_s5 + $0xb8] sm:$0xff] }
 0x544   :  { %5207 = vmatpush.bf16.msrb.mxu3 %v7633_v58  ;;  %5217 = vmatpush.bf16.msra.mxu2 %v7645_v3 }
 0x545   :  { %v4857_v19 = vunpack.c.l.b16 %v4818_v50  ;;  %v7644_v50 = vld [vmem:[%s10125_s5 + $0xb0] sm:$0xff] }
 0x546   :  { %v4722_v29 = vpop.f32.mrf.mxu2  ;;  %v4774_v56 = vpop.f32.mrf.mxu3 }
 0x547   :  { %v4858_v5 = vpack.c.b16 %v4857_v19, %v4856_v24  ;;  %v4775_v54 = vadd.f32 %v4774_v56, %v4721_v47  ;;  %v4723_v11 = vadd.f32 %v4722_v29, %v4669_v27  ;;  %v7652_v24 = vld [vmem:[%s10125_s5 + $0xf0] sm:$0xff]  ;;  %v7643_v19 = vld [vmem:[%s10125_s5 + $0xa8] sm:$0xff]  ;;  %v7642_v56 = vld [vmem:[%s10125_s5 + $0xa0] sm:$0xff] }
 0x548   :  { %5208 = vmatpush.bf16.msrb.mxu3 %v7632_v15  ;;  %5218 = vmatpush.bf16.msra.mxu2 %v7644_v50  ;;  %v7651_v29 = vld [vmem:[%s10125_s5 + $0xe8] sm:$0xff]  ;;  %v7638_v27 = vld [vmem:[%s10125_s5 + $0x80] sm:$0xff] }
 0x549   :  { %4859 = vrot.lane.b32.xlu1 %v4858_v5, %s7707_s14  ;;  %v4801_v60 = vmax.f32 %v4775_v54, 0.0  ;;  %v7650_v5 = vld [vmem:[%s10125_s5 + $0xe0] sm:$0xff]  ;;  %v7641_v54 = vld [vmem:[%s10125_s5 + $0x98] sm:$0xff] }
 0x54b   :  { %v4819_v57 = vpack.c.bf16 %v4801_v60, %v4801_v60 }
 0x54c   :  { %5209 = vmatpush.bf16.msrb.mxu3 %v7631_v34  ;;  %5219 = vmatpush.bf16.msra.mxu2 %v7643_v19  ;;  %v7658_v34 = vld [vmem:[%s10128_s7] sm:$0xff] }
 0x54d   :  { %v4863_v51 = vunpack.c.l.b16 %v4819_v57 }
 0x54e   :  { %v4776_v52 = vpop.f32.mrf.mxu3  ;;  %v4725_v28 = vpop.f32.mrf.mxu2 }
 0x54f   :  { %v4777_v44 = vadd.f32 %v4776_v52, %v4723_v11  ;;  %v4726_v38 = vadd.f32 %v4725_v28, %v9843_v62  ;;  %v4674_v62 = vadd.f32 %v9849_v41, %v4620_v21  ;;  %v4829_v41 = vpack.c.b16 %v4828_v16, %v4827_v8  ;;  %v7656_v52 = vld [vmem:[%s10125_s5 + $0x110] sm:$0xff]  ;;  %v7669_v16 = vld [vmem:[%s10129_s9 + $0x38] sm:$0xff] }
 0x550   :  { %5210 = vmatpush.bf16.msrb.mxu3 %v7630_v43  ;;  %5220 = vmatpush.bf16.msra.mxu2 %v7642_v56  ;;  %v7666_v43 = vld [vmem:[%s10129_s9 + $0x20] sm:$0xff] }
 0x551   :  { %v4802_v18 = vmax.f32 %v4777_v44, 0.0  ;;  %v7646_v44 = vld [vmem:[%s10125_s5 + $0xc0] sm:$0xff] }
 0x553   :  { %v4820_v0 = vpack.c.bf16 %v4802_v18, %v4802_v18  ;;  %v4625_v18 = vadd.f32 %v9824_v26, %v9856_v61 }
 0x554   :  { %5231 = vmatpush.bf16.msra.mxu3 %v7653_v45  ;;  %5221 = vmatpush.bf16.msra.mxu2 %v7641_v54 }
 0x555   :  { %v4864_v13 = vunpack.c.l.b16 %v4820_v0  ;;  %v4679_v0 = vadd.f32 %v9864_v49, %v4625_v18 }
 0x556   :  { %v4779_v63 = vpop.f32.mrf.mxu3  ;;  %v4727_v23 = vpop.f32.mrf.mxu2 }
 0x557   :  { %v9950_v2 = vpack.c.b16 %v4864_v13, %v4863_v51  ;;  %v4780_v12 = vadd.f32 %v4779_v63, %v4726_v38  ;;  %v4728_v9 = vadd.f32 %v4727_v23, %v4674_v62 }
 0x558   :  { %5232 = vmatpush.bf16.msra.mxu3 %v7652_v24  ;;  %5222 = vmatpush.bf16.msra.mxu2 %v7640_v40 }
 0x559   :  { %v4803_v4 = vmax.f32 %v4780_v12, 0.0 }
 0x55b   :  { %v4821_v35 = vpack.c.bf16 %v4803_v4, %v4803_v4 }
 0x55c   :  { %5233 = vmatpush.bf16.msra.mxu3 %v7651_v29  ;;  %5223 = vmatpush.bf16.msra.mxu2 %v7639_v20  ;;  %v7664_v20 = vld [vmem:[%s10129_s9 + $0x10] sm:$0xff] }
 0x55d   :  { %v4868_v47 = vunpack.c.l.b16 %v4821_v35  ;;  %v7667_v35 = vld [vmem:[%s10129_s9 + $0x28] sm:$0xff] }
 0x55e   :  { %v4781_v48 = vpop.f32.mrf.mxu3  ;;  %v4730_v28 = vpop.f32.mrf.mxu2 }
 0x55f   :  { %v4782_v22 = vadd.f32 %v4781_v48, %v4728_v9  ;;  %v4731_v59 = vadd.f32 %v4730_v28, %v9858_v25  ;;  %v7661_v25 = vld [vmem:[%s10128_s7 + $0x18] sm:$0xff] }
 0x560   :  { %5234 = vmatpush.bf16.msra.mxu3 %v7650_v5  ;;  %5224 = vmatpush.bf16.msra.mxu2 %v7638_v27  ;;  %v7663_v27 = vld [vmem:[%s10129_s9 + $0x8] sm:$0xff] }
 0x561   :  { %v4804_v42 = vmax.f32 %v4782_v22, 0.0  ;;  %v7668_v22 = vld [vmem:[%s10129_s9 + $0x30] sm:$0xff] }
 0x563   :  { %v4822_v10 = vpack.c.bf16 %v4804_v42, %v4804_v42  ;;  %v4836_v30 = vpop.permute.xlu2 %4835 }
 0x564   :  { %v4880_v6 = vsel %vm2096_vm0, %v4829_v41, %v4836_v30  ;;  %5235 = vmatpush.bf16.msra.mxu3 %v7649_v17 }
 0x565   :  { %v4869_v33 = vunpack.c.l.b16 %v4822_v10  ;;  %5197 = vmatmul.bf16.vlgmr.msrb.gmra.mxu2 %v4880_v6  ;;  %v7699_v10 = vld [vmem:[%s10126_s6] ss:$0 sm:$0xff] }
 0x566   :  { %5249 = vmatpush.bf16.msrb.mxu2 %v7657_v53  ;;  %v4784_v57 = vpop.f32.mrf.mxu3  ;;  %v4732_v46 = vpop.f32.mrf.mxu2  ;;  %v7676_v53 = vld [vmem:[%s10131_s11 + $0x30] sm:$0xff] }
 0x567   :  { %v4870_v55 = vpack.c.b16 %v4869_v33, %v4868_v47  ;;  %v4733_v13 = vadd.f32 %v4732_v46, %v4679_v0  ;;  %v4785_v37 = vadd.f32 %v4784_v57, %v4731_v59  ;;  %v7671_v59 = vld [vmem:[%s10131_s11 + $0x8] sm:$0xff] }
 0x568   :  { %5236 = vmatpush.bf16.msra.mxu3 %v7648_v36  ;;  %v7665_v36 = vld [vmem:[%s10129_s9 + $0x18] sm:$0xff] }
 0x569   :  { %4871 = vrot.lane.b32.xlu2 %v4870_v55, %s7707_s14  ;;  %v4805_v12 = vmax.f32 %v4785_v37, 0.0 }
 0x56a   :  { %5250 = vmatpush.bf16.msrb.mxu2 %v7656_v52  ;;  %v7674_v52 = vld [vmem:[%s10131_s11 + $0x20] sm:$0xff] }
 0x56b   :  { %v4823_v61 = vpack.c.bf16 %v4805_v12, %v4805_v12 }
 0x56c   :  { %5237 = vmatpush.bf16.msra.mxu3 %v7647_v7  ;;  %v7675_v7 = vld [vmem:[%s10131_s11 + $0x28] sm:$0xff] }
 0x56d   :  { %v4875_v23 = vunpack.c.l.b16 %v4823_v61  ;;  %v7702_v61 = vld [vmem:[%s10132_s12] ss:$0 sm:$0xff] }
 0x56e   :  { %v4786_v51 = vpop.f32.mrf.mxu3 }
 0x56f   :  { %v4787_v63 = vadd.f32 %v4786_v51, %v4733_v13  ;;  %v7673_v51 = vld [vmem:[%s10131_s11 + $0x18] sm:$0xff]  ;;  %v7672_v13 = vld [vmem:[%s10131_s11 + $0x10] sm:$0xff] }
 0x570   :  { %5238 = vmatpush.bf16.msra.mxu3 %v7646_v44 }
 0x571   :  { %v4806_v21 = vmax.f32 %v4787_v63, 0.0  ;;  %v7670_v63 = vld [vmem:[%s10131_s11] sm:$0xff] }
 0x573   :  { %v4824_v15 = vpack.c.bf16 %v4806_v21, %v4806_v21 }
 0x575   :  { %v4876_v49 = vunpack.c.l.b16 %v4824_v15 }
 0x577   :  { %v4877_v62 = vpack.c.b16 %v4876_v49, %v4875_v23 }
 0x59b   :  { %v4848_v11 = vpop.permute.xlu0 %4847 }
 0x59c   :  { %v4884_v60 = vsel %vm2096_vm0, %v9893_v32, %v4848_v11  ;;  %v7655_v32 = vld [vmem:[%s10125_s5 + $0x108] sm:$0xff]  ;;  %v7662_v11 = vld [vmem:[%s10129_s9] sm:$0xff] }
 0x59d   :  { %5211 = vmatmul.bf16.vlgmr.msrb.gmra.mxu3 %v4884_v60  ;;  %5251 = vmatpush.bf16.msrb.mxu2 %v7655_v32  ;;  %v7677_v60 = vld [vmem:[%s10131_s11 + $0x38] sm:$0xff]  ;;  %v7700_v32 = vld [vmem:[%s10127_s8] ss:$0 sm:$0xff] }
 0x59e   :  { %5305 = vmatpush.bf16.msrb.mxu3 %v7661_v25 }
 0x5a1   :  { %5252 = vmatpush.bf16.msrb.mxu2 %v7654_v1 }
 0x5a2   :  { %5306 = vmatpush.bf16.msrb.mxu3 %v7660_v39 }
 0x5bb   :  { %v4860_v38 = vpop.permute.xlu1 %4859 }
 0x5bc   :  { %v4888_v58 = vsel %vm2096_vm0, %v9919_v31, %v4860_v38 }
 0x5bd   :  { %5225 = vmatmul.bf16.vlgmr.msra.gmra.mxu2 %v4888_v58  ;;  %v7701_v58 = vld [vmem:[%s10130_s10] ss:$0 sm:$0xff] }
 0x5be   :  { %5386 = vmatpush.bf16.msra.mxu2 %v7669_v16 }
 0x5c2   :  { %5387 = vmatpush.bf16.msra.mxu2 %v7668_v22 }
 0x5c3   :  { %v4872_v14 = vpop.permute.xlu2 %4871 }
 0x5c4   :  { %v4892_v26 = vsel %vm2096_vm0, %v9950_v2, %v4872_v14  ;;  %v7659_v2 = vld [vmem:[%s10128_s7 + $0x8] sm:$0xff] }
 0x5c5   :  { %5239 = vmatmul.bf16.vlgmr.msra.gmra.mxu3 %v4892_v26 }
 0x5c6   :  { %5307 = vmatpush.bf16.msrb.mxu3 %v7659_v2  ;;  %5388 = vmatpush.bf16.msra.mxu2 %v7667_v35 }
 0x5ca   :  { %5308 = vmatpush.bf16.msrb.mxu3 %v7658_v34  ;;  %5389 = vmatpush.bf16.msra.mxu2 %v7666_v43 }
 0x5cd   :  { %7236 = vmatmul.msk.bf16.vlgmr.msrb.gmra.mxu2 %vm2096_vm0, %v4877_v62 }
 0x5ce   :  { %5390 = vmatpush.bf16.msra.mxu2 %v7665_v36  ;;  %5471 = vmatpush.bf16.msra.mxu3 %v7677_v60 }
 0x5d2   :  { %5391 = vmatpush.bf16.msra.mxu2 %v7664_v20  ;;  %5472 = vmatpush.bf16.msra.mxu3 %v7676_v53 }
 0x5d6   :  { %5392 = vmatpush.bf16.msra.mxu2 %v7663_v27  ;;  %5473 = vmatpush.bf16.msra.mxu3 %v7675_v7 }
 0x5da   :  { %5393 = vmatpush.bf16.msra.mxu2 %v7662_v11  ;;  %5474 = vmatpush.bf16.msra.mxu3 %v7674_v52 }
 0x5de   :  { %5475 = vmatpush.bf16.msra.mxu3 %v7673_v51 }
 0x5e2   :  { %5476 = vmatpush.bf16.msra.mxu3 %v7672_v13 }
 0x5e6   :  { %5477 = vmatpush.bf16.msra.mxu3 %v7671_v59 }
 0x5e8   :  { %v5198_v31 = vpop.f32.mrf.mxu2 }
 0x5e9   :  { %v5199_v30 = vadd.f32 %v7699_v10, %v5198_v31 }
 0x5ea   :  { %5478 = vmatpush.bf16.msra.mxu3 %v7670_v63 }
 0x5f0   :  { %v5200_v9 = vpop.f32.mrf.mxu2 }
 0x5f1   :  { %v5201_v47 = vadd.f32 %v7699_v10, %v5200_v9 }
 0x620   :  { %v5212_v4 = vpop.f32.mrf.mxu3 }
 0x621   :  { %v5213_v33 = vadd.f32 %v5212_v4, %v5199_v30 }
 0x628   :  { %v5214_v8 = vpop.f32.mrf.mxu3 }
 0x629   :  { %v5215_v55 = vadd.f32 %v5214_v8, %v5201_v47 }
 0x640   :  { %v5226_v48 = vpop.f32.mrf.mxu2 }
 0x641   :  { %v5227_v3 = vadd.f32 %v5226_v48, %v5213_v33 }
 0x648   :  { %v5228_v42 = vpop.f32.mrf.mxu2  ;;  %v5240_v41 = vpop.f32.mrf.mxu3 }
 0x649   :  { %v5229_v50 = vadd.f32 %v5228_v42, %v5215_v55  ;;  %v5241_v24 = vadd.f32 %v5240_v41, %v5227_v3 }
 0x650   :  { %v5254_v6 = vpop.f32.mrf.mxu2  ;;  %v5242_v45 = vpop.f32.mrf.mxu3 }
 0x651   :  { %v5243_v19 = vadd.f32 %v5242_v45, %v5229_v50  ;;  %v5255_v29 = vadd.f32 %v5254_v6, %v5241_v24 }
 0x653   :  { %v5259_v54 = vmax.f32 %v5255_v29, 0.0 }
 0x658   :  { %v5256_v56 = vpop.f32.mrf.mxu2 }
 0x659   :  { %v5257_v5 = vadd.f32 %v5256_v56, %v5243_v19 }
 0x65b   :  { %v5260_v17 = vmax.f32 %v5257_v5, 0.0 }
 0x65d   :  { %v5261_v40 = vpack.c.bf16 %v5260_v17, %v5259_v54 }
 0x65f   :  { %7253 = vmatmul.msk.bf16.vlgmr.msrb.gmra.mxu3 %vm2096_vm0, %v5261_v40 }
 0x6e2   :  { %v5310_v44 = vpop.f32.mrf.mxu3 }
 0x6e3   :  { %v5311_v1 = vadd.f32 %v7700_v32, %v5310_v44 }
 0x6e5   :  { %v5315_v18 = vmax.f32 %v5311_v1, 0.0 }
 0x6ea   :  { %v5312_v28 = vpop.f32.mrf.mxu3 }
 0x6eb   :  { %v5313_v57 = vadd.f32 %v7700_v32, %v5312_v28 }
 0x6ed   :  { %v5316_v46 = vmax.f32 %v5313_v57, 0.0 }
 0x6ef   :  { %v5317_v0 = vpack.c.bf16 %v5316_v46, %v5315_v18 }
 0x6f1   :  { %5394 = vmatmul.bf16.vlgmr.msra.gmra.mxu2 %v5317_v0 }
 0x774   :  { %v5395_v38 = vpop.f32.mrf.mxu2 }
 0x775   :  { %v5396_v37 = vadd.f32 %v7701_v58, %v5395_v38 }
 0x777   :  { %v5400_v15 = vmax.f32 %v5396_v37, 0.0 }
 0x77c   :  { %v5397_v21 = vpop.f32.mrf.mxu2 }
 0x77d   :  { %v5398_v12 = vadd.f32 %v7701_v58, %v5397_v21 }
 0x77f   :  { %v5401_v14 = vmax.f32 %v5398_v12, 0.0 }
 0x781   :  { %v5402_v26 = vpack.c.bf16 %v5401_v14, %v5400_v15 }
 0x783   :  { %5479 = vmatmul.bf16.vlgmr.msra.gmra.mxu3 %v5402_v26 }
 0x806   :  { %v5480_v49 = vpop.f32.mrf.mxu3 }
 0x807   :  { %v5481_v23 = vadd.f32 %v7702_v61, %v5480_v49 }
 0x809   :  { %5486 = vst.msk [vmem:[%s10133_s13] sm:$0xff] %vm5485_vm3, %v5481_v23 }
 0x80e   :  { %v5482_v62 = vpop.f32.mrf.mxu3 }
 0x80f   :  { %v5483_v25 = vadd.f32 %v7702_v61, %v5482_v62 }
 0x811   :  { %5487 = vst.msk [vmem:[%s10133_s13 + $0x8] sm:$0xff] %vm5485_vm3, %v5483_v25 }

</bundles_post_ra>
